<compile_context>
chip_gen: v7x
topology: tpu7x:2x2x1
jax: 0.10.0
libtpu: 0.0.40
codegen_flags: <defaults>
</compile_context>

<pallas_src>
import functools
import math

import jax
import jax.numpy as jnp
from jax import lax
from jax.experimental import pallas as pl
from jax.experimental.pallas import tpu as pltpu


# ------------------------- generation-aware VMEM limit ------------------------

def _compute_vmem_limit():
    try:
        cap = int(pltpu.get_tpu_info().vmem_capacity_bytes)   # 128 MiB v5e/v6e, 64 MiB v7x
    except Exception:
        cap = 64 * 1024 * 1024                                # conservative fallback
    # ~75% of physical leaves headroom for compiler-internal scratch on every generation
    return min((cap * 3) // 4, 100 * 1024 * 1024)


_VMEM_LIMIT = _compute_vmem_limit()


def _round_up(x, m):
    return ((x + m - 1) // m) * m


def _pick_tile(dim, target, align):
    """Largest divisor of `dim` that is <= target and a multiple of `align`."""
    if dim <= target:
        return dim
    for a in (align, 8):
        start = (target // a) * a
        for t in range(start, 0, -a):
            if dim % t == 0:
                return t
    # TODO(synk): dims reaching here should be padded by the caller (as done for the
    # vocab axis); full-dim fallback is correct but VMEM-heavy.
    return dim


def _head_group_size(n_heads, dh):
    """Smallest divisor of n_heads whose merged lane width (hg*Dh) is 128-aligned.
    Falls back to all heads (block covers the full lane extent) at tiny shapes."""
    for d in range(1, n_heads + 1):
        if n_heads % d == 0 and (d * dh) % 128 == 0:
            return d
    return n_heads


def _interleave_heads(mats, n_heads, dh, hg):
    """Concatenate projection matrices column-interleaved per head group:
    [m0_g | m1_g | ...] for each group g -> one contiguous lane block per grid step."""
    parts = []
    for g in range(n_heads // hg):
        lo, hi = g * hg * dh, (g + 1) * hg * dh
        for m in mats:
            parts.append(m[:, lo:hi])
    return jnp.concatenate(parts, axis=1)


# ----------------------------- tiled fused dense ------------------------------

def _dense_kernel(x_ref, w_ref, b_ref, o_ref, acc_ref, *, activation):
    @pl.when(pl.program_id(2) == 0)
    def _():
        acc_ref[...] = jnp.zeros_like(acc_ref)

    acc_ref[...] += jnp.dot(x_ref[...], w_ref[...],
                            preferred_element_type=jnp.float32)

    @pl.when(pl.program_id(2) == pl.num_programs(2) - 1)
    def _():
        y = acc_ref[...] + b_ref[...]
        if activation == "gelu":
            # exact (erf-based) GELU, BERT default; erf runs on the EUP
            y = 0.5 * y * (1.0 + lax.erf(y * (1.0 / math.sqrt(2.0))))
        o_ref[...] = y.astype(o_ref.dtype)


def dense(x, w, b, *, activation=None, out_dtype=jnp.bfloat16,
          tm_target=512, tn_target=1024, tk_target=1024):
    """o = act(x @ w + b).  x:[M,K], w:[K,N] (bf16), b:[N] (f32)."""
    M, K = x.shape
    _, N = w.shape
    tm = _pick_tile(M, tm_target, 16)     # bf16 sublane packing
    tn = _pick_tile(N, tn_target, 128)
    tk = _pick_tile(K, tk_target, 128)
    kernel = functools.partial(_dense_kernel, activation=activation)
    return pl.pallas_call(
        kernel,
        grid=(M // tm, N // tn, K // tk),
        in_specs=[
            pl.BlockSpec((tm, tk), lambda i, j, k: (i, k)),
            pl.BlockSpec((tk, tn), lambda i, j, k: (k, j)),
            pl.BlockSpec((1, tn), lambda i, j, k: (0, j)),
        ],
        out_specs=pl.BlockSpec((tm, tn), lambda i, j, k: (i, j)),
        out_shape=jax.ShapeDtypeStruct((M, N), out_dtype),
        scratch_shapes=[pltpu.VMEM((tm, tn), jnp.float32)],
        compiler_params=pltpu.CompilerParams(
            dimension_semantics=("parallel", "parallel", "arbitrary"),
            vmem_limit_bytes=_VMEM_LIMIT),
    )(x.astype(jnp.bfloat16), w, b.reshape(1, N).astype(jnp.float32))


# -------------------- dense + residual-add + LayerNorm fused ------------------

def _dense_res_ln_kernel(x_ref, w_ref, b_ref, r_ref, g_ref, bt_ref,
                         o_ref, acc_ref):
    @pl.when(pl.program_id(1) == 0)
    def _():
        acc_ref[...] = jnp.zeros_like(acc_ref)

    acc_ref[...] += jnp.dot(x_ref[...], w_ref[...],
                            preferred_element_type=jnp.float32)

    @pl.when(pl.program_id(1) == pl.num_programs(1) - 1)
    def _():
        y = acc_ref[...] + b_ref[...] + r_ref[...].astype(jnp.float32)
        mu = jnp.mean(y, axis=-1, keepdims=True)
        var = jnp.mean(jnp.square(y - mu), axis=-1, keepdims=True)
        yn = (y - mu) * lax.rsqrt(var + 1e-12)          # BERT LayerNorm eps
        o_ref[...] = (yn * g_ref[...] + bt_ref[...]).astype(o_ref.dtype)


def dense_res_ln(x, w, b, residual, gamma, beta, *, out_dtype=jnp.bfloat16,
                 tm_target=512, tk_target=1024):
    """o = LayerNorm(x @ w + b + residual).  Full N (=hidden) per block (needed for LN)."""
    M, K = x.shape
    _, N = w.shape
    tm = _pick_tile(M, tm_target, 16)
    tk = _pick_tile(K, tk_target, 128)
    return pl.pallas_call(
        _dense_res_ln_kernel,
        grid=(M // tm, K // tk),
        in_specs=[
            pl.BlockSpec((tm, tk), lambda i, k: (i, k)),
            pl.BlockSpec((tk, N), lambda i, k: (k, 0)),
            pl.BlockSpec((1, N), lambda i, k: (0, 0)),
            pl.BlockSpec((tm, N), lambda i, k: (i, 0)),
            pl.BlockSpec((1, N), lambda i, k: (0, 0)),
            pl.BlockSpec((1, N), lambda i, k: (0, 0)),
        ],
        out_specs=pl.BlockSpec((tm, N), lambda i, k: (i, 0)),
        out_shape=jax.ShapeDtypeStruct((M, N), out_dtype),
        scratch_shapes=[pltpu.VMEM((tm, N), jnp.float32)],
        compiler_params=pltpu.CompilerParams(
            dimension_semantics=("parallel", "arbitrary"),
            vmem_limit_bytes=_VMEM_LIMIT),
    )(x.astype(jnp.bfloat16), w, b.reshape(1, N).astype(jnp.float32),
      residual, gamma.reshape(1, N).astype(jnp.float32),
      beta.reshape(1, N).astype(jnp.float32))


# ------------------------------- row LayerNorm --------------------------------

def _layernorm_kernel(x_ref, g_ref, b_ref, o_ref):
    x = x_ref[...].astype(jnp.float32)
    mu = jnp.mean(x, axis=-1, keepdims=True)
    var = jnp.mean(jnp.square(x - mu), axis=-1, keepdims=True)
    y = (x - mu) * lax.rsqrt(var + 1e-12)
    o_ref[...] = (y * g_ref[...] + b_ref[...]).astype(o_ref.dtype)


def layernorm_rows(x2d, gamma, beta, *, out_dtype=jnp.bfloat16, tm_target=1024):
    M, H = x2d.shape
    tm = _pick_tile(M, tm_target, 8)
    return pl.pallas_call(
        _layernorm_kernel,
        grid=(M // tm,),
        in_specs=[
            pl.BlockSpec((tm, H), lambda i: (i, 0)),
            pl.BlockSpec((1, H), lambda i: (0, 0)),
            pl.BlockSpec((1, H), lambda i: (0, 0)),
        ],
        out_specs=pl.BlockSpec((tm, H), lambda i: (i, 0)),
        out_shape=jax.ShapeDtypeStruct((M, H), out_dtype),
        compiler_params=pltpu.CompilerParams(
            dimension_semantics=("parallel",), vmem_limit_bytes=_VMEM_LIMIT),
    )(x2d, gamma.reshape(1, H).astype(jnp.float32),
      beta.reshape(1, H).astype(jnp.float32))


# --------------------------------- attention -----------------------------------
# grid=(B, nH // hg): one head group per step. q/k/v come in lane-merged [B,S,*H]
# layout (group-interleaved fused projections), ctx is written lane-merged [B,S,H],
# past K/V are written directly as [B,nH,S,Dh]. The 1/sqrt(Dh) scale is folded into
# the Q projection weights.

def _self_attn_kernel(qkv_ref, am_ref, *out_refs, hg, dh, write_att):
    if write_att:
        ctx_ref, att_ref, ko_ref, vo_ref = out_refs
    else:
        ctx_ref, ko_ref, vo_ref = out_refs
        att_ref = None

    blk = qkv_ref[0]                     # (S, 3*hg*dh) bf16, layout [Qg | Kg | Vg]
    S = blk.shape[0]
    w = hg * dh
    q = blk[:, :w]
    k = blk[:, w:2 * w]
    v = blk[:, 2 * w:3 * w]

    # causal + padding additive mask built in-kernel (HF convention: (1-m)*-10000)
    am = am_ref[0]                       # (1, S) f32, 1 = keep
    rows = lax.broadcasted_iota(jnp.int32, (S, S), 0)
    cols = lax.broadcasted_iota(jnp.int32, (S, S), 1)
    causal = (cols <= rows).astype(jnp.float32)
    bias = (1.0 - causal * am) * (-10000.0)

    parts = []
    for h in range(hg):
        qh = q[:, h * dh:(h + 1) * dh]
        kh = k[:, h * dh:(h + 1) * dh]
        vh = v[:, h * dh:(h + 1) * dh]
        s = lax.dot_general(qh, kh, (((1,), (1,)), ((), ())),
                            preferred_element_type=jnp.float32) + bias
        s = s - jnp.max(s, axis=-1, keepdims=True)
        p = jnp.exp(s)
        p = p / jnp.sum(p, axis=-1, keepdims=True)      # exact division (parity)
        if write_att:
            att_ref[0, h] = p.astype(att_ref.dtype)
        ko_ref[0, h] = kh                               # past K/V written in-place
        vo_ref[0, h] = vh
        parts.append(jnp.dot(p.astype(vh.dtype), vh,
                             preferred_element_type=jnp.float32))
    ctx_ref[0] = jnp.concatenate(parts, axis=-1).astype(ctx_ref.dtype)


def _cross_attn_kernel(q_ref, kv_ref, ctx_ref, *, hg, dh):
    q = q_ref[0]                         # (S,  hg*dh)
    kvb = kv_ref[0]                      # (Se, 2*hg*dh), layout [Kg | Vg]
    w = hg * dh
    parts = []
    for h in range(hg):
        qh = q[:, h * dh:(h + 1) * dh]
        kh = kvb[:, h * dh:(h + 1) * dh]
        vh = kvb[:, w + h * dh: w + (h + 1) * dh]
        s = lax.dot_general(qh, kh, (((1,), (1,)), ((), ())),
                            preferred_element_type=jnp.float32)
        s = s - jnp.max(s, axis=-1, keepdims=True)
        p = jnp.exp(s)
        p = p / jnp.sum(p, axis=-1, keepdims=True)
        parts.append(jnp.dot(p.astype(vh.dtype), vh,
                             preferred_element_type=jnp.float32))
    ctx_ref[0] = jnp.concatenate(parts, axis=-1).astype(ctx_ref.dtype)


def self_attention(qkv_grp, att_mask, *, n_heads, dh, hg, output_attentions=True):
    """qkv_grp: [B, S, 3H] (group-interleaved), att_mask: [B, 1, S] f32 (1=keep)."""
    B, S, _ = qkv_grp.shape
    H = n_heads * dh
    G = n_heads // hg
    w = hg * dh
    kernel = functools.partial(_self_attn_kernel, hg=hg, dh=dh,
                               write_att=output_attentions)
    out_specs = [pl.BlockSpec((1, S, w), lambda b, g: (b, 0, g))]
    out_shape = [jax.ShapeDtypeStruct((B, S, H), jnp.bfloat16)]
    if output_attentions:
        out_specs.append(pl.BlockSpec((1, hg, S, S), lambda b, g: (b, g, 0, 0)))
        out_shape.append(jax.ShapeDtypeStruct((B, n_heads, S, S), jnp.bfloat16))
    out_specs += [pl.BlockSpec((1, hg, S, dh), lambda b, g: (b, g, 0, 0)),
                  pl.BlockSpec((1, hg, S, dh), lambda b, g: (b, g, 0, 0))]
    out_shape += [jax.ShapeDtypeStruct((B, n_heads, S, dh), jnp.bfloat16),
                  jax.ShapeDtypeStruct((B, n_heads, S, dh), jnp.bfloat16)]
    outs = pl.pallas_call(
        kernel,
        grid=(B, G),
        in_specs=[pl.BlockSpec((1, S, 3 * w), lambda b, g: (b, 0, g)),
                  pl.BlockSpec((1, 1, S), lambda b, g: (b, 0, 0))],
        out_specs=out_specs,
        out_shape=out_shape,
        compiler_params=pltpu.CompilerParams(
            dimension_semantics=("parallel", "parallel"),
            vmem_limit_bytes=_VMEM_LIMIT),
    )(qkv_grp, att_mask)
    if output_attentions:
        ctx, att, k_out, v_out = outs
    else:
        ctx, k_out, v_out = outs
        att = None
    return ctx, att, k_out, v_out


def cross_attention(qc, kv, *, n_heads, dh, hg):
    """qc: [B, S, H]; kv: [B, Se, 2H] (group-interleaved K|V). No mask (matches
    encoder_attention_mask=None) and no attention-prob writeback."""
    B, S, H = qc.shape
    _, Se, _ = kv.shape
    G = n_heads // hg
    w = hg * dh
    kernel = functools.partial(_cross_attn_kernel, hg=hg, dh=dh)
    return pl.pallas_call(
        kernel,
        grid=(B, G),
        in_specs=[pl.BlockSpec((1, S, w), lambda b, g: (b, 0, g)),
                  pl.BlockSpec((1, Se, 2 * w), lambda b, g: (b, 0, g))],
        out_specs=pl.BlockSpec((1, S, w), lambda b, g: (b, 0, g)),
        out_shape=jax.ShapeDtypeStruct((B, S, H), jnp.bfloat16),
        compiler_params=pltpu.CompilerParams(
            dimension_semantics=("parallel", "parallel"),
            vmem_limit_bytes=_VMEM_LIMIT),
    )(qc, kv)


# ------- lin_out fused with y_lengths masking and LogSoftmax over SEQ (dim=1) -------

def _linout_lsm_kernel(x_ref, w_ref, b_ref, keep_ref, o_ref, acc_ref):
    @pl.when(pl.program_id(2) == 0)
    def _():
        acc_ref[...] = jnp.zeros_like(acc_ref)

    acc_ref[...] += jnp.dot(x_ref[...], w_ref[...],
                            preferred_element_type=jnp.float32)

    @pl.when(pl.program_id(2) == pl.num_programs(2) - 1)
    def _():
        # rows past y_lengths were zeroed in the original before lin_out -> logits = bias
        logits = acc_ref[...] * keep_ref[0] + b_ref[...]        # (S, tv)
        m = jnp.max(logits, axis=0, keepdims=True)              # LogSoftmax over SEQ axis
        z = logits - m
        lse = jnp.log(jnp.sum(jnp.exp(z), axis=0, keepdims=True))
        o_ref[0] = (z - lse).astype(o_ref.dtype)


def linout_logsoftmax_seq(hidden2d, w, b, keep, *, batch, seq,
                          tv_target=2048, tk_target=1024):
    """hidden2d:[B*S,H] bf16, w:[H,Vpad] bf16, b:[Vpad], keep:[B,S,1] f32 -> [B,S,Vpad] f32."""
    M, K = hidden2d.shape
    _, Vp = w.shape
    tv = _pick_tile(Vp, tv_target, 128)
    tk = _pick_tile(K, tk_target, 128)
    return pl.pallas_call(
        _linout_lsm_kernel,
        grid=(batch, Vp // tv, K // tk),
        in_specs=[
            pl.BlockSpec((seq, tk), lambda b, j, k: (b, k)),
            pl.BlockSpec((tk, tv), lambda b, j, k: (k, j)),
            pl.BlockSpec((1, tv), lambda b, j, k: (0, j)),
            pl.BlockSpec((1, seq, 1), lambda b, j, k: (b, 0, 0)),
        ],
        out_specs=pl.BlockSpec((1, seq, tv), lambda b, j, k: (b, 0, j)),
        out_shape=jax.ShapeDtypeStruct((batch, seq, Vp), jnp.float32),
        scratch_shapes=[pltpu.VMEM((seq, tv), jnp.float32)],
        compiler_params=pltpu.CompilerParams(
            dimension_semantics=("parallel", "parallel", "arbitrary"),
            vmem_limit_bytes=_VMEM_LIMIT),
    )(hidden2d.astype(jnp.bfloat16), w, b.reshape(1, Vp).astype(jnp.float32),
      keep.astype(jnp.float32))


# ----------------------------- parameter construction -------------------------

def init_params(key, *, vocab_size, hidden, n_layers, n_heads, intermediate,
                max_pos, type_vocab=2):
    dh = hidden // n_heads
    hg = _head_group_size(n_heads, dh)
    scale = 1.0 / math.sqrt(dh)
    v_pad = _round_up(vocab_size, 128)   # lane-aligned vocab; padding sliced off later

    def nrm(k, shape, std=0.02):
        return (std * jax.random.normal(k, shape)).astype(jnp.float32)

    keys = iter(jax.random.split(key, 16 + n_layers * 16))
    lin_w = jnp.pad(nrm(next(keys), (hidden, vocab_size)),
                    ((0, 0), (0, v_pad - vocab_size)))
    p = {
        "word_emb": nrm(next(keys), (vocab_size, hidden)),
        "pos_emb": nrm(next(keys), (max_pos, hidden)),
        "type_emb": nrm(next(keys), (type_vocab, hidden)),
        "emb_ln_g": jnp.ones((hidden,), jnp.float32),
        "emb_ln_b": jnp.zeros((hidden,), jnp.float32),
        "lin_out_w": lin_w.astype(jnp.bfloat16),
        "lin_out_b": jnp.zeros((v_pad,), jnp.float32),
        "layers": [],
    }
    for _ in range(n_layers):
        q_w = nrm(next(keys), (hidden, hidden)) * scale   # 1/sqrt(Dh) folded into Q (bias 0)
        k_w = nrm(next(keys), (hidden, hidden))
        v_w = nrm(next(keys), (hidden, hidden))
        ck_w = nrm(next(keys), (hidden, hidden))
        cv_w = nrm(next(keys), (hidden, hidden))
        lp = {
            "qkv_w": _interleave_heads([q_w, k_w, v_w], n_heads, dh, hg).astype(jnp.bfloat16),
            "qkv_b": jnp.zeros((3 * hidden,), jnp.float32),
            "ao_w": nrm(next(keys), (hidden, hidden)).astype(jnp.bfloat16),
            "ao_b": jnp.zeros((hidden,), jnp.float32),
            "cq_w": (nrm(next(keys), (hidden, hidden)) * scale).astype(jnp.bfloat16),
            "cq_b": jnp.zeros((hidden,), jnp.float32),
            "ckv_w": _interleave_heads([ck_w, cv_w], n_heads, dh, hg).astype(jnp.bfloat16),
            "ckv_b": jnp.zeros((2 * hidden,), jnp.float32),
            "co_w": nrm(next(keys), (hidden, hidden)).astype(jnp.bfloat16),
            "co_b": jnp.zeros((hidden,), jnp.float32),
            "i_w": nrm(next(keys), (hidden, intermediate)).astype(jnp.bfloat16),
            "i_b": jnp.zeros((intermediate,), jnp.float32),
            "o_w": nrm(next(keys), (intermediate, hidden)).astype(jnp.bfloat16),
            "o_b": jnp.zeros((hidden,), jnp.float32),
        }
        for ln in ("ln1", "ln2", "ln3"):
            lp[ln + "_g"] = jnp.ones((hidden,), jnp.float32)
            lp[ln + "_b"] = jnp.zeros((hidden,), jnp.float32)
        p["layers"].append(lp)
    return p


# ------------------------------- decoder forward -------------------------------

def decoder_forward(params, y_tuple, X_att_mask, encoder_hidden_states, *,
                    n_heads, vocab_size, output_attentions=True):
    """Mirrors Decoder.forward. X_att_mask is accepted but (as in the original
    PyTorch code) unused. Layer activations / att / past are bf16 (f32 accumulation
    in-kernel) — compare against the f32 reference with a tolerance."""
    del X_att_mask
    y, y_lengths, y_att_mask = y_tuple
    B, S = y.shape
    _, Se, H = encoder_hidden_states.shape
    dh = H // n_heads
    hg = _head_group_size(n_heads, dh)
    M = B * S

    # ---- BERT embeddings (gathers in XLA) + LayerNorm kernel ----
    positions = jnp.arange(S)
    emb = (jnp.take(params["word_emb"], y, axis=0)
           + params["pos_emb"][positions][None, :, :]
           + params["type_emb"][0][None, None, :])
    hidden = layernorm_rows(emb.reshape(M, H), params["emb_ln_g"], params["emb_ln_b"])

    am = y_att_mask.astype(jnp.float32).reshape(B, 1, S)   # causal part built in-kernel
    enc2d = encoder_hidden_states.reshape(B * Se, H).astype(jnp.bfloat16)

    pasts, atts = [], []
    for lp in params["layers"]:
        # ---- self-attention: fused (group-interleaved) QKV projection ----
        qkv = dense(hidden, lp["qkv_w"], lp["qkv_b"]).reshape(B, S, 3 * H)
        ctx, att, k_out, v_out = self_attention(
            qkv, am, n_heads=n_heads, dh=dh, hg=hg,
            output_attentions=output_attentions)
        hidden = dense_res_ln(ctx.reshape(M, H), lp["ao_w"], lp["ao_b"],
                              hidden, lp["ln1_g"], lp["ln1_b"])
        pasts.append((k_out, v_out))      # (K, V) tuple, each [B,nH,S,Dh] (no stack copy)
        if output_attentions:
            atts.append(att)

        # ---- cross-attention to encoder states (fused, group-interleaved K|V) ----
        qc = dense(hidden, lp["cq_w"], lp["cq_b"]).reshape(B, S, H)
        kv = dense(enc2d, lp["ckv_w"], lp["ckv_b"]).reshape(B, Se, 2 * H)
        ctxc = cross_attention(qc, kv, n_heads=n_heads, dh=dh, hg=hg)
        hidden = dense_res_ln(ctxc.reshape(M, H), lp["co_w"], lp["co_b"],
                              hidden, lp["ln2_g"], lp["ln2_b"])

        # ---- feed-forward: GELU fused into intermediate matmul, LN fused into output ----
        inter = dense(hidden, lp["i_w"], lp["i_b"], activation="gelu")
        hidden = dense_res_ln(inter, lp["o_w"], lp["o_b"],
                              hidden, lp["ln3_g"], lp["ln3_b"])

    # ---- lin_out + "output[i,:len_i] = hidden[i,:len_i]" + LogSoftmax(dim=1), all fused ----
    keep = (jnp.arange(S)[None, :] < y_lengths[:, None]).astype(jnp.float32)
    log_probs = linout_logsoftmax_seq(
        hidden, params["lin_out_w"], params["lin_out_b"],
        keep.reshape(B, S, 1), batch=B, seq=S)[:, :, :vocab_size]

    # TODO(synk): the original returns HF BertModel's `past` (stacked (2,B,nH,S,Dh));
    # here each layer's past is the (K, V) tuple written directly by the attention kernel.
    return {"output": log_probs, "past": tuple(pasts),
            "att": tuple(atts) if output_attentions else None}


# -------------------------------------- main ------------------------------------

if __name__ == "__main__":
    # small, module-consistent shapes
    B, S, Se = 2, 8, 8
    HIDDEN, N_HEADS, N_LAYERS, INTER = 32, 4, 2, 64
    VOCAB, MAX_POS = 50, 16

    key = jax.random.PRNGKey(0)
    k_par, k_y, k_enc = jax.random.split(key, 3)

    params = init_params(k_par, vocab_size=VOCAB, hidden=HIDDEN, n_layers=N_LAYERS,
                         n_heads=N_HEADS, intermediate=INTER, max_pos=MAX_POS)

    y = jax.random.randint(k_y, (B, S), 0, VOCAB, dtype=jnp.int32)
    y_lengths = jnp.array([8, 5], dtype=jnp.int32)
    y_att_mask = (jnp.arange(S)[None, :] < y_lengths[:, None]).astype(jnp.int32)
    encoder_hidden_states = jax.random.normal(k_enc, (B, Se, HIDDEN), dtype=jnp.float32)

    fwd = jax.jit(functools.partial(decoder_forward, n_heads=N_HEADS, vocab_size=VOCAB))
    out = fwd(params, (y, y_lengths, y_att_mask), None, encoder_hidden_states)

    jax.block_until_ready(out["output"])
    jax.block_until_ready(out["past"])
    jax.block_until_ready(out["att"])

    assert out["output"].shape == (B, S, VOCAB)
    assert out["past"][0][0].shape == (B, N_HEADS, S, HIDDEN // N_HEADS)
    assert out["past"][0][1].shape == (B, N_HEADS, S, HIDDEN // N_HEADS)
    assert out["att"][0].shape == (B, N_HEADS, S, S)
    print("KERNEL_OK")
</pallas_src>

<mosaic_0001>
module attributes {stable_mosaic.version = 11 : i64} {
  func.func @_dense_kernel(%arg0: i32, %arg1: i32, %arg2: i32, %arg3: memref<16x32xbf16, #tpu.memory_space<vmem>>, %arg4: memref<32x96xbf16, #tpu.memory_space<vmem>>, %arg5: memref<1x96xf32, #tpu.memory_space<vmem>>, %arg6: memref<16x96xbf16, #tpu.memory_space<vmem>>, %arg7: memref<16x96xf32, #tpu.memory_space<vmem>>) attributes {dimension_semantics = [#tpu.dimension_semantics<parallel>, #tpu.dimension_semantics<parallel>, #tpu.dimension_semantics<arbitrary>], iteration_bounds = array<i64: 1, 1, 1>, scalar_prefetch = 0 : i64, scratch_operands = 1 : i64, tpu.core_type = #tpu.core_type<tc>, window_params = [{transform_indices = @transform_0, window_bounds = array<i64: 16, 32>}, {transform_indices = @transform_1, window_bounds = array<i64: 32, 96>}, {transform_indices = @transform_2, window_bounds = array<i64: 1, 96>}, {transform_indices = @transform_3, window_bounds = array<i64: 16, 96>}]} {
    %c0_i32 = arith.constant 0 : i32
    %0 = arith.cmpi eq, %arg2, %c0_i32 : i32
    %1 = arith.extui %0 : i1 to i32
    %c0_i32_0 = arith.constant 0 : i32
    %2 = arith.cmpi ne, %1, %c0_i32_0 : i32
    scf.if %2 {
      %cst_10 = arith.constant 0.000000e+00 : f32
      %12 = vector.broadcast %cst_10 : f32 to vector<16x96xf32>
      %c0_11 = arith.constant 0 : index
      %c0_12 = arith.constant 0 : index
      %13 = vector.load %arg7[%c0_11, %c0_12] : memref<16x96xf32, #tpu.memory_space<vmem>>, vector<16x96xf32>
      tpu.vector_store %arg7[%c0_11, %c0_12], %12 {strides = array<i32>} : memref<16x96xf32, #tpu.memory_space<vmem>>, vector<16x96xf32>,
    } else {
    }
    %c0 = arith.constant 0 : index
    %c0_1 = arith.constant 0 : index
    %3 = vector.load %arg7[%c0, %c0_1] : memref<16x96xf32, #tpu.memory_space<vmem>>, vector<16x96xf32>
    %c0_2 = arith.constant 0 : index
    %c0_3 = arith.constant 0 : index
    %4 = vector.load %arg3[%c0_2, %c0_3] : memref<16x32xbf16, #tpu.memory_space<vmem>>, vector<16x32xbf16>
    %c0_4 = arith.constant 0 : index
    %c0_5 = arith.constant 0 : index
    %5 = vector.load %arg4[%c0_4, %c0_5] : memref<32x96xbf16, #tpu.memory_space<vmem>>, vector<32x96xbf16>
    %cst = arith.constant dense<0.000000e+00> : vector<16x96xf32>
    %6 = tpu.matmul %4, %5, %cst {dimension_numbers = #tpu.dot_dimension_numbers<[1], [0], [0], [1], [0, 0, 1, 1], [], []>} : vector<16x32xbf16>, vector<32x96xbf16>, vector<16x96xf32> -> vector<16x96xf32>
    %7 = arith.addf %3, %6 : vector<16x96xf32>
    %c0_6 = arith.constant 0 : index
    %c0_7 = arith.constant 0 : index
    %8 = vector.load %arg7[%c0_6, %c0_7] : memref<16x96xf32, #tpu.memory_space<vmem>>, vector<16x96xf32>
    tpu.vector_store %arg7[%c0_6, %c0_7], %7 {strides = array<i32>} : memref<16x96xf32, #tpu.memory_space<vmem>>, vector<16x96xf32>,
    %c0_i32_8 = arith.constant 0 : i32
    %9 = arith.cmpi eq, %arg2, %c0_i32_8 : i32
    %10 = arith.extui %9 : i1 to i32
    %c0_i32_9 = arith.constant 0 : i32
    %11 = arith.cmpi ne, %10, %c0_i32_9 : i32
    scf.if %11 {
      %c0_10 = arith.constant 0 : index
      %c0_11 = arith.constant 0 : index
      %12 = vector.load %arg7[%c0_10, %c0_11] : memref<16x96xf32, #tpu.memory_space<vmem>>, vector<16x96xf32>
      %c0_12 = arith.constant 0 : index
      %c0_13 = arith.constant 0 : index
      %13 = vector.load %arg5[%c0_12, %c0_13] : memref<1x96xf32, #tpu.memory_space<vmem>>, vector<1x96xf32>
      %14 = vector.broadcast %13 : vector<1x96xf32> to vector<16x96xf32>
      %15 = arith.addf %12, %14 : vector<16x96xf32>
      %16 = arith.truncf %15 : vector<16x96xf32> to vector<16x96xbf16>
      %c0_14 = arith.constant 0 : index
      %c0_15 = arith.constant 0 : index
      %17 = vector.load %arg6[%c0_14, %c0_15] : memref<16x96xbf16, #tpu.memory_space<vmem>>, vector<16x96xbf16>
      tpu.vector_store %arg6[%c0_14, %c0_15], %16 {strides = array<i32>} : memref<16x96xbf16, #tpu.memory_space<vmem>>, vector<16x96xbf16>,
    } else {
    }
    return
  }
  func.func @transform_0(%arg0: i32, %arg1: i32, %arg2: i32) -> (i32, i32) {
    %c0_i32 = arith.constant 0 : i32
    return %arg0, %arg2 : i32, i32
  }
  func.func @transform_1(%arg0: i32, %arg1: i32, %arg2: i32) -> (i32, i32) {
    %c0_i32 = arith.constant 0 : i32
    return %arg2, %arg1 : i32, i32
  }
  func.func @transform_2(%arg0: i32, %arg1: i32, %arg2: i32) -> (i32, i32) {
    %c0_i32 = arith.constant 0 : i32
    %c0_i32_0 = arith.constant 0 : i32
    return %c0_i32, %arg1 : i32, i32
  }
  func.func @transform_3(%arg0: i32, %arg1: i32, %arg2: i32) -> (i32, i32) {
    %c0_i32 = arith.constant 0 : i32
    return %arg0, %arg1 : i32, i32
  }
}

module attributes {stable_mosaic.version = 11 : i64} {
  func.func @_dense_res_ln_kernel(%arg0: i32, %arg1: i32, %arg2: memref<16x32xbf16, #tpu.memory_space<vmem>>, %arg3: memref<32x32xbf16, #tpu.memory_space<vmem>>, %arg4: memref<1x32xf32, #tpu.memory_space<vmem>>, %arg5: memref<16x32xbf16, #tpu.memory_space<vmem>>, %arg6: memref<1x32xf32, #tpu.memory_space<vmem>>, %arg7: memref<1x32xf32, #tpu.memory_space<vmem>>, %arg8: memref<16x32xbf16, #tpu.memory_space<vmem>>, %arg9: memref<16x32xf32, #tpu.memory_space<vmem>>) attributes {dimension_semantics = [#tpu.dimension_semantics<parallel>, #tpu.dimension_semantics<arbitrary>], iteration_bounds = array<i64: 1, 1>, scalar_prefetch = 0 : i64, scratch_operands = 1 : i64, tpu.core_type = #tpu.core_type<tc>, window_params = [{transform_indices = @transform_0, window_bounds = array<i64: 16, 32>}, {transform_indices = @transform_1, window_bounds = array<i64: 32, 32>}, {pipeline_mode = #tpu.pipeline_mode<synchronous>, transform_indices = @transform_2, window_bounds = array<i64: 1, 32>}, {transform_indices = @transform_3, window_bounds = array<i64: 16, 32>}, {pipeline_mode = #tpu.pipeline_mode<synchronous>, transform_indices = @transform_4, window_bounds = array<i64: 1, 32>}, {pipeline_mode = #tpu.pipeline_mode<synchronous>, transform_indices = @transform_5, window_bounds = array<i64: 1, 32>}, {transform_indices = @transform_6, window_bounds = array<i64: 16, 32>}]} {
    %c0_i32 = arith.constant 0 : i32
    %0 = arith.cmpi eq, %arg1, %c0_i32 : i32
    %1 = arith.extui %0 : i1 to i32
    %c0_i32_0 = arith.constant 0 : i32
    %2 = arith.cmpi ne, %1, %c0_i32_0 : i32
    scf.if %2 {
      %cst_10 = arith.constant 0.000000e+00 : f32
      %12 = vector.broadcast %cst_10 : f32 to vector<16x32xf32>
      %c0_11 = arith.constant 0 : index
      %c0_12 = arith.constant 0 : index
      %13 = vector.load %arg9[%c0_11, %c0_12] : memref<16x32xf32, #tpu.memory_space<vmem>>, vector<16x32xf32>
      tpu.vector_store %arg9[%c0_11, %c0_12], %12 {strides = array<i32>} : memref<16x32xf32, #tpu.memory_space<vmem>>, vector<16x32xf32>,
    } else {
    }
    %c0 = arith.constant 0 : index
    %c0_1 = arith.constant 0 : index
    %3 = vector.load %arg9[%c0, %c0_1] : memref<16x32xf32, #tpu.memory_space<vmem>>, vector<16x32xf32>
    %c0_2 = arith.constant 0 : index
    %c0_3 = arith.constant 0 : index
    %4 = vector.load %arg2[%c0_2, %c0_3] : memref<16x32xbf16, #tpu.memory_space<vmem>>, vector<16x32xbf16>
    %c0_4 = arith.constant 0 : index
    %c0_5 = arith.constant 0 : index
    %5 = vector.load %arg3[%c0_4, %c0_5] : memref<32x32xbf16, #tpu.memory_space<vmem>>, vector<32x32xbf16>
    %cst = arith.constant dense<0.000000e+00> : vector<16x32xf32>
    %6 = tpu.matmul %4, %5, %cst {dimension_numbers = #tpu.dot_dimension_numbers<[1], [0], [0], [1], [0, 0, 1, 1], [], []>} : vector<16x32xbf16>, vector<32x32xbf16>, vector<16x32xf32> -> vector<16x32xf32>
    %7 = arith.addf %3, %6 : vector<16x32xf32>
    %c0_6 = arith.constant 0 : index
    %c0_7 = arith.constant 0 : index
    %8 = vector.load %arg9[%c0_6, %c0_7] : memref<16x32xf32, #tpu.memory_space<vmem>>, vector<16x32xf32>
    tpu.vector_store %arg9[%c0_6, %c0_7], %7 {strides = array<i32>} : memref<16x32xf32, #tpu.memory_space<vmem>>, vector<16x32xf32>,
    %c0_i32_8 = arith.constant 0 : i32
    %9 = arith.cmpi eq, %arg1, %c0_i32_8 : i32
    %10 = arith.extui %9 : i1 to i32
    %c0_i32_9 = arith.constant 0 : i32
    %11 = arith.cmpi ne, %10, %c0_i32_9 : i32
    scf.if %11 {
      %c0_10 = arith.constant 0 : index
      %c0_11 = arith.constant 0 : index
      %12 = vector.load %arg9[%c0_10, %c0_11] : memref<16x32xf32, #tpu.memory_space<vmem>>, vector<16x32xf32>
      %c0_12 = arith.constant 0 : index
      %c0_13 = arith.constant 0 : index
      %13 = vector.load %arg4[%c0_12, %c0_13] : memref<1x32xf32, #tpu.memory_space<vmem>>, vector<1x32xf32>
      %14 = vector.broadcast %13 : vector<1x32xf32> to vector<16x32xf32>
      %15 = arith.addf %12, %14 : vector<16x32xf32>
      %c0_14 = arith.constant 0 : index
      %c0_15 = arith.constant 0 : index
      %16 = vector.load %arg5[%c0_14, %c0_15] : memref<16x32xbf16, #tpu.memory_space<vmem>>, vector<16x32xbf16>
      %17 = arith.extf %16 : vector<16x32xbf16> to vector<16x32xf32>
      %18 = arith.addf %15, %17 : vector<16x32xf32>
      %cst_16 = arith.constant dense<0.000000e+00> : vector<16xf32>
      %19 = vector.multi_reduction <add>, %18, %cst_16 [1] : vector<16x32xf32> to vector<16xf32>
      %20 = vector.shape_cast %19 : vector<16xf32> to vector<16x1xf32>
      %cst_17 = arith.constant 3.200000e+01 : f32
      %21 = vector.broadcast %cst_17 : f32 to vector<16x1xf32>
      %22 = arith.divf %20, %21 : vector<16x1xf32>
      %23 = vector.broadcast %22 : vector<16x1xf32> to vector<16x32xf32>
      %24 = arith.subf %18, %23 : vector<16x32xf32>
      %25 = arith.mulf %24, %24 : vector<16x32xf32>
      %cst_18 = arith.constant dense<0.000000e+00> : vector<16xf32>
      %26 = vector.multi_reduction <add>, %25, %cst_18 [1] : vector<16x32xf32> to vector<16xf32>
      %27 = vector.shape_cast %26 : vector<16xf32> to vector<16x1xf32>
      %cst_19 = arith.constant 3.200000e+01 : f32
      %28 = vector.broadcast %cst_19 : f32 to vector<16x1xf32>
      %29 = arith.divf %27, %28 : vector<16x1xf32>
      %30 = vector.broadcast %22 : vector<16x1xf32> to vector<16x32xf32>
      %31 = arith.subf %18, %30 : vector<16x32xf32>
      %cst_20 = arith.constant 9.99999996E-13 : f32
      %32 = vector.broadcast %cst_20 : f32 to vector<16x1xf32>
      %33 = arith.addf %29, %32 : vector<16x1xf32>
      %34 = math.rsqrt %33 : vector<16x1xf32>
      %35 = vector.broadcast %34 : vector<16x1xf32> to vector<16x32xf32>
      %36 = arith.mulf %31, %35 : vector<16x32xf32>
      %c0_21 = arith.constant 0 : index
      %c0_22 = arith.constant 0 : index
      %37 = vector.load %arg6[%c0_21, %c0_22] : memref<1x32xf32, #tpu.memory_space<vmem>>, vector<1x32xf32>
      %38 = vector.broadcast %37 : vector<1x32xf32> to vector<16x32xf32>
      %39 = arith.mulf %36, %38 : vector<16x32xf32>
      %c0_23 = arith.constant 0 : index
      %c0_24 = arith.constant 0 : index
      %40 = vector.load %arg7[%c0_23, %c0_24] : memref<1x32xf32, #tpu.memory_space<vmem>>, vector<1x32xf32>
      %41 = vector.broadcast %40 : vector<1x32xf32> to vector<16x32xf32>
      %42 = arith.addf %39, %41 : vector<16x32xf32>
      %43 = arith.truncf %42 : vector<16x32xf32> to vector<16x32xbf16>
      %c0_25 = arith.constant 0 : index
      %c0_26 = arith.constant 0 : index
      %44 = vector.load %arg8[%c0_25, %c0_26] : memref<16x32xbf16, #tpu.memory_space<vmem>>, vector<16x32xbf16>
      tpu.vector_store %arg8[%c0_25, %c0_26], %43 {strides = array<i32>} : memref<16x32xbf16, #tpu.memory_space<vmem>>, vector<16x32xbf16>,
    } else {
    }
    return
  }
  func.func @transform_0(%arg0: i32, %arg1: i32) -> (i32, i32) {
    %c0_i32 = arith.constant 0 : i32
    return %arg0, %arg1 : i32, i32
  }
  func.func @transform_1(%arg0: i32, %arg1: i32) -> (i32, i32) {
    %c0_i32 = arith.constant 0 : i32
    %c0_i32_0 = arith.constant 0 : i32
    return %arg1, %c0_i32 : i32, i32
  }
  func.func @transform_2(%arg0: i32, %arg1: i32) -> (i32, i32) {
    %c0_i32 = arith.constant 0 : i32
    %c0_i32_0 = arith.constant 0 : i32
    %c0_i32_1 = arith.constant 0 : i32
    return %c0_i32, %c0_i32_0 : i32, i32
  }
  func.func @transform_3(%arg0: i32, %arg1: i32) -> (i32, i32) {
    %c0_i32 = arith.constant 0 : i32
    %c0_i32_0 = arith.constant 0 : i32
    return %arg0, %c0_i32 : i32, i32
  }
  func.func @transform_4(%arg0: i32, %arg1: i32) -> (i32, i32) {
    %c0_i32 = arith.constant 0 : i32
    %c0_i32_0 = arith.constant 0 : i32
    %c0_i32_1 = arith.constant 0 : i32
    return %c0_i32, %c0_i32_0 : i32, i32
  }
  func.func @transform_5(%arg0: i32, %arg1: i32) -> (i32, i32) {
    %c0_i32 = arith.constant 0 : i32
    %c0_i32_0 = arith.constant 0 : i32
    %c0_i32_1 = arith.constant 0 : i32
    return %c0_i32, %c0_i32_0 : i32, i32
  }
  func.func @transform_6(%arg0: i32, %arg1: i32) -> (i32, i32) {
    %c0_i32 = arith.constant 0 : i32
    %c0_i32_0 = arith.constant 0 : i32
    return %arg0, %c0_i32 : i32, i32
  }
}

module attributes {stable_mosaic.version = 11 : i64} {
  func.func @_layernorm_kernel(%arg0: i32, %arg1: memref<16x32xf32, #tpu.memory_space<vmem>>, %arg2: memref<1x32xf32, #tpu.memory_space<vmem>>, %arg3: memref<1x32xf32, #tpu.memory_space<vmem>>, %arg4: memref<16x32xbf16, #tpu.memory_space<vmem>>) attributes {dimension_semantics = [#tpu.dimension_semantics<parallel>], iteration_bounds = array<i64: 1>, scalar_prefetch = 0 : i64, scratch_operands = 0 : i64, tpu.core_type = #tpu.core_type<tc>, window_params = [{transform_indices = @transform_0, window_bounds = array<i64: 16, 32>}, {pipeline_mode = #tpu.pipeline_mode<synchronous>, transform_indices = @transform_1, window_bounds = array<i64: 1, 32>}, {pipeline_mode = #tpu.pipeline_mode<synchronous>, transform_indices = @transform_2, window_bounds = array<i64: 1, 32>}, {transform_indices = @transform_3, window_bounds = array<i64: 16, 32>}]} {
    %c0 = arith.constant 0 : index
    %c0_0 = arith.constant 0 : index
    %0 = vector.load %arg1[%c0, %c0_0] : memref<16x32xf32, #tpu.memory_space<vmem>>, vector<16x32xf32>
    %cst = arith.constant dense<0.000000e+00> : vector<16xf32>
    %1 = vector.multi_reduction <add>, %0, %cst [1] : vector<16x32xf32> to vector<16xf32>
    %2 = vector.shape_cast %1 : vector<16xf32> to vector<16x1xf32>
    %cst_1 = arith.constant 3.200000e+01 : f32
    %3 = vector.broadcast %cst_1 : f32 to vector<16x1xf32>
    %4 = arith.divf %2, %3 : vector<16x1xf32>
    %5 = vector.broadcast %4 : vector<16x1xf32> to vector<16x32xf32>
    %6 = arith.subf %0, %5 : vector<16x32xf32>
    %7 = arith.mulf %6, %6 : vector<16x32xf32>
    %cst_2 = arith.constant dense<0.000000e+00> : vector<16xf32>
    %8 = vector.multi_reduction <add>, %7, %cst_2 [1] : vector<16x32xf32> to vector<16xf32>
    %9 = vector.shape_cast %8 : vector<16xf32> to vector<16x1xf32>
    %cst_3 = arith.constant 3.200000e+01 : f32
    %10 = vector.broadcast %cst_3 : f32 to vector<16x1xf32>
    %11 = arith.divf %9, %10 : vector<16x1xf32>
    %12 = vector.broadcast %4 : vector<16x1xf32> to vector<16x32xf32>
    %13 = arith.subf %0, %12 : vector<16x32xf32>
    %cst_4 = arith.constant 9.99999996E-13 : f32
    %14 = vector.broadcast %cst_4 : f32 to vector<16x1xf32>
    %15 = arith.addf %11, %14 : vector<16x1xf32>
    %16 = math.rsqrt %15 : vector<16x1xf32>
    %17 = vector.broadcast %16 : vector<16x1xf32> to vector<16x32xf32>
    %18 = arith.mulf %13, %17 : vector<16x32xf32>
    %c0_5 = arith.constant 0 : index
    %c0_6 = arith.constant 0 : index
    %19 = vector.load %arg2[%c0_5, %c0_6] : memref<1x32xf32, #tpu.memory_space<vmem>>, vector<1x32xf32>
    %20 = vector.broadcast %19 : vector<1x32xf32> to vector<16x32xf32>
    %21 = arith.mulf %18, %20 : vector<16x32xf32>
    %c0_7 = arith.constant 0 : index
    %c0_8 = arith.constant 0 : index
    %22 = vector.load %arg3[%c0_7, %c0_8] : memref<1x32xf32, #tpu.memory_space<vmem>>, vector<1x32xf32>
    %23 = vector.broadcast %22 : vector<1x32xf32> to vector<16x32xf32>
    %24 = arith.addf %21, %23 : vector<16x32xf32>
    %25 = arith.truncf %24 : vector<16x32xf32> to vector<16x32xbf16>
    %c0_9 = arith.constant 0 : index
    %c0_10 = arith.constant 0 : index
    %26 = vector.load %arg4[%c0_9, %c0_10] : memref<16x32xbf16, #tpu.memory_space<vmem>>, vector<16x32xbf16>
    tpu.vector_store %arg4[%c0_9, %c0_10], %25 {strides = array<i32>} : memref<16x32xbf16, #tpu.memory_space<vmem>>, vector<16x32xbf16>,
    return
  }
  func.func @transform_0(%arg0: i32) -> (i32, i32) {
    %c0_i32 = arith.constant 0 : i32
    %c0_i32_0 = arith.constant 0 : i32
    return %arg0, %c0_i32 : i32, i32
  }
  func.func @transform_1(%arg0: i32) -> (i32, i32) {
    %c0_i32 = arith.constant 0 : i32
    %c0_i32_0 = arith.constant 0 : i32
    %c0_i32_1 = arith.constant 0 : i32
    return %c0_i32, %c0_i32_0 : i32, i32
  }
  func.func @transform_2(%arg0: i32) -> (i32, i32) {
    %c0_i32 = arith.constant 0 : i32
    %c0_i32_0 = arith.constant 0 : i32
    %c0_i32_1 = arith.constant 0 : i32
    return %c0_i32, %c0_i32_0 : i32, i32
  }
  func.func @transform_3(%arg0: i32) -> (i32, i32) {
    %c0_i32 = arith.constant 0 : i32
    %c0_i32_0 = arith.constant 0 : i32
    return %arg0, %c0_i32 : i32, i32
  }
}

module attributes {stable_mosaic.version = 11 : i64} {
  func.func @_self_attn_kernel(%arg0: i32, %arg1: i32, %arg2: memref<1x8x96xbf16, #tpu.memory_space<vmem>>, %arg3: memref<1x1x8xf32, #tpu.memory_space<vmem>>, %arg4: memref<1x8x32xbf16, #tpu.memory_space<vmem>>, %arg5: memref<1x4x8x8xbf16, #tpu.memory_space<vmem>>, %arg6: memref<1x4x8x8xbf16, #tpu.memory_space<vmem>>, %arg7: memref<1x4x8x8xbf16, #tpu.memory_space<vmem>>) attributes {dimension_semantics = [#tpu.dimension_semantics<parallel>, #tpu.dimension_semantics<parallel>], iteration_bounds = array<i64: 2, 1>, scalar_prefetch = 0 : i64, scratch_operands = 0 : i64, tpu.core_type = #tpu.core_type<tc>, window_params = [{transform_indices = @transform_0, window_bounds = array<i64: 1, 8, 96>}, {transform_indices = @transform_1, window_bounds = array<i64: 1, 1, 8>}, {transform_indices = @transform_2, window_bounds = array<i64: 1, 8, 32>}, {transform_indices = @transform_3, window_bounds = array<i64: 1, 4, 8, 8>}, {transform_indices = @transform_4, window_bounds = array<i64: 1, 4, 8, 8>}, {transform_indices = @transform_5, window_bounds = array<i64: 1, 4, 8, 8>}]} {
    %c0 = arith.constant 0 : index
    %c0_0 = arith.constant 0 : index
    %c0_1 = arith.constant 0 : index
    %0 = vector.load %arg2[%c0, %c0_0, %c0_1] : memref<1x8x96xbf16, #tpu.memory_space<vmem>>, vector<1x8x96xbf16>
    %1 = vector.shape_cast %0 : vector<1x8x96xbf16> to vector<8x96xbf16>
    %2 = vector.extract_strided_slice %1 {offsets = [0, 0], sizes = [8, 32], strides = [1, 1]} : vector<8x96xbf16> to vector<8x32xbf16>
    %3 = vector.extract_strided_slice %1 {offsets = [0, 32], sizes = [8, 32], strides = [1, 1]} : vector<8x96xbf16> to vector<8x32xbf16>
    %4 = vector.extract_strided_slice %1 {offsets = [0, 64], sizes = [8, 32], strides = [1, 1]} : vector<8x96xbf16> to vector<8x32xbf16>
    %c0_2 = arith.constant 0 : index
    %c0_3 = arith.constant 0 : index
    %c0_4 = arith.constant 0 : index
    %5 = vector.load %arg3[%c0_2, %c0_3, %c0_4] : memref<1x1x8xf32, #tpu.memory_space<vmem>>, vector<1x1x8xf32>
    %6 = vector.shape_cast %5 : vector<1x1x8xf32> to vector<1x8xf32>
    %7 = tpu.iota {dimensions = array<i32: 0>} : vector<8x8xi32>
    %8 = tpu.iota {dimensions = array<i32: 1>} : vector<8x8xi32>
    %9 = arith.cmpi sle, %8, %7 : vector<8x8xi32>
    %10 = arith.extui %9 : vector<8x8xi1> to vector<8x8xi32>
    %11 = arith.sitofp %10 : vector<8x8xi32> to vector<8x8xf32>
    %12 = vector.broadcast %6 : vector<1x8xf32> to vector<8x8xf32>
    %13 = arith.mulf %11, %12 : vector<8x8xf32>
    %cst = arith.constant 1.000000e+00 : f32
    %14 = vector.broadcast %cst : f32 to vector<8x8xf32>
    %15 = arith.subf %14, %13 : vector<8x8xf32>
    %cst_5 = arith.constant -1.000000e+04 : f32
    %16 = vector.broadcast %cst_5 : f32 to vector<8x8xf32>
    %17 = arith.mulf %15, %16 : vector<8x8xf32>
    %18 = vector.extract_strided_slice %2 {offsets = [0, 0], sizes = [8, 8], strides = [1, 1]} : vector<8x32xbf16> to vector<8x8xbf16>
    %19 = vector.extract_strided_slice %3 {offsets = [0, 0], sizes = [8, 8], strides = [1, 1]} : vector<8x32xbf16> to vector<8x8xbf16>
    %20 = vector.extract_strided_slice %4 {offsets = [0, 0], sizes = [8, 8], strides = [1, 1]} : vector<8x32xbf16> to vector<8x8xbf16>
    %cst_6 = arith.constant dense<0.000000e+00> : vector<8x8xf32>
    %21 = tpu.matmul %18, %19, %cst_6 {dimension_numbers = #tpu.dot_dimension_numbers<[1], [1], [0], [0], [0, 0, 1, 0], [], []>} : vector<8x8xbf16>, vector<8x8xbf16>, vector<8x8xf32> -> vector<8x8xf32>
    %22 = arith.addf %21, %17 : vector<8x8xf32>
    %cst_7 = arith.constant dense<0xFF800000> : vector<8xf32>
    %23 = vector.multi_reduction <maximumf>, %22, %cst_7 [1] : vector<8x8xf32> to vector<8xf32>
    %24 = vector.shape_cast %23 : vector<8xf32> to vector<8x1xf32>
    %25 = vector.broadcast %24 : vector<8x1xf32> to vector<8x8xf32>
    %26 = arith.subf %22, %25 : vector<8x8xf32>
    %27 = math.exp %26 : vector<8x8xf32>
    %cst_8 = arith.constant dense<0.000000e+00> : vector<8xf32>
    %28 = vector.multi_reduction <add>, %27, %cst_8 [1] : vector<8x8xf32> to vector<8xf32>
    %29 = vector.shape_cast %28 : vector<8xf32> to vector<8x1xf32>
    %30 = vector.broadcast %29 : vector<8x1xf32> to vector<8x8xf32>
    %31 = arith.divf %27, %30 : vector<8x8xf32>
    %32 = arith.truncf %31 : vector<8x8xf32> to vector<8x8xbf16>
    %c0_9 = arith.constant 0 : index
    %c0_10 = arith.constant 0 : index
    %c0_11 = arith.constant 0 : index
    %c0_12 = arith.constant 0 : index
    %33 = vector.load %arg5[%c0_9, %c0_10, %c0_11, %c0_12] : memref<1x4x8x8xbf16, #tpu.memory_space<vmem>>, vector<1x1x8x8xbf16>
    %34 = vector.shape_cast %33 : vector<1x1x8x8xbf16> to vector<8x8xbf16>
    %35 = vector.shape_cast %32 : vector<8x8xbf16> to vector<1x1x8x8xbf16>
    tpu.vector_store %arg5[%c0_9, %c0_10, %c0_11, %c0_12], %35 {strides = array<i32>} : memref<1x4x8x8xbf16, #tpu.memory_space<vmem>>, vector<1x1x8x8xbf16>,
    %c0_13 = arith.constant 0 : index
    %c0_14 = arith.constant 0 : index
    %c0_15 = arith.constant 0 : index
    %c0_16 = arith.constant 0 : index
    %36 = vector.load %arg6[%c0_13, %c0_14, %c0_15, %c0_16] : memref<1x4x8x8xbf16, #tpu.memory_space<vmem>>, vector<1x1x8x8xbf16>
    %37 = vector.shape_cast %36 : vector<1x1x8x8xbf16> to vector<8x8xbf16>
    %38 = vector.shape_cast %19 : vector<8x8xbf16> to vector<1x1x8x8xbf16>
    tpu.vector_store %arg6[%c0_13, %c0_14, %c0_15, %c0_16], %38 {strides = array<i32>} : memref<1x4x8x8xbf16, #tpu.memory_space<vmem>>, vector<1x1x8x8xbf16>,
    %c0_17 = arith.constant 0 : index
    %c0_18 = arith.constant 0 : index
    %c0_19 = arith.constant 0 : index
    %c0_20 = arith.constant 0 : index
    %39 = vector.load %arg7[%c0_17, %c0_18, %c0_19, %c0_20] : memref<1x4x8x8xbf16, #tpu.memory_space<vmem>>, vector<1x1x8x8xbf16>
    %40 = vector.shape_cast %39 : vector<1x1x8x8xbf16> to vector<8x8xbf16>
    %41 = vector.shape_cast %20 : vector<8x8xbf16> to vector<1x1x8x8xbf16>
    tpu.vector_store %arg7[%c0_17, %c0_18, %c0_19, %c0_20], %41 {strides = array<i32>} : memref<1x4x8x8xbf16, #tpu.memory_space<vmem>>, vector<1x1x8x8xbf16>,
    %42 = arith.truncf %31 : vector<8x8xf32> to vector<8x8xbf16>
    %cst_21 = arith.constant dense<0.000000e+00> : vector<8x8xf32>
    %43 = tpu.matmul %42, %20, %cst_21 {dimension_numbers = #tpu.dot_dimension_numbers<[1], [0], [0], [1], [0, 0, 1, 1], [], []>} : vector<8x8xbf16>, vector<8x8xbf16>, vector<8x8xf32> -> vector<8x8xf32>
    %44 = vector.extract_strided_slice %2 {offsets = [0, 8], sizes = [8, 8], strides = [1, 1]} : vector<8x32xbf16> to vector<8x8xbf16>
    %45 = vector.extract_strided_slice %3 {offsets = [0, 8], sizes = [8, 8], strides = [1, 1]} : vector<8x32xbf16> to vector<8x8xbf16>
    %46 = vector.extract_strided_slice %4 {offsets = [0, 8], sizes = [8, 8], strides = [1, 1]} : vector<8x32xbf16> to vector<8x8xbf16>
    %cst_22 = arith.constant dense<0.000000e+00> : vector<8x8xf32>
    %47 = tpu.matmul %44, %45, %cst_22 {dimension_numbers = #tpu.dot_dimension_numbers<[1], [1], [0], [0], [0, 0, 1, 0], [], []>} : vector<8x8xbf16>, vector<8x8xbf16>, vector<8x8xf32> -> vector<8x8xf32>
    %48 = arith.addf %47, %17 : vector<8x8xf32>
    %cst_23 = arith.constant dense<0xFF800000> : vector<8xf32>
    %49 = vector.multi_reduction <maximumf>, %48, %cst_23 [1] : vector<8x8xf32> to vector<8xf32>
    %50 = vector.shape_cast %49 : vector<8xf32> to vector<8x1xf32>
    %51 = vector.broadcast %50 : vector<8x1xf32> to vector<8x8xf32>
    %52 = arith.subf %48, %51 : vector<8x8xf32>
    %53 = math.exp %52 : vector<8x8xf32>
    %cst_24 = arith.constant dense<0.000000e+00> : vector<8xf32>
    %54 = vector.multi_reduction <add>, %53, %cst_24 [1] : vector<8x8xf32> to vector<8xf32>
    %55 = vector.shape_cast %54 : vector<8xf32> to vector<8x1xf32>
    %56 = vector.broadcast %55 : vector<8x1xf32> to vector<8x8xf32>
    %57 = arith.divf %53, %56 : vector<8x8xf32>
    %58 = arith.truncf %57 : vector<8x8xf32> to vector<8x8xbf16>
    %c0_25 = arith.constant 0 : index
    %c1 = arith.constant 1 : index
    %c0_26 = arith.constant 0 : index
    %c0_27 = arith.constant 0 : index
    %59 = vector.load %arg5[%c0_25, %c1, %c0_26, %c0_27] : memref<1x4x8x8xbf16, #tpu.memory_space<vmem>>, vector<1x1x8x8xbf16>
    %60 = vector.shape_cast %59 : vector<1x1x8x8xbf16> to vector<8x8xbf16>
    %61 = vector.shape_cast %58 : vector<8x8xbf16> to vector<1x1x8x8xbf16>
    tpu.vector_store %arg5[%c0_25, %c1, %c0_26, %c0_27], %61 {strides = array<i32>} : memref<1x4x8x8xbf16, #tpu.memory_space<vmem>>, vector<1x1x8x8xbf16>,
    %c0_28 = arith.constant 0 : index
    %c1_29 = arith.constant 1 : index
    %c0_30 = arith.constant 0 : index
    %c0_31 = arith.constant 0 : index
    %62 = vector.load %arg6[%c0_28, %c1_29, %c0_30, %c0_31] : memref<1x4x8x8xbf16, #tpu.memory_space<vmem>>, vector<1x1x8x8xbf16>
    %63 = vector.shape_cast %62 : vector<1x1x8x8xbf16> to vector<8x8xbf16>
    %64 = vector.shape_cast %45 : vector<8x8xbf16> to vector<1x1x8x8xbf16>
    tpu.vector_store %arg6[%c0_28, %c1_29, %c0_30, %c0_31], %64 {strides = array<i32>} : memref<1x4x8x8xbf16, #tpu.memory_space<vmem>>, vector<1x1x8x8xbf16>,
    %c0_32 = arith.constant 0 : index
    %c1_33 = arith.constant 1 : index
    %c0_34 = arith.constant 0 : index
    %c0_35 = arith.constant 0 : index
    %65 = vector.load %arg7[%c0_32, %c1_33, %c0_34, %c0_35] : memref<1x4x8x8xbf16, #tpu.memory_space<vmem>>, vector<1x1x8x8xbf16>
    %66 = vector.shape_cast %65 : vector<1x1x8x8xbf16> to vector<8x8xbf16>
    %67 = vector.shape_cast %46 : vector<8x8xbf16> to vector<1x1x8x8xbf16>
    tpu.vector_store %arg7[%c0_32, %c1_33, %c0_34, %c0_35], %67 {strides = array<i32>} : memref<1x4x8x8xbf16, #tpu.memory_space<vmem>>, vector<1x1x8x8xbf16>,
    %68 = arith.truncf %57 : vector<8x8xf32> to vector<8x8xbf16>
    %cst_36 = arith.constant dense<0.000000e+00> : vector<8x8xf32>
    %69 = tpu.matmul %68, %46, %cst_36 {dimension_numbers = #tpu.dot_dimension_numbers<[1], [0], [0], [1], [0, 0, 1, 1], [], []>} : vector<8x8xbf16>, vector<8x8xbf16>, vector<8x8xf32> -> vector<8x8xf32>
    %70 = vector.extract_strided_slice %2 {offsets = [0, 16], sizes = [8, 8], strides = [1, 1]} : vector<8x32xbf16> to vector<8x8xbf16>
    %71 = vector.extract_strided_slice %3 {offsets = [0, 16], sizes = [8, 8], strides = [1, 1]} : vector<8x32xbf16> to vector<8x8xbf16>
    %72 = vector.extract_strided_slice %4 {offsets = [0, 16], sizes = [8, 8], strides = [1, 1]} : vector<8x32xbf16> to vector<8x8xbf16>
    %cst_37 = arith.constant dense<0.000000e+00> : vector<8x8xf32>
    %73 = tpu.matmul %70, %71, %cst_37 {dimension_numbers = #tpu.dot_dimension_numbers<[1], [1], [0], [0], [0, 0, 1, 0], [], []>} : vector<8x8xbf16>, vector<8x8xbf16>, vector<8x8xf32> -> vector<8x8xf32>
    %74 = arith.addf %73, %17 : vector<8x8xf32>
    %cst_38 = arith.constant dense<0xFF800000> : vector<8xf32>
    %75 = vector.multi_reduction <maximumf>, %74, %cst_38 [1] : vector<8x8xf32> to vector<8xf32>
    %76 = vector.shape_cast %75 : vector<8xf32> to vector<8x1xf32>
    %77 = vector.broadcast %76 : vector<8x1xf32> to vector<8x8xf32>
    %78 = arith.subf %74, %77 : vector<8x8xf32>
    %79 = math.exp %78 : vector<8x8xf32>
    %cst_39 = arith.constant dense<0.000000e+00> : vector<8xf32>
    %80 = vector.multi_reduction <add>, %79, %cst_39 [1] : vector<8x8xf32> to vector<8xf32>
    %81 = vector.shape_cast %80 : vector<8xf32> to vector<8x1xf32>
    %82 = vector.broadcast %81 : vector<8x1xf32> to vector<8x8xf32>
    %83 = arith.divf %79, %82 : vector<8x8xf32>
    %84 = arith.truncf %83 : vector<8x8xf32> to vector<8x8xbf16>
    %c0_40 = arith.constant 0 : index
    %c2 = arith.constant 2 : index
    %c0_41 = arith.constant 0 : index
    %c0_42 = arith.constant 0 : index
    %85 = vector.load %arg5[%c0_40, %c2, %c0_41, %c0_42] : memref<1x4x8x8xbf16, #tpu.memory_space<vmem>>, vector<1x1x8x8xbf16>
    %86 = vector.shape_cast %85 : vector<1x1x8x8xbf16> to vector<8x8xbf16>
    %87 = vector.shape_cast %84 : vector<8x8xbf16> to vector<1x1x8x8xbf16>
    tpu.vector_store %arg5[%c0_40, %c2, %c0_41, %c0_42], %87 {strides = array<i32>} : memref<1x4x8x8xbf16, #tpu.memory_space<vmem>>, vector<1x1x8x8xbf16>,
    %c0_43 = arith.constant 0 : index
    %c2_44 = arith.constant 2 : index
    %c0_45 = arith.constant 0 : index
    %c0_46 = arith.constant 0 : index
    %88 = vector.load %arg6[%c0_43, %c2_44, %c0_45, %c0_46] : memref<1x4x8x8xbf16, #tpu.memory_space<vmem>>, vector<1x1x8x8xbf16>
    %89 = vector.shape_cast %88 : vector<1x1x8x8xbf16> to vector<8x8xbf16>
    %90 = vector.shape_cast %71 : vector<8x8xbf16> to vector<1x1x8x8xbf16>
    tpu.vector_store %arg6[%c0_43, %c2_44, %c0_45, %c0_46], %90 {strides = array<i32>} : memref<1x4x8x8xbf16, #tpu.memory_space<vmem>>, vector<1x1x8x8xbf16>,
    %c0_47 = arith.constant 0 : index
    %c2_48 = arith.constant 2 : index
    %c0_49 = arith.constant 0 : index
    %c0_50 = arith.constant 0 : index
    %91 = vector.load %arg7[%c0_47, %c2_48, %c0_49, %c0_50] : memref<1x4x8x8xbf16, #tpu.memory_space<vmem>>, vector<1x1x8x8xbf16>
    %92 = vector.shape_cast %91 : vector<1x1x8x8xbf16> to vector<8x8xbf16>
    %93 = vector.shape_cast %72 : vector<8x8xbf16> to vector<1x1x8x8xbf16>
    tpu.vector_store %arg7[%c0_47, %c2_48, %c0_49, %c0_50], %93 {strides = array<i32>} : memref<1x4x8x8xbf16, #tpu.memory_space<vmem>>, vector<1x1x8x8xbf16>,
    %94 = arith.truncf %83 : vector<8x8xf32> to vector<8x8xbf16>
    %cst_51 = arith.constant dense<0.000000e+00> : vector<8x8xf32>
    %95 = tpu.matmul %94, %72, %cst_51 {dimension_numbers = #tpu.dot_dimension_numbers<[1], [0], [0], [1], [0, 0, 1, 1], [], []>} : vector<8x8xbf16>, vector<8x8xbf16>, vector<8x8xf32> -> vector<8x8xf32>
    %96 = vector.extract_strided_slice %2 {offsets = [0, 24], sizes = [8, 8], strides = [1, 1]} : vector<8x32xbf16> to vector<8x8xbf16>
    %97 = vector.extract_strided_slice %3 {offsets = [0, 24], sizes = [8, 8], strides = [1, 1]} : vector<8x32xbf16> to vector<8x8xbf16>
    %98 = vector.extract_strided_slice %4 {offsets = [0, 24], sizes = [8, 8], strides = [1, 1]} : vector<8x32xbf16> to vector<8x8xbf16>
    %cst_52 = arith.constant dense<0.000000e+00> : vector<8x8xf32>
    %99 = tpu.matmul %96, %97, %cst_52 {dimension_numbers = #tpu.dot_dimension_numbers<[1], [1], [0], [0], [0, 0, 1, 0], [], []>} : vector<8x8xbf16>, vector<8x8xbf16>, vector<8x8xf32> -> vector<8x8xf32>
    %100 = arith.addf %99, %17 : vector<8x8xf32>
    %cst_53 = arith.constant dense<0xFF800000> : vector<8xf32>
    %101 = vector.multi_reduction <maximumf>, %100, %cst_53 [1] : vector<8x8xf32> to vector<8xf32>
    %102 = vector.shape_cast %101 : vector<8xf32> to vector<8x1xf32>
    %103 = vector.broadcast %102 : vector<8x1xf32> to vector<8x8xf32>
    %104 = arith.subf %100, %103 : vector<8x8xf32>
    %105 = math.exp %104 : vector<8x8xf32>
    %cst_54 = arith.constant dense<0.000000e+00> : vector<8xf32>
    %106 = vector.multi_reduction <add>, %105, %cst_54 [1] : vector<8x8xf32> to vector<8xf32>
    %107 = vector.shape_cast %106 : vector<8xf32> to vector<8x1xf32>
    %108 = vector.broadcast %107 : vector<8x1xf32> to vector<8x8xf32>
    %109 = arith.divf %105, %108 : vector<8x8xf32>
    %110 = arith.truncf %109 : vector<8x8xf32> to vector<8x8xbf16>
    %c0_55 = arith.constant 0 : index
    %c3 = arith.constant 3 : index
    %c0_56 = arith.constant 0 : index
    %c0_57 = arith.constant 0 : index
    %111 = vector.load %arg5[%c0_55, %c3, %c0_56, %c0_57] : memref<1x4x8x8xbf16, #tpu.memory_space<vmem>>, vector<1x1x8x8xbf16>
    %112 = vector.shape_cast %111 : vector<1x1x8x8xbf16> to vector<8x8xbf16>
    %113 = vector.shape_cast %110 : vector<8x8xbf16> to vector<1x1x8x8xbf16>
    tpu.vector_store %arg5[%c0_55, %c3, %c0_56, %c0_57], %113 {strides = array<i32>} : memref<1x4x8x8xbf16, #tpu.memory_space<vmem>>, vector<1x1x8x8xbf16>,
    %c0_58 = arith.constant 0 : index
    %c3_59 = arith.constant 3 : index
    %c0_60 = arith.constant 0 : index
    %c0_61 = arith.constant 0 : index
    %114 = vector.load %arg6[%c0_58, %c3_59, %c0_60, %c0_61] : memref<1x4x8x8xbf16, #tpu.memory_space<vmem>>, vector<1x1x8x8xbf16>
    %115 = vector.shape_cast %114 : vector<1x1x8x8xbf16> to vector<8x8xbf16>
    %116 = vector.shape_cast %97 : vector<8x8xbf16> to vector<1x1x8x8xbf16>
    tpu.vector_store %arg6[%c0_58, %c3_59, %c0_60, %c0_61], %116 {strides = array<i32>} : memref<1x4x8x8xbf16, #tpu.memory_space<vmem>>, vector<1x1x8x8xbf16>,
    %c0_62 = arith.constant 0 : index
    %c3_63 = arith.constant 3 : index
    %c0_64 = arith.constant 0 : index
    %c0_65 = arith.constant 0 : index
    %117 = vector.load %arg7[%c0_62, %c3_63, %c0_64, %c0_65] : memref<1x4x8x8xbf16, #tpu.memory_space<vmem>>, vector<1x1x8x8xbf16>
    %118 = vector.shape_cast %117 : vector<1x1x8x8xbf16> to vector<8x8xbf16>
    %119 = vector.shape_cast %98 : vector<8x8xbf16> to vector<1x1x8x8xbf16>
    tpu.vector_store %arg7[%c0_62, %c3_63, %c0_64, %c0_65], %119 {strides = array<i32>} : memref<1x4x8x8xbf16, #tpu.memory_space<vmem>>, vector<1x1x8x8xbf16>,
    %120 = arith.truncf %109 : vector<8x8xf32> to vector<8x8xbf16>
    %cst_66 = arith.constant dense<0.000000e+00> : vector<8x8xf32>
    %121 = tpu.matmul %120, %98, %cst_66 {dimension_numbers = #tpu.dot_dimension_numbers<[1], [0], [0], [1], [0, 0, 1, 1], [], []>} : vector<8x8xbf16>, vector<8x8xbf16>, vector<8x8xf32> -> vector<8x8xf32>
    %122 = tpu.concatenate %43, %69, %95, %121 in 1 : vector<8x8xf32>, vector<8x8xf32>, vector<8x8xf32>, vector<8x8xf32> -> vector<8x32xf32>
    %123 = arith.truncf %122 : vector<8x32xf32> to vector<8x32xbf16>
    %c0_67 = arith.constant 0 : index
    %c0_68 = arith.constant 0 : index
    %c0_69 = arith.constant 0 : index
    %124 = vector.load %arg4[%c0_67, %c0_68, %c0_69] : memref<1x8x32xbf16, #tpu.memory_space<vmem>>, vector<1x8x32xbf16>
    %125 = vector.shape_cast %124 : vector<1x8x32xbf16> to vector<8x32xbf16>
    %126 = vector.shape_cast %123 : vector<8x32xbf16> to vector<1x8x32xbf16>
    tpu.vector_store %arg4[%c0_67, %c0_68, %c0_69], %126 {strides = array<i32>} : memref<1x8x32xbf16, #tpu.memory_space<vmem>>, vector<1x8x32xbf16>,
    return
  }
  func.func @transform_0(%arg0: i32, %arg1: i32) -> (i32, i32, i32) {
    %c0_i32 = arith.constant 0 : i32
    %c0_i32_0 = arith.constant 0 : i32
    return %arg0, %c0_i32, %arg1 : i32, i32, i32
  }
  func.func @transform_1(%arg0: i32, %arg1: i32) -> (i32, i32, i32) {
    %c0_i32 = arith.constant 0 : i32
    %c0_i32_0 = arith.constant 0 : i32
    %c0_i32_1 = arith.constant 0 : i32
    return %arg0, %c0_i32, %c0_i32_0 : i32, i32, i32
  }
  func.func @transform_2(%arg0: i32, %arg1: i32) -> (i32, i32, i32) {
    %c0_i32 = arith.constant 0 : i32
    %c0_i32_0 = arith.constant 0 : i32
    return %arg0, %c0_i32, %arg1 : i32, i32, i32
  }
  func.func @transform_3(%arg0: i32, %arg1: i32) -> (i32, i32, i32, i32) {
    %c0_i32 = arith.constant 0 : i32
    %c0_i32_0 = arith.constant 0 : i32
    %c0_i32_1 = arith.constant 0 : i32
    return %arg0, %arg1, %c0_i32, %c0_i32_0 : i32, i32, i32, i32
  }
  func.func @transform_4(%arg0: i32, %arg1: i32) -> (i32, i32, i32, i32) {
    %c0_i32 = arith.constant 0 : i32
    %c0_i32_0 = arith.constant 0 : i32
    %c0_i32_1 = arith.constant 0 : i32
    return %arg0, %arg1, %c0_i32, %c0_i32_0 : i32, i32, i32, i32
  }
  func.func @transform_5(%arg0: i32, %arg1: i32) -> (i32, i32, i32, i32) {
    %c0_i32 = arith.constant 0 : i32
    %c0_i32_0 = arith.constant 0 : i32
    %c0_i32_1 = arith.constant 0 : i32
    return %arg0, %arg1, %c0_i32, %c0_i32_0 : i32, i32, i32, i32
  }
}

module attributes {stable_mosaic.version = 11 : i64} {
  func.func @_dense_kernel(%arg0: i32, %arg1: i32, %arg2: i32, %arg3: memref<16x32xbf16, #tpu.memory_space<vmem>>, %arg4: memref<32x32xbf16, #tpu.memory_space<vmem>>, %arg5: memref<1x32xf32, #tpu.memory_space<vmem>>, %arg6: memref<16x32xbf16, #tpu.memory_space<vmem>>, %arg7: memref<16x32xf32, #tpu.memory_space<vmem>>) attributes {dimension_semantics = [#tpu.dimension_semantics<parallel>, #tpu.dimension_semantics<parallel>, #tpu.dimension_semantics<arbitrary>], iteration_bounds = array<i64: 1, 1, 1>, scalar_prefetch = 0 : i64, scratch_operands = 1 : i64, tpu.core_type = #tpu.core_type<tc>, window_params = [{transform_indices = @transform_0, window_bounds = array<i64: 16, 32>}, {transform_indices = @transform_1, window_bounds = array<i64: 32, 32>}, {transform_indices = @transform_2, window_bounds = array<i64: 1, 32>}, {transform_indices = @transform_3, window_bounds = array<i64: 16, 32>}]} {
    %c0_i32 = arith.constant 0 : i32
    %0 = arith.cmpi eq, %arg2, %c0_i32 : i32
    %1 = arith.extui %0 : i1 to i32
    %c0_i32_0 = arith.constant 0 : i32
    %2 = arith.cmpi ne, %1, %c0_i32_0 : i32
    scf.if %2 {
      %cst_10 = arith.constant 0.000000e+00 : f32
      %12 = vector.broadcast %cst_10 : f32 to vector<16x32xf32>
      %c0_11 = arith.constant 0 : index
      %c0_12 = arith.constant 0 : index
      %13 = vector.load %arg7[%c0_11, %c0_12] : memref<16x32xf32, #tpu.memory_space<vmem>>, vector<16x32xf32>
      tpu.vector_store %arg7[%c0_11, %c0_12], %12 {strides = array<i32>} : memref<16x32xf32, #tpu.memory_space<vmem>>, vector<16x32xf32>,
    } else {
    }
    %c0 = arith.constant 0 : index
    %c0_1 = arith.constant 0 : index
    %3 = vector.load %arg7[%c0, %c0_1] : memref<16x32xf32, #tpu.memory_space<vmem>>, vector<16x32xf32>
    %c0_2 = arith.constant 0 : index
    %c0_3 = arith.constant 0 : index
    %4 = vector.load %arg3[%c0_2, %c0_3] : memref<16x32xbf16, #tpu.memory_space<vmem>>, vector<16x32xbf16>
    %c0_4 = arith.constant 0 : index
    %c0_5 = arith.constant 0 : index
    %5 = vector.load %arg4[%c0_4, %c0_5] : memref<32x32xbf16, #tpu.memory_space<vmem>>, vector<32x32xbf16>
    %cst = arith.constant dense<0.000000e+00> : vector<16x32xf32>
    %6 = tpu.matmul %4, %5, %cst {dimension_numbers = #tpu.dot_dimension_numbers<[1], [0], [0], [1], [0, 0, 1, 1], [], []>} : vector<16x32xbf16>, vector<32x32xbf16>, vector<16x32xf32> -> vector<16x32xf32>
    %7 = arith.addf %3, %6 : vector<16x32xf32>
    %c0_6 = arith.constant 0 : index
    %c0_7 = arith.constant 0 : index
    %8 = vector.load %arg7[%c0_6, %c0_7] : memref<16x32xf32, #tpu.memory_space<vmem>>, vector<16x32xf32>
    tpu.vector_store %arg7[%c0_6, %c0_7], %7 {strides = array<i32>} : memref<16x32xf32, #tpu.memory_space<vmem>>, vector<16x32xf32>,
    %c0_i32_8 = arith.constant 0 : i32
    %9 = arith.cmpi eq, %arg2, %c0_i32_8 : i32
    %10 = arith.extui %9 : i1 to i32
    %c0_i32_9 = arith.constant 0 : i32
    %11 = arith.cmpi ne, %10, %c0_i32_9 : i32
    scf.if %11 {
      %c0_10 = arith.constant 0 : index
      %c0_11 = arith.constant 0 : index
      %12 = vector.load %arg7[%c0_10, %c0_11] : memref<16x32xf32, #tpu.memory_space<vmem>>, vector<16x32xf32>
      %c0_12 = arith.constant 0 : index
      %c0_13 = arith.constant 0 : index
      %13 = vector.load %arg5[%c0_12, %c0_13] : memref<1x32xf32, #tpu.memory_space<vmem>>, vector<1x32xf32>
      %14 = vector.broadcast %13 : vector<1x32xf32> to vector<16x32xf32>
      %15 = arith.addf %12, %14 : vector<16x32xf32>
      %16 = arith.truncf %15 : vector<16x32xf32> to vector<16x32xbf16>
      %c0_14 = arith.constant 0 : index
      %c0_15 = arith.constant 0 : index
      %17 = vector.load %arg6[%c0_14, %c0_15] : memref<16x32xbf16, #tpu.memory_space<vmem>>, vector<16x32xbf16>
      tpu.vector_store %arg6[%c0_14, %c0_15], %16 {strides = array<i32>} : memref<16x32xbf16, #tpu.memory_space<vmem>>, vector<16x32xbf16>,
    } else {
    }
    return
  }
  func.func @transform_0(%arg0: i32, %arg1: i32, %arg2: i32) -> (i32, i32) {
    %c0_i32 = arith.constant 0 : i32
    return %arg0, %arg2 : i32, i32
  }
  func.func @transform_1(%arg0: i32, %arg1: i32, %arg2: i32) -> (i32, i32) {
    %c0_i32 = arith.constant 0 : i32
    return %arg2, %arg1 : i32, i32
  }
  func.func @transform_2(%arg0: i32, %arg1: i32, %arg2: i32) -> (i32, i32) {
    %c0_i32 = arith.constant 0 : i32
    %c0_i32_0 = arith.constant 0 : i32
    return %c0_i32, %arg1 : i32, i32
  }
  func.func @transform_3(%arg0: i32, %arg1: i32, %arg2: i32) -> (i32, i32) {
    %c0_i32 = arith.constant 0 : i32
    return %arg0, %arg1 : i32, i32
  }
}

module attributes {stable_mosaic.version = 11 : i64} {
  func.func @_dense_kernel(%arg0: i32, %arg1: i32, %arg2: i32, %arg3: memref<16x32xbf16, #tpu.memory_space<vmem>>, %arg4: memref<32x64xbf16, #tpu.memory_space<vmem>>, %arg5: memref<1x64xf32, #tpu.memory_space<vmem>>, %arg6: memref<16x64xbf16, #tpu.memory_space<vmem>>, %arg7: memref<16x64xf32, #tpu.memory_space<vmem>>) attributes {dimension_semantics = [#tpu.dimension_semantics<parallel>, #tpu.dimension_semantics<parallel>, #tpu.dimension_semantics<arbitrary>], iteration_bounds = array<i64: 1, 1, 1>, scalar_prefetch = 0 : i64, scratch_operands = 1 : i64, tpu.core_type = #tpu.core_type<tc>, window_params = [{transform_indices = @transform_0, window_bounds = array<i64: 16, 32>}, {transform_indices = @transform_1, window_bounds = array<i64: 32, 64>}, {transform_indices = @transform_2, window_bounds = array<i64: 1, 64>}, {transform_indices = @transform_3, window_bounds = array<i64: 16, 64>}]} {
    %c0_i32 = arith.constant 0 : i32
    %0 = arith.cmpi eq, %arg2, %c0_i32 : i32
    %1 = arith.extui %0 : i1 to i32
    %c0_i32_0 = arith.constant 0 : i32
    %2 = arith.cmpi ne, %1, %c0_i32_0 : i32
    scf.if %2 {
      %cst_10 = arith.constant 0.000000e+00 : f32
      %12 = vector.broadcast %cst_10 : f32 to vector<16x64xf32>
      %c0_11 = arith.constant 0 : index
      %c0_12 = arith.constant 0 : index
      %13 = vector.load %arg7[%c0_11, %c0_12] : memref<16x64xf32, #tpu.memory_space<vmem>>, vector<16x64xf32>
      tpu.vector_store %arg7[%c0_11, %c0_12], %12 {strides = array<i32>} : memref<16x64xf32, #tpu.memory_space<vmem>>, vector<16x64xf32>,
    } else {
    }
    %c0 = arith.constant 0 : index
    %c0_1 = arith.constant 0 : index
    %3 = vector.load %arg7[%c0, %c0_1] : memref<16x64xf32, #tpu.memory_space<vmem>>, vector<16x64xf32>
    %c0_2 = arith.constant 0 : index
    %c0_3 = arith.constant 0 : index
    %4 = vector.load %arg3[%c0_2, %c0_3] : memref<16x32xbf16, #tpu.memory_space<vmem>>, vector<16x32xbf16>
    %c0_4 = arith.constant 0 : index
    %c0_5 = arith.constant 0 : index
    %5 = vector.load %arg4[%c0_4, %c0_5] : memref<32x64xbf16, #tpu.memory_space<vmem>>, vector<32x64xbf16>
    %cst = arith.constant dense<0.000000e+00> : vector<16x64xf32>
    %6 = tpu.matmul %4, %5, %cst {dimension_numbers = #tpu.dot_dimension_numbers<[1], [0], [0], [1], [0, 0, 1, 1], [], []>} : vector<16x32xbf16>, vector<32x64xbf16>, vector<16x64xf32> -> vector<16x64xf32>
    %7 = arith.addf %3, %6 : vector<16x64xf32>
    %c0_6 = arith.constant 0 : index
    %c0_7 = arith.constant 0 : index
    %8 = vector.load %arg7[%c0_6, %c0_7] : memref<16x64xf32, #tpu.memory_space<vmem>>, vector<16x64xf32>
    tpu.vector_store %arg7[%c0_6, %c0_7], %7 {strides = array<i32>} : memref<16x64xf32, #tpu.memory_space<vmem>>, vector<16x64xf32>,
    %c0_i32_8 = arith.constant 0 : i32
    %9 = arith.cmpi eq, %arg2, %c0_i32_8 : i32
    %10 = arith.extui %9 : i1 to i32
    %c0_i32_9 = arith.constant 0 : i32
    %11 = arith.cmpi ne, %10, %c0_i32_9 : i32
    scf.if %11 {
      %c0_10 = arith.constant 0 : index
      %c0_11 = arith.constant 0 : index
      %12 = vector.load %arg7[%c0_10, %c0_11] : memref<16x64xf32, #tpu.memory_space<vmem>>, vector<16x64xf32>
      %c0_12 = arith.constant 0 : index
      %c0_13 = arith.constant 0 : index
      %13 = vector.load %arg5[%c0_12, %c0_13] : memref<1x64xf32, #tpu.memory_space<vmem>>, vector<1x64xf32>
      %14 = vector.broadcast %13 : vector<1x64xf32> to vector<16x64xf32>
      %15 = arith.addf %12, %14 : vector<16x64xf32>
      %16 = arith.truncf %15 : vector<16x64xf32> to vector<16x64xbf16>
      %c0_14 = arith.constant 0 : index
      %c0_15 = arith.constant 0 : index
      %17 = vector.load %arg6[%c0_14, %c0_15] : memref<16x64xbf16, #tpu.memory_space<vmem>>, vector<16x64xbf16>
      tpu.vector_store %arg6[%c0_14, %c0_15], %16 {strides = array<i32>} : memref<16x64xbf16, #tpu.memory_space<vmem>>, vector<16x64xbf16>,
    } else {
    }
    return
  }
  func.func @transform_0(%arg0: i32, %arg1: i32, %arg2: i32) -> (i32, i32) {
    %c0_i32 = arith.constant 0 : i32
    return %arg0, %arg2 : i32, i32
  }
  func.func @transform_1(%arg0: i32, %arg1: i32, %arg2: i32) -> (i32, i32) {
    %c0_i32 = arith.constant 0 : i32
    return %arg2, %arg1 : i32, i32
  }
  func.func @transform_2(%arg0: i32, %arg1: i32, %arg2: i32) -> (i32, i32) {
    %c0_i32 = arith.constant 0 : i32
    %c0_i32_0 = arith.constant 0 : i32
    return %c0_i32, %arg1 : i32, i32
  }
  func.func @transform_3(%arg0: i32, %arg1: i32, %arg2: i32) -> (i32, i32) {
    %c0_i32 = arith.constant 0 : i32
    return %arg0, %arg1 : i32, i32
  }
}

module attributes {stable_mosaic.version = 11 : i64} {
  func.func @_cross_attn_kernel(%arg0: i32, %arg1: i32, %arg2: memref<1x8x32xbf16, #tpu.memory_space<vmem>>, %arg3: memref<1x8x64xbf16, #tpu.memory_space<vmem>>, %arg4: memref<1x8x32xbf16, #tpu.memory_space<vmem>>) attributes {dimension_semantics = [#tpu.dimension_semantics<parallel>, #tpu.dimension_semantics<parallel>], iteration_bounds = array<i64: 2, 1>, scalar_prefetch = 0 : i64, scratch_operands = 0 : i64, tpu.core_type = #tpu.core_type<tc>, window_params = [{transform_indices = @transform_0, window_bounds = array<i64: 1, 8, 32>}, {transform_indices = @transform_1, window_bounds = array<i64: 1, 8, 64>}, {transform_indices = @transform_2, window_bounds = array<i64: 1, 8, 32>}]} {
    %c0 = arith.constant 0 : index
    %c0_0 = arith.constant 0 : index
    %c0_1 = arith.constant 0 : index
    %0 = vector.load %arg2[%c0, %c0_0, %c0_1] : memref<1x8x32xbf16, #tpu.memory_space<vmem>>, vector<1x8x32xbf16>
    %1 = vector.shape_cast %0 : vector<1x8x32xbf16> to vector<8x32xbf16>
    %c0_2 = arith.constant 0 : index
    %c0_3 = arith.constant 0 : index
    %c0_4 = arith.constant 0 : index
    %2 = vector.load %arg3[%c0_2, %c0_3, %c0_4] : memref<1x8x64xbf16, #tpu.memory_space<vmem>>, vector<1x8x64xbf16>
    %3 = vector.shape_cast %2 : vector<1x8x64xbf16> to vector<8x64xbf16>
    %4 = vector.extract_strided_slice %1 {offsets = [0, 0], sizes = [8, 8], strides = [1, 1]} : vector<8x32xbf16> to vector<8x8xbf16>
    %5 = vector.extract_strided_slice %3 {offsets = [0, 0], sizes = [8, 8], strides = [1, 1]} : vector<8x64xbf16> to vector<8x8xbf16>
    %6 = vector.extract_strided_slice %3 {offsets = [0, 32], sizes = [8, 8], strides = [1, 1]} : vector<8x64xbf16> to vector<8x8xbf16>
    %cst = arith.constant dense<0.000000e+00> : vector<8x8xf32>
    %7 = tpu.matmul %4, %5, %cst {dimension_numbers = #tpu.dot_dimension_numbers<[1], [1], [0], [0], [0, 0, 1, 0], [], []>} : vector<8x8xbf16>, vector<8x8xbf16>, vector<8x8xf32> -> vector<8x8xf32>
    %cst_5 = arith.constant dense<0xFF800000> : vector<8xf32>
    %8 = vector.multi_reduction <maximumf>, %7, %cst_5 [1] : vector<8x8xf32> to vector<8xf32>
    %9 = vector.shape_cast %8 : vector<8xf32> to vector<8x1xf32>
    %10 = vector.broadcast %9 : vector<8x1xf32> to vector<8x8xf32>
    %11 = arith.subf %7, %10 : vector<8x8xf32>
    %12 = math.exp %11 : vector<8x8xf32>
    %cst_6 = arith.constant dense<0.000000e+00> : vector<8xf32>
    %13 = vector.multi_reduction <add>, %12, %cst_6 [1] : vector<8x8xf32> to vector<8xf32>
    %14 = vector.shape_cast %13 : vector<8xf32> to vector<8x1xf32>
    %15 = vector.broadcast %14 : vector<8x1xf32> to vector<8x8xf32>
    %16 = arith.divf %12, %15 : vector<8x8xf32>
    %17 = arith.truncf %16 : vector<8x8xf32> to vector<8x8xbf16>
    %cst_7 = arith.constant dense<0.000000e+00> : vector<8x8xf32>
    %18 = tpu.matmul %17, %6, %cst_7 {dimension_numbers = #tpu.dot_dimension_numbers<[1], [0], [0], [1], [0, 0, 1, 1], [], []>} : vector<8x8xbf16>, vector<8x8xbf16>, vector<8x8xf32> -> vector<8x8xf32>
    %19 = vector.extract_strided_slice %1 {offsets = [0, 8], sizes = [8, 8], strides = [1, 1]} : vector<8x32xbf16> to vector<8x8xbf16>
    %20 = vector.extract_strided_slice %3 {offsets = [0, 8], sizes = [8, 8], strides = [1, 1]} : vector<8x64xbf16> to vector<8x8xbf16>
    %21 = vector.extract_strided_slice %3 {offsets = [0, 40], sizes = [8, 8], strides = [1, 1]} : vector<8x64xbf16> to vector<8x8xbf16>
    %cst_8 = arith.constant dense<0.000000e+00> : vector<8x8xf32>
    %22 = tpu.matmul %19, %20, %cst_8 {dimension_numbers = #tpu.dot_dimension_numbers<[1], [1], [0], [0], [0, 0, 1, 0], [], []>} : vector<8x8xbf16>, vector<8x8xbf16>, vector<8x8xf32> -> vector<8x8xf32>
    %cst_9 = arith.constant dense<0xFF800000> : vector<8xf32>
    %23 = vector.multi_reduction <maximumf>, %22, %cst_9 [1] : vector<8x8xf32> to vector<8xf32>
    %24 = vector.shape_cast %23 : vector<8xf32> to vector<8x1xf32>
    %25 = vector.broadcast %24 : vector<8x1xf32> to vector<8x8xf32>
    %26 = arith.subf %22, %25 : vector<8x8xf32>
    %27 = math.exp %26 : vector<8x8xf32>
    %cst_10 = arith.constant dense<0.000000e+00> : vector<8xf32>
    %28 = vector.multi_reduction <add>, %27, %cst_10 [1] : vector<8x8xf32> to vector<8xf32>
    %29 = vector.shape_cast %28 : vector<8xf32> to vector<8x1xf32>
    %30 = vector.broadcast %29 : vector<8x1xf32> to vector<8x8xf32>
    %31 = arith.divf %27, %30 : vector<8x8xf32>
    %32 = arith.truncf %31 : vector<8x8xf32> to vector<8x8xbf16>
    %cst_11 = arith.constant dense<0.000000e+00> : vector<8x8xf32>
    %33 = tpu.matmul %32, %21, %cst_11 {dimension_numbers = #tpu.dot_dimension_numbers<[1], [0], [0], [1], [0, 0, 1, 1], [], []>} : vector<8x8xbf16>, vector<8x8xbf16>, vector<8x8xf32> -> vector<8x8xf32>
    %34 = vector.extract_strided_slice %1 {offsets = [0, 16], sizes = [8, 8], strides = [1, 1]} : vector<8x32xbf16> to vector<8x8xbf16>
    %35 = vector.extract_strided_slice %3 {offsets = [0, 16], sizes = [8, 8], strides = [1, 1]} : vector<8x64xbf16> to vector<8x8xbf16>
    %36 = vector.extract_strided_slice %3 {offsets = [0, 48], sizes = [8, 8], strides = [1, 1]} : vector<8x64xbf16> to vector<8x8xbf16>
    %cst_12 = arith.constant dense<0.000000e+00> : vector<8x8xf32>
    %37 = tpu.matmul %34, %35, %cst_12 {dimension_numbers = #tpu.dot_dimension_numbers<[1], [1], [0], [0], [0, 0, 1, 0], [], []>} : vector<8x8xbf16>, vector<8x8xbf16>, vector<8x8xf32> -> vector<8x8xf32>
    %cst_13 = arith.constant dense<0xFF800000> : vector<8xf32>
    %38 = vector.multi_reduction <maximumf>, %37, %cst_13 [1] : vector<8x8xf32> to vector<8xf32>
    %39 = vector.shape_cast %38 : vector<8xf32> to vector<8x1xf32>
    %40 = vector.broadcast %39 : vector<8x1xf32> to vector<8x8xf32>
    %41 = arith.subf %37, %40 : vector<8x8xf32>
    %42 = math.exp %41 : vector<8x8xf32>
    %cst_14 = arith.constant dense<0.000000e+00> : vector<8xf32>
    %43 = vector.multi_reduction <add>, %42, %cst_14 [1] : vector<8x8xf32> to vector<8xf32>
    %44 = vector.shape_cast %43 : vector<8xf32> to vector<8x1xf32>
    %45 = vector.broadcast %44 : vector<8x1xf32> to vector<8x8xf32>
    %46 = arith.divf %42, %45 : vector<8x8xf32>
    %47 = arith.truncf %46 : vector<8x8xf32> to vector<8x8xbf16>
    %cst_15 = arith.constant dense<0.000000e+00> : vector<8x8xf32>
    %48 = tpu.matmul %47, %36, %cst_15 {dimension_numbers = #tpu.dot_dimension_numbers<[1], [0], [0], [1], [0, 0, 1, 1], [], []>} : vector<8x8xbf16>, vector<8x8xbf16>, vector<8x8xf32> -> vector<8x8xf32>
    %49 = vector.extract_strided_slice %1 {offsets = [0, 24], sizes = [8, 8], strides = [1, 1]} : vector<8x32xbf16> to vector<8x8xbf16>
    %50 = vector.extract_strided_slice %3 {offsets = [0, 24], sizes = [8, 8], strides = [1, 1]} : vector<8x64xbf16> to vector<8x8xbf16>
    %51 = vector.extract_strided_slice %3 {offsets = [0, 56], sizes = [8, 8], strides = [1, 1]} : vector<8x64xbf16> to vector<8x8xbf16>
    %cst_16 = arith.constant dense<0.000000e+00> : vector<8x8xf32>
    %52 = tpu.matmul %49, %50, %cst_16 {dimension_numbers = #tpu.dot_dimension_numbers<[1], [1], [0], [0], [0, 0, 1, 0], [], []>} : vector<8x8xbf16>, vector<8x8xbf16>, vector<8x8xf32> -> vector<8x8xf32>
    %cst_17 = arith.constant dense<0xFF800000> : vector<8xf32>
    %53 = vector.multi_reduction <maximumf>, %52, %cst_17 [1] : vector<8x8xf32> to vector<8xf32>
    %54 = vector.shape_cast %53 : vector<8xf32> to vector<8x1xf32>
    %55 = vector.broadcast %54 : vector<8x1xf32> to vector<8x8xf32>
    %56 = arith.subf %52, %55 : vector<8x8xf32>
    %57 = math.exp %56 : vector<8x8xf32>
    %cst_18 = arith.constant dense<0.000000e+00> : vector<8xf32>
    %58 = vector.multi_reduction <add>, %57, %cst_18 [1] : vector<8x8xf32> to vector<8xf32>
    %59 = vector.shape_cast %58 : vector<8xf32> to vector<8x1xf32>
    %60 = vector.broadcast %59 : vector<8x1xf32> to vector<8x8xf32>
    %61 = arith.divf %57, %60 : vector<8x8xf32>
    %62 = arith.truncf %61 : vector<8x8xf32> to vector<8x8xbf16>
    %cst_19 = arith.constant dense<0.000000e+00> : vector<8x8xf32>
    %63 = tpu.matmul %62, %51, %cst_19 {dimension_numbers = #tpu.dot_dimension_numbers<[1], [0], [0], [1], [0, 0, 1, 1], [], []>} : vector<8x8xbf16>, vector<8x8xbf16>, vector<8x8xf32> -> vector<8x8xf32>
    %64 = tpu.concatenate %18, %33, %48, %63 in 1 : vector<8x8xf32>, vector<8x8xf32>, vector<8x8xf32>, vector<8x8xf32> -> vector<8x32xf32>
    %65 = arith.truncf %64 : vector<8x32xf32> to vector<8x32xbf16>
    %c0_20 = arith.constant 0 : index
    %c0_21 = arith.constant 0 : index
    %c0_22 = arith.constant 0 : index
    %66 = vector.load %arg4[%c0_20, %c0_21, %c0_22] : memref<1x8x32xbf16, #tpu.memory_space<vmem>>, vector<1x8x32xbf16>
    %67 = vector.shape_cast %66 : vector<1x8x32xbf16> to vector<8x32xbf16>
    %68 = vector.shape_cast %65 : vector<8x32xbf16> to vector<1x8x32xbf16>
    tpu.vector_store %arg4[%c0_20, %c0_21, %c0_22], %68 {strides = array<i32>} : memref<1x8x32xbf16, #tpu.memory_space<vmem>>, vector<1x8x32xbf16>,
    return
  }
  func.func @transform_0(%arg0: i32, %arg1: i32) -> (i32, i32, i32) {
    %c0_i32 = arith.constant 0 : i32
    %c0_i32_0 = arith.constant 0 : i32
    return %arg0, %c0_i32, %arg1 : i32, i32, i32
  }
  func.func @transform_1(%arg0: i32, %arg1: i32) -> (i32, i32, i32) {
    %c0_i32 = arith.constant 0 : i32
    %c0_i32_0 = arith.constant 0 : i32
    return %arg0, %c0_i32, %arg1 : i32, i32, i32
  }
  func.func @transform_2(%arg0: i32, %arg1: i32) -> (i32, i32, i32) {
    %c0_i32 = arith.constant 0 : i32
    %c0_i32_0 = arith.constant 0 : i32
    return %arg0, %c0_i32, %arg1 : i32, i32, i32
  }
}

module attributes {stable_mosaic.version = 11 : i64} {
  func.func @_dense_kernel(%arg0: i32, %arg1: i32, %arg2: i32, %arg3: memref<16x32xbf16, #tpu.memory_space<vmem>>, %arg4: memref<32x64xbf16, #tpu.memory_space<vmem>>, %arg5: memref<1x64xf32, #tpu.memory_space<vmem>>, %arg6: memref<16x64xbf16, #tpu.memory_space<vmem>>, %arg7: memref<16x64xf32, #tpu.memory_space<vmem>>) attributes {dimension_semantics = [#tpu.dimension_semantics<parallel>, #tpu.dimension_semantics<parallel>, #tpu.dimension_semantics<arbitrary>], iteration_bounds = array<i64: 1, 1, 1>, scalar_prefetch = 0 : i64, scratch_operands = 1 : i64, tpu.core_type = #tpu.core_type<tc>, window_params = [{transform_indices = @transform_0, window_bounds = array<i64: 16, 32>}, {transform_indices = @transform_1, window_bounds = array<i64: 32, 64>}, {transform_indices = @transform_2, window_bounds = array<i64: 1, 64>}, {transform_indices = @transform_3, window_bounds = array<i64: 16, 64>}]} {
    %c0_i32 = arith.constant 0 : i32
    %0 = arith.cmpi eq, %arg2, %c0_i32 : i32
    %1 = arith.extui %0 : i1 to i32
    %c0_i32_0 = arith.constant 0 : i32
    %2 = arith.cmpi ne, %1, %c0_i32_0 : i32
    scf.if %2 {
      %cst_10 = arith.constant 0.000000e+00 : f32
      %12 = vector.broadcast %cst_10 : f32 to vector<16x64xf32>
      %c0_11 = arith.constant 0 : index
      %c0_12 = arith.constant 0 : index
      %13 = vector.load %arg7[%c0_11, %c0_12] : memref<16x64xf32, #tpu.memory_space<vmem>>, vector<16x64xf32>
      tpu.vector_store %arg7[%c0_11, %c0_12], %12 {strides = array<i32>} : memref<16x64xf32, #tpu.memory_space<vmem>>, vector<16x64xf32>,
    } else {
    }
    %c0 = arith.constant 0 : index
    %c0_1 = arith.constant 0 : index
    %3 = vector.load %arg7[%c0, %c0_1] : memref<16x64xf32, #tpu.memory_space<vmem>>, vector<16x64xf32>
    %c0_2 = arith.constant 0 : index
    %c0_3 = arith.constant 0 : index
    %4 = vector.load %arg3[%c0_2, %c0_3] : memref<16x32xbf16, #tpu.memory_space<vmem>>, vector<16x32xbf16>
    %c0_4 = arith.constant 0 : index
    %c0_5 = arith.constant 0 : index
    %5 = vector.load %arg4[%c0_4, %c0_5] : memref<32x64xbf16, #tpu.memory_space<vmem>>, vector<32x64xbf16>
    %cst = arith.constant dense<0.000000e+00> : vector<16x64xf32>
    %6 = tpu.matmul %4, %5, %cst {dimension_numbers = #tpu.dot_dimension_numbers<[1], [0], [0], [1], [0, 0, 1, 1], [], []>} : vector<16x32xbf16>, vector<32x64xbf16>, vector<16x64xf32> -> vector<16x64xf32>
    %7 = arith.addf %3, %6 : vector<16x64xf32>
    %c0_6 = arith.constant 0 : index
    %c0_7 = arith.constant 0 : index
    %8 = vector.load %arg7[%c0_6, %c0_7] : memref<16x64xf32, #tpu.memory_space<vmem>>, vector<16x64xf32>
    tpu.vector_store %arg7[%c0_6, %c0_7], %7 {strides = array<i32>} : memref<16x64xf32, #tpu.memory_space<vmem>>, vector<16x64xf32>,
    %c0_i32_8 = arith.constant 0 : i32
    %9 = arith.cmpi eq, %arg2, %c0_i32_8 : i32
    %10 = arith.extui %9 : i1 to i32
    %c0_i32_9 = arith.constant 0 : i32
    %11 = arith.cmpi ne, %10, %c0_i32_9 : i32
    scf.if %11 {
      %c0_10 = arith.constant 0 : index
      %c0_11 = arith.constant 0 : index
      %12 = vector.load %arg7[%c0_10, %c0_11] : memref<16x64xf32, #tpu.memory_space<vmem>>, vector<16x64xf32>
      %c0_12 = arith.constant 0 : index
      %c0_13 = arith.constant 0 : index
      %13 = vector.load %arg5[%c0_12, %c0_13] : memref<1x64xf32, #tpu.memory_space<vmem>>, vector<1x64xf32>
      %14 = vector.broadcast %13 : vector<1x64xf32> to vector<16x64xf32>
      %15 = arith.addf %12, %14 : vector<16x64xf32>
      %cst_14 = arith.constant 5.000000e-01 : f32
      %16 = vector.broadcast %cst_14 : f32 to vector<16x64xf32>
      %17 = arith.mulf %16, %15 : vector<16x64xf32>
      %cst_15 = arith.constant 0.707106769 : f32
      %18 = vector.broadcast %cst_15 : f32 to vector<16x64xf32>
      %19 = arith.mulf %15, %18 : vector<16x64xf32>
      %20 = math.erf %19 : vector<16x64xf32>
      %cst_16 = arith.constant 1.000000e+00 : f32
      %21 = vector.broadcast %cst_16 : f32 to vector<16x64xf32>
      %22 = arith.addf %21, %20 : vector<16x64xf32>
      %23 = arith.mulf %17, %22 : vector<16x64xf32>
      %24 = arith.truncf %23 : vector<16x64xf32> to vector<16x64xbf16>
      %c0_17 = arith.constant 0 : index
      %c0_18 = arith.constant 0 : index
      %25 = vector.load %arg6[%c0_17, %c0_18] : memref<16x64xbf16, #tpu.memory_space<vmem>>, vector<16x64xbf16>
      tpu.vector_store %arg6[%c0_17, %c0_18], %24 {strides = array<i32>} : memref<16x64xbf16, #tpu.memory_space<vmem>>, vector<16x64xbf16>,
    } else {
    }
    return
  }
  func.func @transform_0(%arg0: i32, %arg1: i32, %arg2: i32) -> (i32, i32) {
    %c0_i32 = arith.constant 0 : i32
    return %arg0, %arg2 : i32, i32
  }
  func.func @transform_1(%arg0: i32, %arg1: i32, %arg2: i32) -> (i32, i32) {
    %c0_i32 = arith.constant 0 : i32
    return %arg2, %arg1 : i32, i32
  }
  func.func @transform_2(%arg0: i32, %arg1: i32, %arg2: i32) -> (i32, i32) {
    %c0_i32 = arith.constant 0 : i32
    %c0_i32_0 = arith.constant 0 : i32
    return %c0_i32, %arg1 : i32, i32
  }
  func.func @transform_3(%arg0: i32, %arg1: i32, %arg2: i32) -> (i32, i32) {
    %c0_i32 = arith.constant 0 : i32
    return %arg0, %arg1 : i32, i32
  }
}

module attributes {stable_mosaic.version = 11 : i64} {
  func.func @_dense_res_ln_kernel(%arg0: i32, %arg1: i32, %arg2: memref<16x64xbf16, #tpu.memory_space<vmem>>, %arg3: memref<64x32xbf16, #tpu.memory_space<vmem>>, %arg4: memref<1x32xf32, #tpu.memory_space<vmem>>, %arg5: memref<16x32xbf16, #tpu.memory_space<vmem>>, %arg6: memref<1x32xf32, #tpu.memory_space<vmem>>, %arg7: memref<1x32xf32, #tpu.memory_space<vmem>>, %arg8: memref<16x32xbf16, #tpu.memory_space<vmem>>, %arg9: memref<16x32xf32, #tpu.memory_space<vmem>>) attributes {dimension_semantics = [#tpu.dimension_semantics<parallel>, #tpu.dimension_semantics<arbitrary>], iteration_bounds = array<i64: 1, 1>, scalar_prefetch = 0 : i64, scratch_operands = 1 : i64, tpu.core_type = #tpu.core_type<tc>, window_params = [{transform_indices = @transform_0, window_bounds = array<i64: 16, 64>}, {transform_indices = @transform_1, window_bounds = array<i64: 64, 32>}, {pipeline_mode = #tpu.pipeline_mode<synchronous>, transform_indices = @transform_2, window_bounds = array<i64: 1, 32>}, {transform_indices = @transform_3, window_bounds = array<i64: 16, 32>}, {pipeline_mode = #tpu.pipeline_mode<synchronous>, transform_indices = @transform_4, window_bounds = array<i64: 1, 32>}, {pipeline_mode = #tpu.pipeline_mode<synchronous>, transform_indices = @transform_5, window_bounds = array<i64: 1, 32>}, {transform_indices = @transform_6, window_bounds = array<i64: 16, 32>}]} {
    %c0_i32 = arith.constant 0 : i32
    %0 = arith.cmpi eq, %arg1, %c0_i32 : i32
    %1 = arith.extui %0 : i1 to i32
    %c0_i32_0 = arith.constant 0 : i32
    %2 = arith.cmpi ne, %1, %c0_i32_0 : i32
    scf.if %2 {
      %cst_10 = arith.constant 0.000000e+00 : f32
      %12 = vector.broadcast %cst_10 : f32 to vector<16x32xf32>
      %c0_11 = arith.constant 0 : index
      %c0_12 = arith.constant 0 : index
      %13 = vector.load %arg9[%c0_11, %c0_12] : memref<16x32xf32, #tpu.memory_space<vmem>>, vector<16x32xf32>
      tpu.vector_store %arg9[%c0_11, %c0_12], %12 {strides = array<i32>} : memref<16x32xf32, #tpu.memory_space<vmem>>, vector<16x32xf32>,
    } else {
    }
    %c0 = arith.constant 0 : index
    %c0_1 = arith.constant 0 : index
    %3 = vector.load %arg9[%c0, %c0_1] : memref<16x32xf32, #tpu.memory_space<vmem>>, vector<16x32xf32>
    %c0_2 = arith.constant 0 : index
    %c0_3 = arith.constant 0 : index
    %4 = vector.load %arg2[%c0_2, %c0_3] : memref<16x64xbf16, #tpu.memory_space<vmem>>, vector<16x64xbf16>
    %c0_4 = arith.constant 0 : index
    %c0_5 = arith.constant 0 : index
    %5 = vector.load %arg3[%c0_4, %c0_5] : memref<64x32xbf16, #tpu.memory_space<vmem>>, vector<64x32xbf16>
    %cst = arith.constant dense<0.000000e+00> : vector<16x32xf32>
    %6 = tpu.matmul %4, %5, %cst {dimension_numbers = #tpu.dot_dimension_numbers<[1], [0], [0], [1], [0, 0, 1, 1], [], []>} : vector<16x64xbf16>, vector<64x32xbf16>, vector<16x32xf32> -> vector<16x32xf32>
    %7 = arith.addf %3, %6 : vector<16x32xf32>
    %c0_6 = arith.constant 0 : index
    %c0_7 = arith.constant 0 : index
    %8 = vector.load %arg9[%c0_6, %c0_7] : memref<16x32xf32, #tpu.memory_space<vmem>>, vector<16x32xf32>
    tpu.vector_store %arg9[%c0_6, %c0_7], %7 {strides = array<i32>} : memref<16x32xf32, #tpu.memory_space<vmem>>, vector<16x32xf32>,
    %c0_i32_8 = arith.constant 0 : i32
    %9 = arith.cmpi eq, %arg1, %c0_i32_8 : i32
    %10 = arith.extui %9 : i1 to i32
    %c0_i32_9 = arith.constant 0 : i32
    %11 = arith.cmpi ne, %10, %c0_i32_9 : i32
    scf.if %11 {
      %c0_10 = arith.constant 0 : index
      %c0_11 = arith.constant 0 : index
      %12 = vector.load %arg9[%c0_10, %c0_11] : memref<16x32xf32, #tpu.memory_space<vmem>>, vector<16x32xf32>
      %c0_12 = arith.constant 0 : index
      %c0_13 = arith.constant 0 : index
      %13 = vector.load %arg4[%c0_12, %c0_13] : memref<1x32xf32, #tpu.memory_space<vmem>>, vector<1x32xf32>
      %14 = vector.broadcast %13 : vector<1x32xf32> to vector<16x32xf32>
      %15 = arith.addf %12, %14 : vector<16x32xf32>
      %c0_14 = arith.constant 0 : index
      %c0_15 = arith.constant 0 : index
      %16 = vector.load %arg5[%c0_14, %c0_15] : memref<16x32xbf16, #tpu.memory_space<vmem>>, vector<16x32xbf16>
      %17 = arith.extf %16 : vector<16x32xbf16> to vector<16x32xf32>
      %18 = arith.addf %15, %17 : vector<16x32xf32>
      %cst_16 = arith.constant dense<0.000000e+00> : vector<16xf32>
      %19 = vector.multi_reduction <add>, %18, %cst_16 [1] : vector<16x32xf32> to vector<16xf32>
      %20 = vector.shape_cast %19 : vector<16xf32> to vector<16x1xf32>
      %cst_17 = arith.constant 3.200000e+01 : f32
      %21 = vector.broadcast %cst_17 : f32 to vector<16x1xf32>
      %22 = arith.divf %20, %21 : vector<16x1xf32>
      %23 = vector.broadcast %22 : vector<16x1xf32> to vector<16x32xf32>
      %24 = arith.subf %18, %23 : vector<16x32xf32>
      %25 = arith.mulf %24, %24 : vector<16x32xf32>
      %cst_18 = arith.constant dense<0.000000e+00> : vector<16xf32>
      %26 = vector.multi_reduction <add>, %25, %cst_18 [1] : vector<16x32xf32> to vector<16xf32>
      %27 = vector.shape_cast %26 : vector<16xf32> to vector<16x1xf32>
      %cst_19 = arith.constant 3.200000e+01 : f32
      %28 = vector.broadcast %cst_19 : f32 to vector<16x1xf32>
      %29 = arith.divf %27, %28 : vector<16x1xf32>
      %30 = vector.broadcast %22 : vector<16x1xf32> to vector<16x32xf32>
      %31 = arith.subf %18, %30 : vector<16x32xf32>
      %cst_20 = arith.constant 9.99999996E-13 : f32
      %32 = vector.broadcast %cst_20 : f32 to vector<16x1xf32>
      %33 = arith.addf %29, %32 : vector<16x1xf32>
      %34 = math.rsqrt %33 : vector<16x1xf32>
      %35 = vector.broadcast %34 : vector<16x1xf32> to vector<16x32xf32>
      %36 = arith.mulf %31, %35 : vector<16x32xf32>
      %c0_21 = arith.constant 0 : index
      %c0_22 = arith.constant 0 : index
      %37 = vector.load %arg6[%c0_21, %c0_22] : memref<1x32xf32, #tpu.memory_space<vmem>>, vector<1x32xf32>
      %38 = vector.broadcast %37 : vector<1x32xf32> to vector<16x32xf32>
      %39 = arith.mulf %36, %38 : vector<16x32xf32>
      %c0_23 = arith.constant 0 : index
      %c0_24 = arith.constant 0 : index
      %40 = vector.load %arg7[%c0_23, %c0_24] : memref<1x32xf32, #tpu.memory_space<vmem>>, vector<1x32xf32>
      %41 = vector.broadcast %40 : vector<1x32xf32> to vector<16x32xf32>
      %42 = arith.addf %39, %41 : vector<16x32xf32>
      %43 = arith.truncf %42 : vector<16x32xf32> to vector<16x32xbf16>
      %c0_25 = arith.constant 0 : index
      %c0_26 = arith.constant 0 : index
      %44 = vector.load %arg8[%c0_25, %c0_26] : memref<16x32xbf16, #tpu.memory_space<vmem>>, vector<16x32xbf16>
      tpu.vector_store %arg8[%c0_25, %c0_26], %43 {strides = array<i32>} : memref<16x32xbf16, #tpu.memory_space<vmem>>, vector<16x32xbf16>,
    } else {
    }
    return
  }
  func.func @transform_0(%arg0: i32, %arg1: i32) -> (i32, i32) {
    %c0_i32 = arith.constant 0 : i32
    return %arg0, %arg1 : i32, i32
  }
  func.func @transform_1(%arg0: i32, %arg1: i32) -> (i32, i32) {
    %c0_i32 = arith.constant 0 : i32
    %c0_i32_0 = arith.constant 0 : i32
    return %arg1, %c0_i32 : i32, i32
  }
  func.func @transform_2(%arg0: i32, %arg1: i32) -> (i32, i32) {
    %c0_i32 = arith.constant 0 : i32
    %c0_i32_0 = arith.constant 0 : i32
    %c0_i32_1 = arith.constant 0 : i32
    return %c0_i32, %c0_i32_0 : i32, i32
  }
  func.func @transform_3(%arg0: i32, %arg1: i32) -> (i32, i32) {
    %c0_i32 = arith.constant 0 : i32
    %c0_i32_0 = arith.constant 0 : i32
    return %arg0, %c0_i32 : i32, i32
  }
  func.func @transform_4(%arg0: i32, %arg1: i32) -> (i32, i32) {
    %c0_i32 = arith.constant 0 : i32
    %c0_i32_0 = arith.constant 0 : i32
    %c0_i32_1 = arith.constant 0 : i32
    return %c0_i32, %c0_i32_0 : i32, i32
  }
  func.func @transform_5(%arg0: i32, %arg1: i32) -> (i32, i32) {
    %c0_i32 = arith.constant 0 : i32
    %c0_i32_0 = arith.constant 0 : i32
    %c0_i32_1 = arith.constant 0 : i32
    return %c0_i32, %c0_i32_0 : i32, i32
  }
  func.func @transform_6(%arg0: i32, %arg1: i32) -> (i32, i32) {
    %c0_i32 = arith.constant 0 : i32
    %c0_i32_0 = arith.constant 0 : i32
    return %arg0, %c0_i32 : i32, i32
  }
}

module attributes {stable_mosaic.version = 11 : i64} {
  func.func @_linout_lsm_kernel(%arg0: i32, %arg1: i32, %arg2: i32, %arg3: memref<8x32xbf16, #tpu.memory_space<vmem>>, %arg4: memref<32x128xbf16, #tpu.memory_space<vmem>>, %arg5: memref<1x128xf32, #tpu.memory_space<vmem>>, %arg6: memref<1x8x1xf32, #tpu.memory_space<vmem>>, %arg7: memref<1x8x128xf32, #tpu.memory_space<vmem>>, %arg8: memref<8x128xf32, #tpu.memory_space<vmem>>) attributes {dimension_semantics = [#tpu.dimension_semantics<parallel>, #tpu.dimension_semantics<parallel>, #tpu.dimension_semantics<arbitrary>], iteration_bounds = array<i64: 2, 1, 1>, scalar_prefetch = 0 : i64, scratch_operands = 1 : i64, tpu.core_type = #tpu.core_type<tc>, window_params = [{transform_indices = @transform_0, window_bounds = array<i64: 8, 32>}, {transform_indices = @transform_1, window_bounds = array<i64: 32, 128>}, {transform_indices = @transform_2, window_bounds = array<i64: 1, 128>}, {transform_indices = @transform_3, window_bounds = array<i64: 1, 8, 1>}, {transform_indices = @transform_4, window_bounds = array<i64: 1, 8, 128>}]} {
    %c0_i32 = arith.constant 0 : i32
    %0 = arith.cmpi eq, %arg2, %c0_i32 : i32
    %1 = arith.extui %0 : i1 to i32
    %c0_i32_0 = arith.constant 0 : i32
    %2 = arith.cmpi ne, %1, %c0_i32_0 : i32
    scf.if %2 {
      %cst_10 = arith.constant 0.000000e+00 : f32
      %12 = vector.broadcast %cst_10 : f32 to vector<8x128xf32>
      %c0_11 = arith.constant 0 : index
      %c0_12 = arith.constant 0 : index
      %13 = vector.load %arg8[%c0_11, %c0_12] : memref<8x128xf32, #tpu.memory_space<vmem>>, vector<8x128xf32>
      tpu.vector_store %arg8[%c0_11, %c0_12], %12 {strides = array<i32>} : memref<8x128xf32, #tpu.memory_space<vmem>>, vector<8x128xf32>,
    } else {
    }
    %c0 = arith.constant 0 : index
    %c0_1 = arith.constant 0 : index
    %3 = vector.load %arg8[%c0, %c0_1] : memref<8x128xf32, #tpu.memory_space<vmem>>, vector<8x128xf32>
    %c0_2 = arith.constant 0 : index
    %c0_3 = arith.constant 0 : index
    %4 = vector.load %arg3[%c0_2, %c0_3] : memref<8x32xbf16, #tpu.memory_space<vmem>>, vector<8x32xbf16>
    %c0_4 = arith.constant 0 : index
    %c0_5 = arith.constant 0 : index
    %5 = vector.load %arg4[%c0_4, %c0_5] : memref<32x128xbf16, #tpu.memory_space<vmem>>, vector<32x128xbf16>
    %cst = arith.constant dense<0.000000e+00> : vector<8x128xf32>
    %6 = tpu.matmul %4, %5, %cst {dimension_numbers = #tpu.dot_dimension_numbers<[1], [0], [0], [1], [0, 0, 1, 1], [], []>} : vector<8x32xbf16>, vector<32x128xbf16>, vector<8x128xf32> -> vector<8x128xf32>
    %7 = arith.addf %3, %6 : vector<8x128xf32>
    %c0_6 = arith.constant 0 : index
    %c0_7 = arith.constant 0 : index
    %8 = vector.load %arg8[%c0_6, %c0_7] : memref<8x128xf32, #tpu.memory_space<vmem>>, vector<8x128xf32>
    tpu.vector_store %arg8[%c0_6, %c0_7], %7 {strides = array<i32>} : memref<8x128xf32, #tpu.memory_space<vmem>>, vector<8x128xf32>,
    %c0_i32_8 = arith.constant 0 : i32
    %9 = arith.cmpi eq, %arg2, %c0_i32_8 : i32
    %10 = arith.extui %9 : i1 to i32
    %c0_i32_9 = arith.constant 0 : i32
    %11 = arith.cmpi ne, %10, %c0_i32_9 : i32
    scf.if %11 {
      %c0_10 = arith.constant 0 : index
      %c0_11 = arith.constant 0 : index
      %12 = vector.load %arg8[%c0_10, %c0_11] : memref<8x128xf32, #tpu.memory_space<vmem>>, vector<8x128xf32>
      %c0_12 = arith.constant 0 : index
      %c0_13 = arith.constant 0 : index
      %c0_14 = arith.constant 0 : index
      %13 = vector.load %arg6[%c0_12, %c0_13, %c0_14] : memref<1x8x1xf32, #tpu.memory_space<vmem>>, vector<1x8x1xf32>
      %14 = vector.shape_cast %13 : vector<1x8x1xf32> to vector<8x1xf32>
      %15 = vector.broadcast %14 : vector<8x1xf32> to vector<8x128xf32>
      %16 = arith.mulf %12, %15 : vector<8x128xf32>
      %c0_15 = arith.constant 0 : index
      %c0_16 = arith.constant 0 : index
      %17 = vector.load %arg5[%c0_15, %c0_16] : memref<1x128xf32, #tpu.memory_space<vmem>>, vector<1x128xf32>
      %18 = vector.broadcast %17 : vector<1x128xf32> to vector<8x128xf32>
      %19 = arith.addf %16, %18 : vector<8x128xf32>
      %cst_17 = arith.constant dense<0xFF800000> : vector<128xf32>
      %20 = vector.multi_reduction <maximumf>, %19, %cst_17 [0] : vector<8x128xf32> to vector<128xf32>
      %21 = vector.shape_cast %20 : vector<128xf32> to vector<1x128xf32>
      %22 = vector.broadcast %21 : vector<1x128xf32> to vector<8x128xf32>
      %23 = arith.subf %19, %22 : vector<8x128xf32>
      %24 = math.exp %23 : vector<8x128xf32>
      %cst_18 = arith.constant dense<0.000000e+00> : vector<128xf32>
      %25 = vector.multi_reduction <add>, %24, %cst_18 [0] : vector<8x128xf32> to vector<128xf32>
      %26 = vector.shape_cast %25 : vector<128xf32> to vector<1x128xf32>
      %27 = math.log %26 : vector<1x128xf32>
      %28 = vector.broadcast %27 : vector<1x128xf32> to vector<8x128xf32>
      %29 = arith.subf %23, %28 : vector<8x128xf32>
      %c0_19 = arith.constant 0 : index
      %c0_20 = arith.constant 0 : index
      %c0_21 = arith.constant 0 : index
      %30 = vector.load %arg7[%c0_19, %c0_20, %c0_21] : memref<1x8x128xf32, #tpu.memory_space<vmem>>, vector<1x8x128xf32>
      %31 = vector.shape_cast %30 : vector<1x8x128xf32> to vector<8x128xf32>
      %32 = vector.shape_cast %29 : vector<8x128xf32> to vector<1x8x128xf32>
      tpu.vector_store %arg7[%c0_19, %c0_20, %c0_21], %32 {strides = array<i32>} : memref<1x8x128xf32, #tpu.memory_space<vmem>>, vector<1x8x128xf32>,
    } else {
    }
    return
  }
  func.func @transform_0(%arg0: i32, %arg1: i32, %arg2: i32) -> (i32, i32) {
    %c0_i32 = arith.constant 0 : i32
    return %arg0, %arg2 : i32, i32
  }
  func.func @transform_1(%arg0: i32, %arg1: i32, %arg2: i32) -> (i32, i32) {
    %c0_i32 = arith.constant 0 : i32
    return %arg2, %arg1 : i32, i32
  }
  func.func @transform_2(%arg0: i32, %arg1: i32, %arg2: i32) -> (i32, i32) {
    %c0_i32 = arith.constant 0 : i32
    %c0_i32_0 = arith.constant 0 : i32
    return %c0_i32, %arg1 : i32, i32
  }
  func.func @transform_3(%arg0: i32, %arg1: i32, %arg2: i32) -> (i32, i32, i32) {
    %c0_i32 = arith.constant 0 : i32
    %c0_i32_0 = arith.constant 0 : i32
    %c0_i32_1 = arith.constant 0 : i32
    return %arg0, %c0_i32, %c0_i32_0 : i32, i32, i32
  }
  func.func @transform_4(%arg0: i32, %arg1: i32, %arg2: i32) -> (i32, i32, i32) {
    %c0_i32 = arith.constant 0 : i32
    %c0_i32_0 = arith.constant 0 : i32
    return %arg0, %c0_i32, %arg1 : i32, i32, i32
  }
}

</mosaic_0001>

<bundles_post_ra>
// kernel: decoder_forward.23
= control target key start
LH: loop header
LB: loop body
LE: loop exit
PB: predicated region body
PF: predicated region fallthrough
CT: control target
= control target key end

     0   :  { %vm28_vm0 = vcmask 261120   ;;  %v220_v0 = vmov 0.0   ;;  %vm221_vm1 = vmmov 0   ;;  %vm178_vm2 = vcmask 257024   ;;  %s293_s1 = inlined_call_operand.vmem [shape: bf16[32,32], index: 1, kind: input, shape index: {}]   ;;  %s294_s0 = inlined_call_operand.vmem [shape: bf16[16,32], index: 0, kind: input, shape index: {}]   ;;  %s295_s3 = inlined_call_operand.vmem [shape: bf16[16,32], index: 3, kind: input, shape index: {}]   ;;  %s296_s2 = inlined_call_operand.vmem [shape: f32[1,32], index: 2, kind: input, shape index: {}]   ;;  %s297_s4 = inlined_call_operand.vmem [shape: f32[1,32], index: 4, kind: input, shape index: {}]   ;;  %s298_s5 = inlined_call_operand.vmem [shape: f32[1,32], index: 5, kind: input, shape index: {}]   ;;  %s299_s6 = inlined_call_operand.vmem [shape: bf16[16,32], index: 6, kind: output, shape index: {}]  }
   0x1   :  { %203 = vmatprep.subr.bf16.mxu0 %v220_v0  ;;  %v213_v1 = vld [vmem:[%s293_s1] sm:$0xff]   ;;  %207 = vmatprep.mubr.msk.bf16.mxu0 %vm221_vm1, %v220_v0  ;;  %29 = vst.msk [vmem:[#allocation2] sm:$0xff] %vm28_vm0, %v220_v0  ;;  %30 = vst.msk [vmem:[#allocation2 + $0x8] sm:$0xff] %vm28_vm0, %v220_v0  ;;  %v214_v2 = vld [vmem:[%s293_s1 + $0x8] sm:$0xff]  }
   0x2   :  { %204 = vmatpush3.bf16.msra.mxu0 %v213_v1  ;;  %v215_v3 = vld [vmem:[%s294_s0] sm:$0xff]  }
   0x3   :  { %205 = vmatprep.subr.bf16.mxu0 %v220_v0  ;;  %v197_v12 = vld [vmem:[%s295_s3] sm:$0xff]  }
   0x4   :  { %v189_v13 = vld [vmem:[%s296_s2] ss:$0 sm:$0xff]  ;;  %v198_v14 = vunpack.c.l.bf16 %v197_v12  ;;  %v199_v17 = vunpack.c.h.bf16 %v197_v12 }
   0x5   :  { %v190_v41 = vld [vmem:[%s297_s4] ss:$0 sm:$0xff] }
   0x6   :  { %206 = vmatpush3.bf16.msra.mxu0 %v214_v2  ;;  %v191_v43 = vld [vmem:[%s298_s5] ss:$0 sm:$0xff] }
   0x8   :  { %v31_v4 = vld [vmem:[#allocation2] sm:$0xff]  ;;  %v32_v6 = vld [vmem:[#allocation2 + $0x8] sm:$0xff] }
   0x9   :  { %208 = vmatmul.mubr.msk.bf16.vlgmr.msra.gmra.mrb[0].mxu0 %vm28_vm0, %v215_v3 }
  0xdc   :  { %v94_v5 = vpop.f32.mrb[0].mxu0 }
  0xdd   :  { %v101_v7 = vadd.f32 %v94_v5, %v31_v4  ;;  %v209_v8 = vpop.f32.mrb[1].mxu0 }
  0xde   :  { %v97_v9 = vpop.f32.mrb[2].mxu0 }
  0xdf   :  { %103 = vst.msk [vmem:[#allocation2] sm:$0xff] %vm28_vm0, %v101_v7  ;;  %v102_v10 = vadd.f32 %v97_v9, %v32_v6  ;;  %v210_v11 = vpop.f32.mrb[3].mxu0 }
  0xe1   :  { %104 = vst.msk [vmem:[#allocation2 + $0x8] sm:$0xff] %vm28_vm0, %v102_v10 }
  0xe6   :  { %v108_v15 = vld [vmem:[#allocation2] sm:$0xff] }
  0xe7   :  { %v117_v16 = vadd.f32 %v189_v13, %v108_v15 }
  0xe8   :  { %v109_v18 = vld [vmem:[#allocation2 + $0x8] sm:$0xff] }
  0xe9   :  { %v123_v19 = vadd.f32 %v198_v14, %v117_v16  ;;  %v118_v20 = vadd.f32 %v189_v13, %v109_v18 }
  0xeb   :  { %v125_v21 = vsel %vm28_vm0, %v123_v19, 0.0  ;;  %v124_v22 = vadd.f32 %v199_v17, %v118_v20 }
  0xec   :  { %126 = vadd.xlane.f32.xlu0 %v125_v21 }
  0xed   :  { %v128_v23 = vsel %vm28_vm0, %v124_v22, 0.0 }
  0xf0   :  { %129 = vadd.xlane.f32.xlu0 %v128_v23 }
 0x179   :  { %v127_v24 = vpop.xlane.xlu0 %126 }
 0x17a   :  { %v132_v25 = vmul.f32 0.03125, %v127_v24 }
 0x17c   :  { %v134_v26 = vsub.f32 %v123_v19, %v132_v25 }
 0x17d   :  { %v130_v27 = vpop.xlane.xlu0 %129 }
 0x17e   :  { %v133_v28 = vmul.f32 0.03125, %v130_v27  ;;  %v136_v29 = vmul.f32 %v134_v26, %v134_v26 }
 0x180   :  { %v135_v30 = vsub.f32 %v124_v22, %v133_v28  ;;  %v138_v31 = vsel %vm28_vm0, %v136_v29, 0.0 }
 0x181   :  { %139 = vadd.xlane.f32.xlu1 %v138_v31 }
 0x182   :  { %v137_v32 = vmul.f32 %v135_v30, %v135_v30 }
 0x184   :  { %v141_v33 = vsel %vm28_vm0, %v137_v32, 0.0 }
 0x185   :  { %142 = vadd.xlane.f32.xlu1 %v141_v33 }
 0x20e   :  { %v140_v34 = vpop.xlane.xlu1 %139 }
 0x20f   :  { %v144_v35 = vmul.f32 0.03125, %v140_v34 }
 0x211   :  { %v146_v36 = vadd.f32 1e-12, %v144_v35 }
 0x212   :  { %v143_v37 = vpop.xlane.xlu1 %142 }
 0x213   :  { %216 = vrsqrt.f32 %v146_v36  ;;  %v145_v38 = vmul.f32 0.03125, %v143_v37 }
 0x215   :  { %v147_v39 = vadd.f32 1e-12, %v145_v38 }
 0x217   :  { %218 = vrsqrt.f32 %v147_v39 }
 0x21d   :  { %v217_v40 = vpop.eup %216 }
 0x21e   :  { %v150_v42 = vmul.f32 %v217_v40, %v134_v26 }
 0x220   :  { %v159_v44 = vmul.f32 %v190_v41, %v150_v42 }
 0x221   :  { %v219_v45 = vpop.eup %218 }
 0x222   :  { %v168_v46 = vadd.f32 %v191_v43, %v159_v44  ;;  %v151_v47 = vmul.f32 %v219_v45, %v135_v30 }
 0x224   :  { %v194_v48 = vpack.c.bf16 %v168_v46, %v168_v46  ;;  %v160_v49 = vmul.f32 %v190_v41, %v151_v47 }
 0x226   :  { %179 = vst.msk [vmem:[%s299_s6] sm:$0xf] %vm178_vm2, %v194_v48  ;;  %v169_v50 = vadd.f32 %v191_v43, %v160_v49 }
 0x228   :  { %v195_v51 = vpack.c.bf16 %v169_v50, %v169_v50 }
 0x22a   :  { %180 = vst.msk [vmem:[%s299_s6 + $0x4] sm:$0xf] %vm178_vm2, %v195_v51 }

// kernel: decoder_forward.21
= control target key start
LH: loop header
LB: loop body
LE: loop exit
PB: predicated region body
PF: predicated region fallthrough
CT: control target
= control target key end

     0   :  { %vm19_vm0 = vcmask 785408   ;;  %v151_v0 = vmov 0.0   ;;  %vm152_vm1 = vmmov 0   ;;  %vm47_vm2 = vcmask 261120   ;;  %s195_s1 = inlined_call_operand.vmem [shape: bf16[32,96], index: 1, kind: input, shape index: {}]   ;;  %s196_s0 = inlined_call_operand.vmem [shape: bf16[16,32], index: 0, kind: input, shape index: {}]   ;;  %s197_s2 = inlined_call_operand.vmem [shape: f32[1,96], index: 2, kind: input, shape index: {}]   ;;  %s198_s3 = inlined_call_operand.vmem [shape: bf16[16,96], index: 3, kind: output, shape index: {}]  }
   0x1   :  { %138 = vmatprep.subr.bf16.mxu0 %v151_v0  ;;  %v148_v1 = vld [vmem:[%s195_s1] sm:$0xff]   ;;  %142 = vmatprep.mubr.msk.bf16.mxu0 %vm152_vm1, %v151_v0  ;;  %20 = vst.msk [vmem:[#allocation2] sm:$0xff] %vm19_vm0, %v151_v0  ;;  %21 = vst.msk [vmem:[#allocation2 + $0x8] sm:$0xff] %vm19_vm0, %v151_v0  ;;  %v149_v2 = vld [vmem:[%s195_s1 + $0x8] sm:$0xff]   ;;  %vm119_vm3 = vcmask 781312  }
   0x2   :  { %139 = vmatpush3.bf16.msra.mxu0 %v148_v1  ;;  %v150_v3 = vld [vmem:[%s196_s0] sm:$0xff]  }
   0x3   :  { %140 = vmatprep.subr.bf16.mxu0 %v151_v0  ;;  %v130_v12 = vld [vmem:[%s197_s2] ss:$0 sm:$0xff] }
   0x6   :  { %141 = vmatpush3.bf16.msra.mxu0 %v149_v2 }
   0x8   :  { %v22_v4 = vld [vmem:[#allocation2] sm:$0xff]  ;;  %v23_v6 = vld [vmem:[#allocation2 + $0x8] sm:$0xff] }
   0x9   :  { %143 = vmatmul.mubr.msk.bf16.vlgmr.msra.gmra.mrb[0].mxu0 %vm47_vm2, %v150_v3 }
  0xdc   :  { %v85_v5 = vpop.f32.mrb[0].mxu0 }
  0xdd   :  { %v92_v7 = vadd.f32 %v85_v5, %v22_v4  ;;  %v144_v8 = vpop.f32.mrb[1].mxu0 }
  0xde   :  { %v88_v9 = vpop.f32.mrb[2].mxu0 }
  0xdf   :  { %95 = vst.msk [vmem:[#allocation2] sm:$0xff] %vm19_vm0, %v92_v7  ;;  %v93_v10 = vadd.f32 %v88_v9, %v23_v6  ;;  %v145_v11 = vpop.f32.mrb[3].mxu0 }
  0xe1   :  { %96 = vst.msk [vmem:[#allocation2 + $0x8] sm:$0xff] %vm19_vm0, %v93_v10 }
  0xe6   :  { %v100_v13 = vld [vmem:[#allocation2] sm:$0xff] }
  0xe7   :  { %v109_v14 = vadd.f32 %v130_v12, %v100_v13 }
  0xe8   :  { %v101_v15 = vld [vmem:[#allocation2 + $0x8] sm:$0xff] }
  0xe9   :  { %v133_v16 = vpack.c.bf16 %v109_v14, %v109_v14  ;;  %v110_v17 = vadd.f32 %v130_v12, %v101_v15 }
  0xeb   :  { %120 = vst.msk [vmem:[%s198_s3] sm:$0xf] %vm119_vm3, %v133_v16  ;;  %v134_v18 = vpack.c.bf16 %v110_v17, %v110_v17 }
  0xed   :  { %121 = vst.msk [vmem:[%s198_s3 + $0x4] sm:$0xf] %vm119_vm3, %v134_v18 }

// kernel: decoder_forward.20
= control target key start
LH: loop header
LB: loop body
LE: loop exit
PB: predicated region body
PF: predicated region fallthrough
CT: control target
= control target key end

     0   :  { %vm16_vm0 = vcmask 261120   ;;  %vm70_vm1 = vcmask 257024   ;;  %s129_s0 = inlined_call_operand.vmem [shape: f32[16,32], index: 0, kind: input, shape index: {}]   ;;  %s130_s1 = inlined_call_operand.vmem [shape: f32[1,32], index: 1, kind: input, shape index: {}]   ;;  %s131_s2 = inlined_call_operand.vmem [shape: f32[1,32], index: 2, kind: input, shape index: {}]   ;;  %s132_s3 = inlined_call_operand.vmem [shape: bf16[16,32], index: 3, kind: output, shape index: {}]  }
   0x1   :  { %v14_v0 = vld [vmem:[%s129_s0] sm:$0xff]  ;;  %v15_v1 = vld [vmem:[%s129_s0 + $0x8] sm:$0xff] }
   0x2   :  { %v17_v2 = vsel %vm16_vm0, %v14_v0, 0.0  ;;  %v20_v3 = vsel %vm16_vm0, %v15_v1, 0.0  ;;  %v77_v21 = vld [vmem:[%s130_s1] ss:$0 sm:$0xff] }
   0x3   :  { %18 = vadd.xlane.f32.xlu0 %v17_v2  ;;  %v78_v23 = vld [vmem:[%s131_s2] ss:$0 sm:$0xff] }
   0x7   :  { %21 = vadd.xlane.f32.xlu0 %v20_v3 }
  0x90   :  { %v19_v4 = vpop.xlane.xlu0 %18 }
  0x91   :  { %v24_v5 = vmul.f32 0.03125, %v19_v4 }
  0x93   :  { %v26_v6 = vsub.f32 %v14_v0, %v24_v5 }
  0x94   :  { %v22_v7 = vpop.xlane.xlu0 %21 }
  0x95   :  { %v25_v8 = vmul.f32 0.03125, %v22_v7  ;;  %v28_v9 = vmul.f32 %v26_v6, %v26_v6 }
  0x97   :  { %v27_v10 = vsub.f32 %v15_v1, %v25_v8  ;;  %v30_v11 = vsel %vm16_vm0, %v28_v9, 0.0 }
  0x98   :  { %31 = vadd.xlane.f32.xlu1 %v30_v11 }
  0x99   :  { %v29_v12 = vmul.f32 %v27_v10, %v27_v10 }
  0x9b   :  { %v33_v13 = vsel %vm16_vm0, %v29_v12, 0.0 }
  0x9c   :  { %34 = vadd.xlane.f32.xlu1 %v33_v13 }
 0x125   :  { %v32_v14 = vpop.xlane.xlu1 %31 }
 0x126   :  { %v36_v15 = vmul.f32 0.03125, %v32_v14 }
 0x128   :  { %v38_v16 = vadd.f32 1e-12, %v36_v15 }
 0x129   :  { %v35_v17 = vpop.xlane.xlu1 %34 }
 0x12a   :  { %83 = vrsqrt.f32 %v38_v16  ;;  %v37_v18 = vmul.f32 0.03125, %v35_v17 }
 0x12c   :  { %v39_v19 = vadd.f32 1e-12, %v37_v18 }
 0x12e   :  { %85 = vrsqrt.f32 %v39_v19 }
 0x134   :  { %v84_v20 = vpop.eup %83 }
 0x135   :  { %v42_v22 = vmul.f32 %v84_v20, %v26_v6 }
 0x137   :  { %v51_v24 = vmul.f32 %v77_v21, %v42_v22 }
 0x138   :  { %v86_v25 = vpop.eup %85 }
 0x139   :  { %v60_v26 = vadd.f32 %v78_v23, %v51_v24  ;;  %v43_v27 = vmul.f32 %v86_v25, %v27_v10 }
 0x13b   :  { %v81_v28 = vpack.c.bf16 %v60_v26, %v60_v26  ;;  %v52_v29 = vmul.f32 %v77_v21, %v43_v27 }
 0x13d   :  { %71 = vst.msk [vmem:[%s132_s3] sm:$0xf] %vm70_vm1, %v81_v28  ;;  %v61_v30 = vadd.f32 %v78_v23, %v52_v29 }
 0x13f   :  { %v82_v31 = vpack.c.bf16 %v61_v30, %v61_v30 }
 0x141   :  { %72 = vst.msk [vmem:[%s132_s3 + $0x4] sm:$0xf] %vm70_vm1, %v82_v31 }

// kernel: decoder_forward.22
= control target key start
LH: loop header
LB: loop body
LE: loop exit
PB: predicated region body
PF: predicated region fallthrough
CT: control target
= control target key end

     0   :  { %s1830_s0 = inlined_call_operand.vmem [shape: bf16[2,8,96], index: 0, kind: input, shape index: {}]   ;;  %s1831_s1 = inlined_call_operand.vmem [shape: f32[2,1,8], index: 1, kind: input, shape index: {}]   ;;  %s1832_s2 = inlined_call_operand.vmem [shape: bf16[2,8,32], index: 2, kind: output, shape index: {0}]   ;;  %s1833_s3 = inlined_call_operand.hbm [shape: bf16[2,4,8,8], index: 3, kind: output, shape index: {1}]   ;;  %s1834_s4 = inlined_call_operand.hbm [shape: bf16[2,4,8,8], index: 4, kind: output, shape index: {2}]   ;;  %s1835_s5 = inlined_call_operand.hbm [shape: bf16[2,4,8,8], index: 5, kind: output, shape index: {3}]  }
   0x1   :  { %1841 = sst [smem:[#allocation9_spill]] %s1830_s0 }
   0x2   :  { %1842 = sst [smem:[#allocation10_spill]] %s1831_s1 }
   0x3   :  { %1843 = sst [smem:[#allocation11_spill]] %s1834_s4 }
   0x4   :  { %11 = vsyncpa [#allocation3], 0 }
   0x5   :  { %13 = vsyncpa [#allocation3 + $0x1], 0 }
   0x6   :  { %14 = vsyncpa [#allocation5], 0 }
   0x7   :  { %16 = vsyncpa [#allocation5 + $0x1], 0  ;;  %s1482_s18 = smov 0   ;;  %s1484_s19 = smov 0  }
   0x8   :  { %s1486_s20 = smov 0   ;;  %s1488_s21 = smov 0  }
   0x9   :  { %s1490_s22 = smov 0   ;;  %s1492_s23 = smov 0  }
   0xa LB: > { %s1085_s24 = sadd.s32 4294967295, %s1430_s23   ;;  %s1836_s25 = sadd.s32 4294967294, %s1430_s23   ;;  %s1430_s23 = sphi %s1492_s23, %s22_s23   ;;  %s1426_s22 = sphi %s1490_s22, %s1860_s22   ;;  %s1422_s21 = sphi %s1488_s21, %s1859_s21   ;;  %s1418_s20 = sphi %s1486_s20, %s1858_s20   ;;  %s1414_s19 = sphi %s1484_s19, %s1857_s19   ;;  %s1410_s18 = sphi %s1482_s18, %s1856_s18  }
   0xb   : > { %s34_s26 = sadd.s32 1, %s1426_s22  ;;  %s125_s27 = sadd.s32 1, %s1418_s20 }
   0xc   : > { %p36_p0 = scmp.ge.s32.totalorder %s34_s26, 2  ;;  %p135_p1 = scmp.ne.s32.totalorder %s1418_s20, %s1414_s19 }
   0xd   : > { %p136_p2 = scmp.eq.s32.totalorder %s1085_s24, 1  ;;  %p141_p3 = scmp.ne.s32.totalorder %s1414_s19, %s1410_s18 }
   0xe   : > { %s1862_s26 = smov (%p36_p0, %s34_s26), 0  ;;  %p142_p5 = scmp.eq.s32.totalorder %s1836_s25, 1 }
   0xf   : > { %p1524_p4 = por %p136_p2, %p135_p1  ;;  %s120_s29 = ssub.s32 %s1426_s22, %s1862_s26 }
  0x10   : > { %p1089_p6 = scmp.ge.s32.totalorder %s1430_s23, 1  ;;  %p123_p7 = scmp.eq.s32.totalorder %s120_s29, 0 }
  0x11   : > { %p1533_p8 = por %p142_p5, %p141_p3  ;;  %p232_p9 = scmp.lt.s32.totalorder %s1430_s23, 3 }
  0x12   : > { %s1539_s6 = scalar_select %p123_p7, %s1418_s20, %s125_s27  }
  0x13   : > { %p233_p10 = pnand %p1089_p6, %p232_p9 }
  0x14   : > { %p282_p11 = scmp.lt.s32.totalorder (!%p233_p10), %s1422_s21, 1  ;;  %v1432_v0 = vmov (!%p233_p10), 0.0   ;;  %vm1433_vm0 = vmmov (!%p233_p10), 0   ;;  %s1846_s0 = sld [smem:[#allocation9_spill]] (!%p233_p10)  ;;  %vm326_vm1 = vcmask (!%p233_p10), 64512   ;;  %v305_v5 = vlaneseq (!%p233_p10) }
  0x15   : > { %236 = sbr.rel (%p233_p10) target bundleno = 1666 (0x682), region = 28  ;;  %1145 = vmatprep.subr.bf16.mxu0 (!%p233_p10), %v1432_v0  ;;  %1147 = vmatprep.mubr.msk.bf16.mxu0 (!%p233_p10), %vm1433_vm0, %v1432_v0  ;;  %s1434_s12 = smov (!%p233_p10), 96   ;;  %vm400_vm3 = vcmask (!%p233_p10), 1043456   ;;  %vm385_vm4 = vcmask (!%p233_p10), 60416  }
  0x16   : > { %1151 = vmatprep.subr.bf16.mxu1 (!%p233_p10), %v1432_v0  ;;  %1153 = vmatprep.mubr.msk.bf16.mxu1 (!%p233_p10), %vm1433_vm0, %v1432_v0  ;;  %s1435_s13 = smov (!%p233_p10), 64   ;;  %s1436_s14 = smov (!%p233_p10), 88   ;;  %v306_v6 = vshrl.u32 (!%p233_p10), %v305_v5, 7  ;;  %v308_v7 = vand.u32 (!%p233_p10), 127, %v305_v5 }
  0x17   : > { %s1847_s1 = sld [smem:[#allocation10_spill]] (!%p233_p10)  ;;  %s1437_s27 = smov (!%p233_p10), 72  }
  0x18   : > { %vm309_vm2 = vcmp.le.s32.totalorder (!%p233_p10), %v308_v7, %v306_v6  ;;  %s1438_s29 = smov (!%p233_p10), 120   ;;  %s1439_s9 = smov (!%p233_p10), 80  }
  0x19   : > { %v1095_v9 = vsel (!%p233_p10), %vm309_vm2, 1.0, %v1432_v0  ;;  %s1440_s10 = smov (!%p233_p10), 112   ;;  %s1840_s15 = sand.u32 (!%p233_p10), 1, %s1414_s19  }
  0x1a   : > { %s1597_s16 = sshll.u32 (!%p233_p10), %s1840_s15, 4  ;;  %s1684_s25 = sshll.u32 (!%p233_p10), %s1422_s21, 8 }
  0x1b   : > { %s1848_s4 = sld [smem:[#allocation11_spill]] (!%p233_p10) }
  0x1c   : > { %s1546_s7 = scalar_select %p282_p11, %s1422_s21, 1 }
  0x1d   : > { %s1447_s21 = smov [#allocation4]  }
  0x1e   : > { %s1837_s8 = sshll.u32 %s1546_s7, 2  ;;  %s291_s17 = scalar_lea.vmem %s1847_s1, %s1546_s7 }
  0x1f   : > { %s288_s11 = scalar_lea.vmem %s1846_s0, %s1837_s8  ;;  %v1096_v8 = vld [vmem:[%s291_s17] ss:$0 sm:$0xff]  ;;  %s1602_s17 = scalar_lea.vmem [#allocation2], %s1597_s16 }
  0x20   : > { %v1557_v1 = vld [vmem:[%s288_s11] sm:$0xf]  ;;  %v318_v10 = vmul.f32 %v1096_v8, %v1095_v9  ;;  %s1441_s11 = smov 104  }
  0x21   : > { %v1561_v2 = vcombine.low %v1557_v1, %v1557_v1  ;;  %s1692_s8 = scalar_lea.hbm %s1848_s4, %s1684_s25 }
  0x22   : > { %v319_v11 = vsub.f32 1.0, %v318_v10 }
  0x23   : > { %324 = vrot.lane.b32.xlu0 %v1561_v2, %s1434_s12  ;;  %395 = vrot.lane.b32.xlu1 %v1561_v2, %s1435_s13 }
  0x24   : > { %v1580_v12 = vmul.f32 -10000.0, %v319_v11 }
  0x27   : > { %446 = vrot.lane.b32.xlu1 %v1561_v2, %s1436_s14 }
  0x95   : > { %v325_v3 = vpop.permute.xlu0 %324  ;;  %v396_v19 = vpop.permute.xlu1 %395 }
  0x96   : > { %v331_v4 = vsel %vm326_vm1, %v325_v3, 0  ;;  %v402_v20 = vsel %vm400_vm3, %v396_v19, 0 }
  0x97   : > { %1146 = vmatpush3.bf16.xpose.msra.mxu0 %v331_v4  ;;  %1152 = vmatpush3.bf16.msra.mxu1 %v402_v20 }
  0x98   : > { %1163 = vmatprep.subr.bf16.mxu0 %v1432_v0  ;;  %1157 = vmatprep.subr.bf16.mxu1 %v1432_v0 }
  0x99   : > { %v447_v26 = vpop.permute.xlu1 %446 }
  0x9a   : > { %v452_v32 = vsel %vm326_vm1, %v447_v26, 0 }
  0x9e   : > { %1148 = vmatmul.mubr.msk.bf16.vlgmr.msra.gmra.mrb[0].mxu0 %vm326_vm1, %v1557_v1 }
  0x9f   : > { %1165 = vmatprep.mubr.msk.bf16.mxu0 %vm1433_vm0, %v1432_v0 }
 0x171   : > { %v367_v13 = vpop.f32.mrb[0].mxu0 }
 0x172   : > { %v368_v14 = vadd.f32 %v367_v13, %v1580_v12  ;;  %v1149_v15 = vpop.f32.mrb[1].mxu0 }
 0x173   : > { %v370_v16 = vpop.f32.mrb[2].mxu0 }
 0x174   : > { %v1150_v17 = vpop.f32.mrb[3].mxu0  ;;  %v373_v18 = vsel %vm326_vm1, %v368_v14, -inf }
 0x175   : > { %374 = vmax.xlane.f32.xlu0 %v373_v18 }
 0x18b   : > { %690 = vrot.lane.b32.xlu0 %v1561_v2, %s1437_s27 }
 0x202   : > { %v375_v21 = vpop.xlane.xlu0 %374 }
 0x203   : > { %v376_v22 = vsub.f32 %v368_v14, %v375_v21 }
 0x205   : > { %v377_v23 = vmul.f32 1.442695, %v376_v22 }
 0x206   : > { %v691_v35 = vpop.permute.xlu0 %690 }
 0x207   : > { %1276 = vpow2.f32 %v377_v23  ;;  %v696_v37 = vsel %vm326_vm1, %v691_v35, 0 }
 0x211   : > { %v1277_v24 = vpop.eup %1276 }
 0x212   : > { %v379_v25 = vsel %vm326_vm1, %v1277_v24, 0.0 }
 0x213   : > { %380 = vadd.xlane.f32.xlu1 %v379_v25 }
 0x224   : > { %444 = vrot.lane.b32.xlu1 %v1561_v2, %s1438_s29  ;;  %s1442_s29 = smov 56  }
 0x228   : > { %568 = vrot.lane.b32.xlu1 %v1561_v2, %s1439_s9 }
 0x22c   : > { %566 = vrot.lane.b32.xlu1 %v1561_v2, %s1440_s10  ;;  %s1838_s10 = smov 48  }
 0x230   : > { %688 = vrot.lane.b32.xlu1 %v1561_v2, %s1441_s11  ;;  %s1839_s11 = smov 40  }
 0x2a0   : > { %v381_v27 = vpop.xlane.xlu1 %380 }
 0x2a1   : > { %1278 = vrcp.f32 %v381_v27 }
 0x2a4   : > { %v445_v30 = vpop.permute.xlu1 %444 }
 0x2a8   : > { %v569_v33 = vpop.permute.xlu1 %568 }
 0x2a9   : > { %v574_v34 = vsel %vm326_vm1, %v569_v33, 0 }
 0x2ab   : > { %v1279_v28 = vpop.eup %1278 }
 0x2ac   : > { %v383_v29 = vmul.f32 %v1279_v28, %v1277_v24  ;;  %v567_v36 = vpop.permute.xlu1 %566 }
 0x2ae   : > { %v384_v31 = vpack.c.bf16 %v383_v29, %v383_v29 }
 0x2b0   : > { %1154 = vmatmul.mubr.msk.bf16.vlgmr.msra.gmra.mrb[0].mxu1 %vm326_vm1, %v384_v31  ;;  %386 = vst.msk [vmem:[%s1602_s17] sm:$0xf] %vm385_vm4, %v384_v31  ;;  %v689_v38 = vpop.permute.xlu1 %688 }
 0x2b1   : > { %1158 = vmatpush3.bf16.xpose.msra.mxu1 %v452_v32  ;;  %1159 = vmatprep.mubr.msk.bf16.mxu1 %vm1433_vm0, %v1432_v0 }
 0x2b2   : > { %1169 = vmatprep.subr.bf16.mxu1 %v1432_v0 }
 0x2b8   : > { %1160 = vmatmul.mubr.msk.bf16.vlgmr.msra.gmra.mrb[4].mxu1 %vm326_vm1, %v445_v30 }
 0x2b9   : > { %1170 = vmatpush3.bf16.xpose.msra.mxu1 %v574_v34  ;;  %1171 = vmatprep.mubr.msk.bf16.mxu1 %vm1433_vm0, %v1432_v0 }
 0x2ba   : > { %1181 = vmatprep.subr.bf16.mxu1 %v1432_v0 }
 0x2c0   : > { %1172 = vmatmul.mubr.msk.bf16.vlgmr.msra.gmra.mrb[8].mxu1 %vm326_vm1, %v567_v36 }
 0x2c1   : > { %1182 = vmatpush3.bf16.xpose.msra.mxu1 %v696_v37  ;;  %1183 = vmatprep.mubr.msk.bf16.mxu1 %vm1433_vm0, %v1432_v0 }
 0x2c8   : > { %1184 = vmatmul.mubr.msk.bf16.vlgmr.msra.gmra.mrb[12].mxu1 %vm326_vm1, %v689_v38 }
 0x383   : > { %v1619_v39 = vpop.f32.mrb[0].mxu1 }
 0x384   : > { %v1155_v40 = vpop.f32.mrb[1].mxu1 }
 0x385   : > { %v441_v41 = vpop.f32.mrb[2].mxu1 }
 0x386   : > { %v1156_v42 = vpop.f32.mrb[3].mxu1 }
 0x38b   : > { %v488_v43 = vpop.f32.mrb[4].mxu1 }
 0x38c   : > { %v489_v44 = vadd.f32 %v488_v43, %v1580_v12  ;;  %v1161_v45 = vpop.f32.mrb[5].mxu1 }
 0x38d   : > { %v491_v46 = vpop.f32.mrb[6].mxu1 }
 0x38e   : > { %v1162_v47 = vpop.f32.mrb[7].mxu1  ;;  %v494_v48 = vsel %vm326_vm1, %v489_v44, -inf }
 0x38f   : > { %495 = vmax.xlane.f32.xlu1 %v494_v48 }
 0x393   : > { %v610_v49 = vpop.f32.mrb[8].mxu1 }
 0x394   : > { %v611_v50 = vadd.f32 %v610_v49, %v1580_v12  ;;  %v1173_v51 = vpop.f32.mrb[9].mxu1 }
 0x395   : > { %v613_v52 = vpop.f32.mrb[10].mxu1 }
 0x396   : > { %v616_v53 = vsel %vm326_vm1, %v611_v50, -inf  ;;  %v1174_v54 = vpop.f32.mrb[11].mxu1 }
 0x397   : > { %617 = vmax.xlane.f32.xlu0 %v616_v53 }
 0x39b   : > { %v732_v55 = vpop.f32.mrb[12].mxu1 }
 0x39c   : > { %v733_v56 = vadd.f32 %v732_v55, %v1580_v12  ;;  %v1185_v57 = vpop.f32.mrb[13].mxu1 }
 0x39d   : > { %v735_v58 = vpop.f32.mrb[14].mxu1 }
 0x39e   : > { %v738_v59 = vsel %vm326_vm1, %v733_v56, -inf  ;;  %v1186_v60 = vpop.f32.mrb[15].mxu1 }
 0x39f   : > { %739 = vmax.xlane.f32.xlu1 %v738_v59 }
 0x41c   : > { %v496_v61 = vpop.xlane.xlu1 %495 }
 0x41d   : > { %v497_v62 = vsub.f32 %v489_v44, %v496_v61 }
 0x41f   : > { %v498_v63 = vmul.f32 1.442695, %v497_v62 }
 0x421   : > { %1280 = vpow2.f32 %v498_v63 }
 0x424   : > { %v618_v10 = vpop.xlane.xlu0 %617 }
 0x425   : > { %v619_v11 = vsub.f32 %v611_v50, %v618_v10 }
 0x427   : > { %v620_v12 = vmul.f32 1.442695, %v619_v11 }
 0x42b   : > { %v1281_v3 = vpop.eup %1280 }
 0x42c   : > { %v740_v4 = vpop.xlane.xlu1 %739  ;;  %v500_v5 = vsel %vm326_vm1, %v1281_v3, 0.0 }
 0x42d   : > { %v741_v6 = vsub.f32 %v733_v56, %v740_v4  ;;  %501 = vadd.xlane.f32.xlu1 %v500_v5 }
 0x42f   : > { %v742_v7 = vmul.f32 1.442695, %v741_v6 }
 0x431   : > { %1282 = vpow2.f32 %v742_v7 }
 0x432   : > { %1284 = vpow2.f32 %v620_v12 }
 0x43b   : > { %v1283_v8 = vpop.eup %1282 }
 0x43c   : > { %v744_v9 = vsel %vm326_vm1, %v1283_v8, 0.0  ;;  %v1285_v13 = vpop.eup %1284 }
 0x43d   : > { %745 = vadd.xlane.f32.xlu0 %v744_v9  ;;  %v622_v14 = vsel %vm326_vm1, %v1285_v13, 0.0 }
 0x43e   : > { %518 = vrot.lane.b32.xlu1 %v1561_v2, %s1442_s29 }
 0x453   : > { %640 = vrot.lane.b32.xlu0 %v1561_v2, %s1838_s10 }
 0x457   : > { %391 = vrot.lane.b32.xlu0 %v1557_v1, %s1435_s13 }
 0x45b   : > { %752 = vrot.lane.b32.xlu0 %v1557_v1, %s1437_s27  ;;  %s1445_s27 = smov 8  }
 0x462   : > { %623 = vadd.xlane.f32.xlu1 %v622_v14 }
 0x473   : > { %762 = vrot.lane.b32.xlu1 %v1561_v2, %s1839_s11  ;;  %s1296_s11 = sshll.u32 %s1447_s21, 4  ;;  %s1297_s11 = int_to_ptr.vmem [resolvable:$false] %s1296_s11 }
 0x474   : > { %s1298_s15 = scalar_lea.vmem %s1297_s11, 512 }
 0x477   : > { %387 = vrot.lane.b32.xlu1 %v1557_v1, %s1434_s12  ;;  %s1665_s12 = scalar_lea.vmem [#allocation6], %s1597_s16 }
 0x47b   : > { %508 = vrot.lane.b32.xlu1 %v1557_v1, %s1436_s14  ;;  %s274_s14 = scalar_lea.vmem [#allocation4], %s1597_s16  ;;  %s866_s16 = sshll.u32 %s1602_s17, 4  ;;  %s1686_s16 = int_to_ptr.vmem [resolvable:$true] %s866_s16 }
 0x47f   : > { %630 = vrot.lane.b32.xlu1 %v1557_v1, %s1439_s9  ;;  %s884_s9 = sshll.u32 %s274_s14, 4  ;;  %s1677_s9 = int_to_ptr.vmem [resolvable:$true] %s884_s9 }
 0x480   : > { %p1299_p1 = scmp.lt.s32.totalorder %s1677_s9, %s1297_s11 }
 0x483   : > { %513 = vrot.lane.b32.xlu1 %v1557_v1, %s1442_s29  ;;  %s1681_s29 = sand.u32 1, %s1085_s24   ;;  %s1292_s24 = scalar_lea.vmem %s1677_s9, 256 }
 0x484   : > { %p1293_p12 = scmp.ne.s32.totalorder %s1677_s9, %s1292_s24  ;;  %p1300_p2 = scmp.lt.s32.totalorder %s1298_s15, %s1292_s24 }
 0x486   : > { %p1294_p13 = pnand %p1293_p12, %p1524_p4  ;;  %p1301_p3 = por %p1300_p2, %p1299_p1 }
 0x488   : > { %p1295_p0 = pneg %p1294_p13 }
 0x48a   : > { %p1302_p5 = pnand %p1301_p3, %p1295_p0 }
 0x4ba   : > { %v502_v15 = vpop.xlane.xlu1 %501 }
 0x4bb   : > { %1286 = vrcp.f32 %v502_v15 }
 0x4be   : > { %v519_v16 = vpop.permute.xlu1 %518 }
 0x4bf   : > { %v524_v17 = vsel %vm400_vm3, %v519_v16, 0 }
 0x4c0   : > { %1164 = vmatpush3.bf16.msra.mxu0 %v524_v17 }
 0x4c1   : > { %1175 = vmatprep.subr.bf16.mxu0 %v1432_v0 }
 0x4c5   : > { %v1287_v2 = vpop.eup %1286 }
 0x4c6   : > { %v504_v18 = vmul.f32 %v1287_v2, %v1281_v3 }
 0x4c8   : > { %v505_v19 = vpack.c.bf16 %v504_v18, %v504_v18 }
 0x4ca   : > { %1166 = vmatmul.mubr.msk.bf16.vlgmr.msra.gmra.mrb[4].mxu0 %vm326_vm1, %v505_v19  ;;  %v746_v20 = vpop.xlane.xlu0 %745  ;;  %1101 = vst.msk [vmem:[%s1602_s17 + $0x4] sm:$0xf] %vm385_vm4, %v505_v19 }
 0x4cb   : > { %1288 = vrcp.f32 %v746_v20  ;;  %1177 = vmatprep.mubr.msk.bf16.mxu0 %vm1433_vm0, %v1432_v0 }
 0x4ce   : > { %v641_v21 = vpop.permute.xlu0 %640 }
 0x4cf   : > { %v646_v22 = vsel %vm400_vm3, %v641_v21, 0 }
 0x4d0   : > { %1176 = vmatpush3.bf16.msra.mxu0 %v646_v22 }
 0x4d1   : > { %1187 = vmatprep.subr.bf16.mxu0 %v1432_v0 }
 0x4d2   : > { %v392_v32 = vpop.permute.xlu0 %391 }
 0x4d3   : > { %394 = vst.msk [vmem:[%s1665_s12] sm:$0xf] %vm385_vm4, %v392_v32 }
 0x4d5   : > { %v1289_v23 = vpop.eup %1288 }
 0x4d6   : > { %v748_v24 = vmul.f32 %v1289_v23, %v1283_v8  ;;  %v753_v33 = vpop.permute.xlu0 %752 }
 0x4d7   : > { %1112 = vst.msk [vmem:[%s274_s14 + $0xc] sm:$0xf] %vm385_vm4, %v753_v33 }
 0x4d8   : > { %v749_v25 = vpack.c.bf16 %v748_v24, %v748_v24 }
 0x4da   : > { %1111 = vst.msk [vmem:[%s1602_s17 + $0xc] sm:$0xf] %vm385_vm4, %v749_v25 }
 0x4ef   : > { %v624_v26 = vpop.xlane.xlu1 %623 }
 0x4f0   : > { %1290 = vrcp.f32 %v624_v26 }
 0x4f3   : > { %v763_v28 = vpop.permute.xlu1 %762 }
 0x4f4   : > { %v768_v30 = vsel %vm400_vm3, %v763_v28, 0 }
 0x4f7   : > { %v388_v34 = vpop.permute.xlu1 %387 }
 0x4f8   : > { %390 = vst.msk [vmem:[%s274_s14] sm:$0xf] %vm385_vm4, %v388_v34 }
 0x4fa   : > { %v1291_v27 = vpop.eup %1290 }
 0x4fb   : > { %v626_v29 = vmul.f32 %v1291_v27, %v1285_v13  ;;  %v509_v35 = vpop.permute.xlu1 %508 }
 0x4fc   : > { %1102 = vst.msk [vmem:[%s274_s14 + $0x4] sm:$0xf] %vm385_vm4, %v509_v35 }
 0x4fd   : > { %v627_v31 = vpack.c.bf16 %v626_v29, %v626_v29 }
 0x4ff   : > { %1178 = vmatmul.mubr.msk.bf16.vlgmr.msra.gmra.mrb[8].mxu0 %vm326_vm1, %v627_v31  ;;  %1106 = vst.msk [vmem:[%s1602_s17 + $0x8] sm:$0xf] %vm385_vm4, %v627_v31 }
 0x500   : > { %1188 = vmatpush3.bf16.msra.mxu0 %v768_v30  ;;  %1189 = vmatprep.mubr.msk.bf16.mxu0 %vm1433_vm0, %v1432_v0  ;;  %v631_v0 = vpop.permute.xlu1 %630 }
 0x501   : > { %1107 = vst.msk [vmem:[%s274_s14 + $0x8] sm:$0xf] %vm385_vm4, %v631_v0 }
 0x504   : > { %v514_v37 = vpop.permute.xlu1 %513 }
 0x505   : > { %1103 = vst.msk [vmem:[%s1665_s12 + $0x4] sm:$0xf] %vm385_vm4, %v514_v37 }
 0x507   : > { %1190 = vmatmul.mubr.msk.bf16.vlgmr.msra.gmra.mrb[12].mxu0 %vm326_vm1, %v749_v25 }
 0x59d   : > { %v560_v36 = vpop.f32.mrb[4].mxu0 }
 0x59e   : > { %811 = vrot.lane.b32.xlu0 %v560_v36, %s1445_s27  ;;  %v1167_v38 = vpop.f32.mrb[5].mxu0  ;;  %s1446_s27 = smov 16  }
 0x59f   : > { %v563_v40 = vpop.f32.mrb[6].mxu0 }
 0x5a0   : > { %v1168_v41 = vpop.f32.mrb[7].mxu0 }
 0x5d2   : > { %v682_v42 = vpop.f32.mrb[8].mxu0 }
 0x5d3   : > { %815 = vrot.lane.b32.xlu1 %v682_v42, %s1446_s27  ;;  %v1179_v43 = vpop.f32.mrb[9].mxu0 }
 0x5d4   : > { %v685_v44 = vpop.f32.mrb[10].mxu0 }
 0x5d5   : > { %1305 = shalt.err (!%p1302_p5)
}
 0x5d6   : > { %s1306_s27 = scalar_lea.hbm %s1692_s8, 256  ;;  %s1310_s21 = scalar_lea.hbm %s1848_s4, 512 }
 0x5d7   : > { %p1307_p6 = scmp.ne.s32.totalorder %s1692_s8, %s1306_s27  ;;  %p1311_p10 = scmp.lt.u32.totalorder %s1692_s8, %s1848_s4 }
 0x5d8   : > { %p1312_p11 = scmp.lt.u32.totalorder %s1310_s21, %s1306_s27  ;;  %p1314_p13 = scmp.lt.u32.totalorder %s1306_s27, %s1692_s8 }
 0x5d9   : > { %p1308_p7 = pnand %p1307_p6, %p1524_p4 }
 0x5da   : > { %p1313_p12 = por %p1312_p11, %p1311_p10 }
 0x5db   : > { %p1309_p9 = pneg %p1308_p7 }
 0x5dc   : > { %p1315_p0 = por %p1314_p13, %p1313_p12 }
 0x5de   : > { %p1316_p1 = pnand %p1315_p0, %p1309_p9 }
 0x5e0   : > { %1319 = shalt.err (!%p1316_p1)
}
 0x5e1   : > { %s1448_s15 = smov 4   ;;  %s1849_s24 = scalar_lea.sflag [#allocation5], %s1681_s29  ;;  %v1180_v45 = vpop.f32.mrb[11].mxu0 }
 0x5e2   : > { %1194 = dma.vmem_to_hbm [thread:$0]  (%p1524_p4), %s1677_s9, 256, %s1692_s8, %s1849_s24, %s1435_s13, %s1435_s13, %s1448_s15  }
 0x5e3   : > { %s1725_s14 = scalar_lea.hbm %s1833_s3, %s1684_s25  ;;  %s1850_s17 = sand.u32 1, %s1414_s19  }
 0x5e4   : > { %s1729_s21 = scalar_lea.sflag [#allocation3], %s1850_s17  ;;  %s1320_s11 = scalar_lea.vmem %s1686_s16, 256 }
 0x5e5   : > { %p1321_p2 = scmp.ne.s32.totalorder %s1686_s16, %s1320_s11  ;;  %s1449_s0 = smov [#allocation2]  }
 0x5e6   : > { %s1324_s1 = sshll.u32 %s1449_s0, 4  ;;  %s1325_s1 = int_to_ptr.vmem [resolvable:$false] %s1324_s1 }
 0x5e7   : > { %p1322_p3 = pnand %p1321_p2, %p1524_p4  ;;  %s1326_s4 = scalar_lea.vmem %s1325_s1, 512 }
 0x5e8   : > { %p1327_p6 = scmp.lt.s32.totalorder %s1686_s16, %s1325_s1  ;;  %p1328_p7 = scmp.lt.s32.totalorder %s1326_s4, %s1320_s11 }
 0x5e9   : > { %p1323_p5 = pneg %p1322_p3 }
 0x5ea   : > { %p1329_p9 = por %p1328_p7, %p1327_p6 }
 0x5ec   : > { %p1330_p10 = pnand %p1329_p9, %p1323_p5 }
 0x5ee   : > { %1333 = shalt.err (!%p1330_p10)
}
 0x5ef   : > { %s1334_s8 = scalar_lea.hbm %s1725_s14, 256  ;;  %s1338_s0 = scalar_lea.hbm %s1833_s3, 512 }
 0x5f0   : > { %p1335_p11 = scmp.ne.s32.totalorder %s1725_s14, %s1334_s8  ;;  %p1339_p0 = scmp.lt.u32.totalorder %s1725_s14, %s1833_s3 }
 0x5f1   : > { %p1340_p1 = scmp.lt.u32.totalorder %s1338_s0, %s1334_s8  ;;  %p1342_p3 = scmp.lt.u32.totalorder %s1334_s8, %s1725_s14 }
 0x5f2   : > { %p1336_p12 = pnand %p1335_p11, %p1524_p4 }
 0x5f3   : > { %p1341_p2 = por %p1340_p1, %p1339_p0 }
 0x5f4   : > { %p1337_p13 = pneg %p1336_p12 }
 0x5f5   : > { %p1343_p5 = por %p1342_p3, %p1341_p2 }
 0x5f7   : > { %p1344_p6 = pnand %p1343_p5, %p1337_p13 }
 0x5f9   : > { %1347 = shalt.err (!%p1344_p6)
}
 0x5fa   : > { %1193 = dma.vmem_to_hbm [thread:$0]  (%p1524_p4), %s1686_s16, 256, %s1725_s14, %s1729_s21, %s1435_s13, %s1435_s13, %s1448_s15   ;;  %v804_v46 = vpop.f32.mrb[12].mxu0  ;;  %vm823_vm5 = vcmask 130048   ;;  %vm825_vm6 = vcmask 195584   ;;  %vm828_vm7 = vcmask 257024  }
 0x5fb   : > { %s1851_s4 = smov 40   ;;  %s1450_s27 = smov 24   ;;  %v1191_v47 = vpop.f32.mrb[13].mxu0 }
 0x5fc   : > { %757 = vrot.lane.b32.xlu1 %v1557_v1, %s1851_s4  ;;  %819 = vrot.lane.b32.xlu0 %v804_v46, %s1450_s27  ;;  %v807_v48 = vpop.f32.mrb[14].mxu0  ;;  %s1852_s17 = smov 48   ;;  %s902_s16 = sshll.u32 %s1665_s12, 4  ;;  %s1770_s16 = int_to_ptr.vmem [resolvable:$true] %s902_s16 }
 0x5fd   : > { %v1192_v49 = vpop.f32.mrb[15].mxu0  ;;  %s1853_s14 = sshll.u32 %s1546_s7, 2  ;;  %s1776_s0 = scalar_lea.hbm %s1835_s5, %s1684_s25 }
 0x5fe   : > { %s298_s8 = scalar_lea.vmem %s1832_s2, %s1853_s14  ;;  %s1348_s7 = scalar_lea.vmem %s1770_s16, 256 }
 0x5ff   : > { %p1349_p7 = scmp.ne.s32.totalorder %s1770_s16, %s1348_s7  ;;  %s1451_s10 = smov [#allocation6]  }
 0x600   : > { %635 = vrot.lane.b32.xlu0 %v1557_v1, %s1852_s17  ;;  %s1352_s1 = sshll.u32 %s1451_s10, 4  ;;  %s1353_s1 = int_to_ptr.vmem [resolvable:$false] %s1352_s1 }
 0x601   : > { %p1350_p9 = pnand %p1349_p7, %p1524_p4  ;;  %s1354_s4 = scalar_lea.vmem %s1353_s1, 512 }
 0x602   : > { %p1355_p11 = scmp.lt.s32.totalorder %s1770_s16, %s1353_s1  ;;  %p1356_p12 = scmp.lt.s32.totalorder %s1354_s4, %s1348_s7 }
 0x603   : > { %p1351_p10 = pneg %p1350_p9 }
 0x604   : > { %p1357_p13 = por %p1356_p12, %p1355_p11 }
 0x606   : > { %p1358_p0 = pnand %p1357_p13, %p1351_p10 }
 0x610   : > { %v812_v51 = vpop.permute.xlu0 %811 }
 0x611   : > { %v822_v53 = vsel %vm326_vm1, %v1619_v39, %v812_v51 }
 0x645   : > { %v816_v50 = vpop.permute.xlu1 %815 }
 0x646   : > { %v824_v54 = vsel %vm823_vm5, %v822_v53, %v816_v50 }
 0x66e   : > { %v758_v52 = vpop.permute.xlu1 %757  ;;  %v820_v55 = vpop.permute.xlu0 %819 }
 0x66f   : > { %1113 = vst.msk [vmem:[%s1665_s12 + $0xc] sm:$0xf] %vm385_vm4, %v758_v52  ;;  %v826_v1 = vsel %vm825_vm6, %v824_v54, %v820_v55 }
 0x670   : > { %v827_v56 = vpack.c.bf16 %v826_v1, %v826_v1 }
 0x672   : > { %829 = vst.msk [vmem:[%s298_s8] sm:$0xf] %vm828_vm7, %v827_v56  ;;  %v636_v39 = vpop.permute.xlu0 %635 }
 0x673   : > { %1108 = vst.msk [vmem:[%s1665_s12 + $0x8] sm:$0xf] %vm385_vm4, %v636_v39 }
 0x674   : > { %1361 = shalt.err (!%p1358_p0)
}
 0x675   : > { %s1362_s25 = scalar_lea.hbm %s1776_s0, 256  ;;  %s1366_s17 = scalar_lea.hbm %s1835_s5, 512 }
 0x676   : > { %p1363_p1 = scmp.ne.s32.totalorder %s1776_s0, %s1362_s25  ;;  %p1367_p5 = scmp.lt.u32.totalorder %s1776_s0, %s1835_s5 }
 0x677   : > { %p1368_p6 = scmp.lt.u32.totalorder %s1366_s17, %s1362_s25  ;;  %p1370_p9 = scmp.lt.u32.totalorder %s1362_s25, %s1776_s0 }
 0x678   : > { %p1364_p2 = pnand %p1363_p1, %p1524_p4 }
 0x679   : > { %p1369_p7 = por %p1368_p6, %p1367_p5 }
 0x67a   : > { %p1365_p3 = pneg %p1364_p2 }
 0x67b   : > { %p1371_p10 = por %p1370_p9, %p1369_p7 }
 0x67d   : > { %p1372_p11 = pnand %p1371_p10, %p1365_p3 }
 0x67f   : > { %1375 = shalt.err (!%p1372_p11)
}
 0x680   : > { %s1854_s11 = scalar_lea.sflag [#allocation5], %s1681_s29 }
 0x681   : > { %1195 = dma.vmem_to_hbm [thread:$0]  (%p1524_p4), %s1770_s16, 256, %s1776_s0, %s1854_s11, %s1435_s13, %s1435_s13, %s1448_s15  }
 0x682 PF: > { %p1209_p12 = scmp.ge.s32.totalorder %s1430_s23, 2  ;;  %s927_s8 = sand.u32 1, %s1410_s18  }
 0x683   : > { %s928_s9 = scalar_lea.sflag [#allocation3], %s927_s8 }
 0x684   : > { %p1200_p13 = pnand %p1209_p12, %p1533_p8 }
 0x686   : > { %1401 = dma.done.wait (!%p1200_p13), %s928_s9, 256  }
 0x687   : > { %1403 = vsyncadd (!%p1200_p13), %s928_s9, 4294967040  ;;  %s1855_s28 = sadd.s32 4294967294, %s1430_s23  }
 0x688   : > { %s936_s24 = sand.u32 1, %s1855_s28  }
 0x689   : > { %s937_s7 = scalar_lea.sflag [#allocation5], %s936_s24 }
 0x68a   : > { %1405 = dma.done.wait (!%p1200_p13), %s937_s7, 512  }
 0x68b   : > { %1407 = vsyncadd (!%p1200_p13), %s937_s7, 4294966784  ;;  %s22_s23 = sadd.s32 1, %s1430_s23   ;;  %s1856_s18 = smov %s1414_s19 }
 0x68c   : > { %p19_p4 = scmp.ge.s32.totalorder %s22_s23, 4   ;;  %s1857_s19 = smov %s1418_s20 }
 0x68d   : > { %s1858_s20 = smov %s1539_s6  ;;  %s1859_s21 = smov %s1426_s22 }
 0x68e   : > { %s1860_s22 = smov %s1862_s26  ;;  %21 = sbr.rel (!%p19_p4) target bundleno = 10 (0xa), region = 119 }
 0x695   :  { %951 = vsyncpa [#allocation3], 1 }
 0x696   :  { %953 = vsyncpa [#allocation3 + $0x1], 1 }
 0x697   :  { %954 = vsyncpa [#allocation5], 1 }
 0x698   :  { %956 = vsyncpa [#allocation5 + $0x1], 1 }

// kernel: decoder_forward.24
= control target key start
LH: loop header
LB: loop body
LE: loop exit
PB: predicated region body
PF: predicated region fallthrough
CT: control target
= control target key end

     0   :  { %vm19_vm0 = vcmask 261120   ;;  %v150_v0 = vmov 0.0   ;;  %vm151_vm1 = vmmov 0   ;;  %vm118_vm2 = vcmask 257024   ;;  %s195_s1 = inlined_call_operand.vmem [shape: bf16[32,32], index: 1, kind: input, shape index: {}]   ;;  %s196_s0 = inlined_call_operand.vmem [shape: bf16[16,32], index: 0, kind: input, shape index: {}]   ;;  %s197_s2 = inlined_call_operand.vmem [shape: f32[1,32], index: 2, kind: input, shape index: {}]   ;;  %s198_s3 = inlined_call_operand.vmem [shape: bf16[16,32], index: 3, kind: output, shape index: {}]  }
   0x1   :  { %137 = vmatprep.subr.bf16.mxu0 %v150_v0  ;;  %v147_v1 = vld [vmem:[%s195_s1] sm:$0xff]   ;;  %141 = vmatprep.mubr.msk.bf16.mxu0 %vm151_vm1, %v150_v0  ;;  %20 = vst.msk [vmem:[#allocation2] sm:$0xff] %vm19_vm0, %v150_v0  ;;  %21 = vst.msk [vmem:[#allocation2 + $0x8] sm:$0xff] %vm19_vm0, %v150_v0  ;;  %v148_v2 = vld [vmem:[%s195_s1 + $0x8] sm:$0xff]  }
   0x2   :  { %138 = vmatpush3.bf16.msra.mxu0 %v147_v1  ;;  %v149_v3 = vld [vmem:[%s196_s0] sm:$0xff]  }
   0x3   :  { %139 = vmatprep.subr.bf16.mxu0 %v150_v0  ;;  %v129_v12 = vld [vmem:[%s197_s2] ss:$0 sm:$0xff] }
   0x6   :  { %140 = vmatpush3.bf16.msra.mxu0 %v148_v2 }
   0x8   :  { %v22_v4 = vld [vmem:[#allocation2] sm:$0xff]  ;;  %v23_v6 = vld [vmem:[#allocation2 + $0x8] sm:$0xff] }
   0x9   :  { %142 = vmatmul.mubr.msk.bf16.vlgmr.msra.gmra.mrb[0].mxu0 %vm19_vm0, %v149_v3 }
  0xdc   :  { %v85_v5 = vpop.f32.mrb[0].mxu0 }
  0xdd   :  { %v92_v7 = vadd.f32 %v85_v5, %v22_v4  ;;  %v143_v8 = vpop.f32.mrb[1].mxu0 }
  0xde   :  { %v88_v9 = vpop.f32.mrb[2].mxu0 }
  0xdf   :  { %94 = vst.msk [vmem:[#allocation2] sm:$0xff] %vm19_vm0, %v92_v7  ;;  %v93_v10 = vadd.f32 %v88_v9, %v23_v6  ;;  %v144_v11 = vpop.f32.mrb[3].mxu0 }
  0xe1   :  { %95 = vst.msk [vmem:[#allocation2 + $0x8] sm:$0xff] %vm19_vm0, %v93_v10 }
  0xe6   :  { %v99_v13 = vld [vmem:[#allocation2] sm:$0xff] }
  0xe7   :  { %v108_v14 = vadd.f32 %v129_v12, %v99_v13 }
  0xe8   :  { %v100_v15 = vld [vmem:[#allocation2 + $0x8] sm:$0xff] }
  0xe9   :  { %v132_v16 = vpack.c.bf16 %v108_v14, %v108_v14  ;;  %v109_v17 = vadd.f32 %v129_v12, %v100_v15 }
  0xeb   :  { %119 = vst.msk [vmem:[%s198_s3] sm:$0xf] %vm118_vm2, %v132_v16  ;;  %v133_v18 = vpack.c.bf16 %v109_v17, %v109_v17 }
  0xed   :  { %120 = vst.msk [vmem:[%s198_s3 + $0x4] sm:$0xf] %vm118_vm2, %v133_v18 }

// kernel: decoder_forward.25
= control target key start
LH: loop header
LB: loop body
LE: loop exit
PB: predicated region body
PF: predicated region fallthrough
CT: control target
= control target key end

     0   :  { %vm19_vm0 = vcmask 523264   ;;  %v151_v0 = vmov 0.0   ;;  %vm152_vm1 = vmmov 0   ;;  %vm47_vm2 = vcmask 261120   ;;  %s195_s1 = inlined_call_operand.vmem [shape: bf16[32,64], index: 1, kind: input, shape index: {}]   ;;  %s196_s0 = inlined_call_operand.vmem [shape: bf16[16,32], index: 0, kind: input, shape index: {}]   ;;  %s197_s2 = inlined_call_operand.vmem [shape: f32[1,64], index: 2, kind: input, shape index: {}]   ;;  %s198_s3 = inlined_call_operand.vmem [shape: bf16[16,64], index: 3, kind: output, shape index: {}]  }
   0x1   :  { %138 = vmatprep.subr.bf16.mxu0 %v151_v0  ;;  %v148_v1 = vld [vmem:[%s195_s1] sm:$0xff]   ;;  %142 = vmatprep.mubr.msk.bf16.mxu0 %vm152_vm1, %v151_v0  ;;  %20 = vst.msk [vmem:[#allocation2] sm:$0xff] %vm19_vm0, %v151_v0  ;;  %21 = vst.msk [vmem:[#allocation2 + $0x8] sm:$0xff] %vm19_vm0, %v151_v0  ;;  %v149_v2 = vld [vmem:[%s195_s1 + $0x8] sm:$0xff]   ;;  %vm119_vm3 = vcmask 519168  }
   0x2   :  { %139 = vmatpush3.bf16.msra.mxu0 %v148_v1  ;;  %v150_v3 = vld [vmem:[%s196_s0] sm:$0xff]  }
   0x3   :  { %140 = vmatprep.subr.bf16.mxu0 %v151_v0  ;;  %v130_v12 = vld [vmem:[%s197_s2] ss:$0 sm:$0xff] }
   0x6   :  { %141 = vmatpush3.bf16.msra.mxu0 %v149_v2 }
   0x8   :  { %v22_v4 = vld [vmem:[#allocation2] sm:$0xff]  ;;  %v23_v6 = vld [vmem:[#allocation2 + $0x8] sm:$0xff] }
   0x9   :  { %143 = vmatmul.mubr.msk.bf16.vlgmr.msra.gmra.mrb[0].mxu0 %vm47_vm2, %v150_v3 }
  0xdc   :  { %v85_v5 = vpop.f32.mrb[0].mxu0 }
  0xdd   :  { %v92_v7 = vadd.f32 %v85_v5, %v22_v4  ;;  %v144_v8 = vpop.f32.mrb[1].mxu0 }
  0xde   :  { %v88_v9 = vpop.f32.mrb[2].mxu0 }
  0xdf   :  { %95 = vst.msk [vmem:[#allocation2] sm:$0xff] %vm19_vm0, %v92_v7  ;;  %v93_v10 = vadd.f32 %v88_v9, %v23_v6  ;;  %v145_v11 = vpop.f32.mrb[3].mxu0 }
  0xe1   :  { %96 = vst.msk [vmem:[#allocation2 + $0x8] sm:$0xff] %vm19_vm0, %v93_v10 }
  0xe6   :  { %v100_v13 = vld [vmem:[#allocation2] sm:$0xff] }
  0xe7   :  { %v109_v14 = vadd.f32 %v130_v12, %v100_v13 }
  0xe8   :  { %v101_v15 = vld [vmem:[#allocation2 + $0x8] sm:$0xff] }
  0xe9   :  { %v133_v16 = vpack.c.bf16 %v109_v14, %v109_v14  ;;  %v110_v17 = vadd.f32 %v130_v12, %v101_v15 }
  0xeb   :  { %120 = vst.msk [vmem:[%s198_s3] sm:$0xf] %vm119_vm3, %v133_v16  ;;  %v134_v18 = vpack.c.bf16 %v110_v17, %v110_v17 }
  0xed   :  { %121 = vst.msk [vmem:[%s198_s3 + $0x4] sm:$0xf] %vm119_vm3, %v134_v18 }

// kernel: decoder_forward.28
= control target key start
LH: loop header
LB: loop body
LE: loop exit
PB: predicated region body
PF: predicated region fallthrough
CT: control target
= control target key end

     0   :  { %vm19_vm0 = vcmask 523264   ;;  %v165_v0 = vmov 0.0   ;;  %vm166_vm1 = vmmov 0   ;;  %vm47_vm2 = vcmask 261120   ;;  %s209_s1 = inlined_call_operand.vmem [shape: bf16[32,64], index: 1, kind: input, shape index: {}]   ;;  %s210_s0 = inlined_call_operand.vmem [shape: bf16[16,32], index: 0, kind: input, shape index: {}]   ;;  %s211_s2 = inlined_call_operand.vmem [shape: f32[1,64], index: 2, kind: input, shape index: {}]   ;;  %s212_s3 = inlined_call_operand.vmem [shape: bf16[16,64], index: 3, kind: output, shape index: {}]  }
   0x1   :  { %148 = vmatprep.subr.bf16.mxu0 %v165_v0  ;;  %v158_v1 = vld [vmem:[%s209_s1] sm:$0xff]   ;;  %152 = vmatprep.mubr.msk.bf16.mxu0 %vm166_vm1, %v165_v0  ;;  %20 = vst.msk [vmem:[#allocation2] sm:$0xff] %vm19_vm0, %v165_v0  ;;  %21 = vst.msk [vmem:[#allocation2 + $0x8] sm:$0xff] %vm19_vm0, %v165_v0  ;;  %v159_v2 = vld [vmem:[%s209_s1 + $0x8] sm:$0xff]   ;;  %vm129_vm3 = vcmask 519168  }
   0x2   :  { %149 = vmatpush3.bf16.msra.mxu0 %v158_v1  ;;  %v160_v3 = vld [vmem:[%s210_s0] sm:$0xff]  }
   0x3   :  { %150 = vmatprep.subr.bf16.mxu0 %v165_v0  ;;  %v140_v12 = vld [vmem:[%s211_s2] ss:$0 sm:$0xff] }
   0x6   :  { %151 = vmatpush3.bf16.msra.mxu0 %v159_v2 }
   0x8   :  { %v22_v4 = vld [vmem:[#allocation2] sm:$0xff]  ;;  %v23_v6 = vld [vmem:[#allocation2 + $0x8] sm:$0xff] }
   0x9   :  { %153 = vmatmul.mubr.msk.bf16.vlgmr.msra.gmra.mrb[0].mxu0 %vm47_vm2, %v160_v3 }
  0xdc   :  { %v85_v5 = vpop.f32.mrb[0].mxu0 }
  0xdd   :  { %v92_v7 = vadd.f32 %v85_v5, %v22_v4  ;;  %v154_v8 = vpop.f32.mrb[1].mxu0 }
  0xde   :  { %v88_v9 = vpop.f32.mrb[2].mxu0 }
  0xdf   :  { %95 = vst.msk [vmem:[#allocation2] sm:$0xff] %vm19_vm0, %v92_v7  ;;  %v93_v10 = vadd.f32 %v88_v9, %v23_v6  ;;  %v155_v11 = vpop.f32.mrb[3].mxu0 }
  0xe1   :  { %96 = vst.msk [vmem:[#allocation2 + $0x8] sm:$0xff] %vm19_vm0, %v93_v10 }
  0xe6   :  { %v100_v13 = vld [vmem:[#allocation2] sm:$0xff] }
  0xe7   :  { %v109_v14 = vadd.f32 %v140_v12, %v100_v13 }
  0xe8   :  { %v101_v15 = vld [vmem:[#allocation2 + $0x8] sm:$0xff] }
  0xe9   :  { %v113_v16 = vmul.f32 0.70710677, %v109_v14  ;;  %v110_v17 = vadd.f32 %v140_v12, %v101_v15  ;;  %v111_v20 = vmul.f32 0.5, %v109_v14 }
  0xeb   :  { %161 = verf.f32 %v113_v16  ;;  %v114_v18 = vmul.f32 0.70710677, %v110_v17  ;;  %v112_v24 = vmul.f32 0.5, %v110_v17 }
  0xed   :  { %163 = verf.f32 %v114_v18 }
  0xf5   :  { %v162_v19 = vpop.eup %161 }
  0xf6   :  { %v117_v21 = vadd.f32 1.0, %v162_v19 }
  0xf7   :  { %v164_v22 = vpop.eup %163 }
  0xf8   :  { %v119_v23 = vmul.f32 %v117_v21, %v111_v20  ;;  %v118_v25 = vadd.f32 1.0, %v164_v22 }
  0xfa   :  { %v143_v26 = vpack.c.bf16 %v119_v23, %v119_v23  ;;  %v120_v27 = vmul.f32 %v118_v25, %v112_v24 }
  0xfc   :  { %130 = vst.msk [vmem:[%s212_s3] sm:$0xf] %vm129_vm3, %v143_v26  ;;  %v144_v28 = vpack.c.bf16 %v120_v27, %v120_v27 }
  0xfe   :  { %131 = vst.msk [vmem:[%s212_s3 + $0x4] sm:$0xf] %vm129_vm3, %v144_v28 }

// kernel: decoder_forward.26
= control target key start
LH: loop header
LB: loop body
LE: loop exit
PB: predicated region body
PF: predicated region fallthrough
CT: control target
= control target key end

     0   :  { %s943_s9 = smov 0   ;;  %s945_s10 = smov 0   ;;  %s1045_s0 = inlined_call_operand.vmem [shape: bf16[2,8,32], index: 0, kind: input, shape index: {}]   ;;  %s1046_s1 = inlined_call_operand.vmem [shape: bf16[2,8,64], index: 1, kind: input, shape index: {}]   ;;  %s1047_s2 = inlined_call_operand.vmem [shape: bf16[2,8,32], index: 2, kind: output, shape index: {}]  }
   0x1   :  { %s947_s11 = smov 0  }
   0x2 LB: > { %s24_s12 = sadd.s32 1, %s910_s10  ;;  %p758_p0 = scmp.ge.s32.totalorder %s914_s11, 1  ;;  %s914_s11 = sphi %s947_s11, %s12_s11   ;;  %s910_s10 = sphi %s945_s10, %s1049_s10   ;;  %s906_s9 = sphi %s943_s9, %s1048_s9  }
   0x3   : > { %p26_p1 = scmp.ge.s32.totalorder %s24_s12, 2  ;;  %p144_p2 = scmp.lt.s32.totalorder %s914_s11, 3 }
   0x5   : > { %s1051_s12 = smov (%p26_p1, %s24_s12), 0  ;;  %p145_p3 = pnand %p758_p0, %p144_p2 }
   0x6   : > { %p177_p4 = scmp.lt.s32.totalorder (!%p145_p3), %s906_s9, 1  ;;  %v916_v0 = vmov (!%p145_p3), 0.0   ;;  %vm917_vm0 = vmmov (!%p145_p3), 0   ;;  %vm201_vm1 = vcmask (!%p145_p3), 64512   ;;  %s918_s20 = smov (!%p145_p3), 96   ;;  %vm268_vm2 = vcmask (!%p145_p3), 1043456  }
   0x7   : > { %148 = sbr.rel (%p145_p3) target bundleno = 1438 (0x59e), region = 28  ;;  %790 = vmatprep.subr.bf16.mxu0 (!%p145_p3), %v916_v0  ;;  %792 = vmatprep.mubr.msk.bf16.mxu0 (!%p145_p3), %vm917_vm0, %v916_v0  ;;  %s919_s21 = smov (!%p145_p3), 120   ;;  %vm658_vm3 = vcmask (!%p145_p3), 130048   ;;  %vm660_vm4 = vcmask (!%p145_p3), 195584   ;;  %vm663_vm5 = vcmask (!%p145_p3), 257024  }
   0x8   : > { %796 = vmatprep.subr.bf16.mxu1 (!%p145_p3), %v916_v0  ;;  %798 = vmatprep.mubr.msk.bf16.mxu1 (!%p145_p3), %vm917_vm0, %v916_v0  ;;  %s920_s22 = smov (!%p145_p3), 112   ;;  %s921_s23 = smov (!%p145_p3), 104  }
   0x9   : > { %s922_s24 = smov (!%p145_p3), 88   ;;  %s923_s25 = smov (!%p145_p3), 72  }
   0xa   : > { %s924_s26 = smov (!%p145_p3), 80   ;;  %s925_s27 = smov (!%p145_p3), 8  }
   0xb   : > { %s926_s28 = smov (!%p145_p3), 16   ;;  %s927_s29 = smov (!%p145_p3), 24  }
   0xe   : > { %s1053_s9 = smov (!%p177_p4, %s906_s9), 1 }
   0xf   : > { %s967_s13 = sshll.u32 %s1053_s9, 2 }
  0x10   : > { %s190_s16 = scalar_lea.vmem %s1046_s1, %s967_s13  ;;  %s183_s19 = scalar_lea.vmem %s1045_s0, %s967_s13 }
  0x11   : > { %v200_v1 = vld [vmem:[%s190_s16] sm:$0xf]  ;;  %s197_s4 = scalar_lea.vmem %s1047_s2, %s967_s13 }
  0x12   : > { %v206_v2 = vsel %vm201_vm1, %v200_v1, 0  ;;  %v199_v3 = vld [vmem:[%s183_s19] sm:$0xf]  ;;  %v983_v9 = vcombine.low %v200_v1, %v200_v1 }
  0x13   : > { %791 = vmatpush3.bf16.xpose.msra.mxu0 %v206_v2  ;;  %v765_v10 = vcombine.low %v199_v3, %v199_v3 }
  0x14   : > { %808 = vmatprep.subr.bf16.mxu0 %v916_v0  ;;  %263 = vrot.lane.b32.xlu1 %v983_v9, %s918_s20 }
  0x18   : > { %317 = vrot.lane.b32.xlu1 %v983_v9, %s919_s21 }
  0x1a   : > { %793 = vmatmul.mubr.msk.bf16.vlgmr.msra.gmra.mrb[0].mxu0 %vm201_vm1, %v199_v3 }
  0x1b   : > { %810 = vmatprep.mubr.msk.bf16.mxu0 %vm917_vm0, %v916_v0 }
  0x1c   : > { %427 = vrot.lane.b32.xlu1 %v983_v9, %s920_s22 }
  0x20   : > { %425 = vrot.lane.b32.xlu1 %v765_v10, %s920_s22 }
  0x24   : > { %537 = vrot.lane.b32.xlu1 %v983_v9, %s921_s23 }
  0x28   : > { %535 = vrot.lane.b32.xlu1 %v765_v10, %s921_s23 }
  0x86   : > { %v264_v16 = vpop.permute.xlu1 %263 }
  0x87   : > { %v270_v17 = vsel %vm268_vm2, %v264_v16, 0 }
  0x88   : > { %797 = vmatpush3.bf16.msra.mxu1 %v270_v17 }
  0x89   : > { %802 = vmatprep.subr.bf16.mxu1 %v916_v0 }
  0x8a   : > { %v318_v20 = vpop.permute.xlu1 %317 }
  0x8b   : > { %v323_v22 = vsel %vm201_vm1, %v318_v20, 0 }
  0x8e   : > { %v428_v24 = vpop.permute.xlu1 %427 }
  0x8f   : > { %v433_v27 = vsel %vm201_vm1, %v428_v24, 0 }
  0x92   : > { %v426_v26 = vpop.permute.xlu1 %425 }
  0x96   : > { %v538_v28 = vpop.permute.xlu1 %537 }
  0x97   : > { %v543_v29 = vsel %vm201_vm1, %v538_v28, 0 }
  0x9a   : > { %v536_v30 = vpop.permute.xlu1 %535 }
  0xed   : > { %v242_v4 = vpop.f32.mrb[0].mxu0 }
  0xee   : > { %v794_v5 = vpop.f32.mrb[1].mxu0  ;;  %v248_v6 = vsel %vm201_vm1, %v242_v4, -inf }
  0xef   : > { %249 = vmax.xlane.f32.xlu0 %v248_v6  ;;  %v245_v7 = vpop.f32.mrb[2].mxu0 }
  0xf0   : > { %v795_v8 = vpop.f32.mrb[3].mxu0 }
 0x17c   : > { %v250_v11 = vpop.xlane.xlu0 %249 }
 0x17d   : > { %v251_v12 = vsub.f32 %v242_v4, %v250_v11 }
 0x17f   : > { %v252_v13 = vmul.f32 1.442695, %v251_v12 }
 0x181   : > { %876 = vpow2.f32 %v252_v13 }
 0x18b   : > { %v877_v14 = vpop.eup %876 }
 0x18c   : > { %v254_v15 = vsel %vm201_vm1, %v877_v14, 0.0 }
 0x18d   : > { %255 = vadd.xlane.f32.xlu0 %v254_v15 }
 0x1a3   : > { %315 = vrot.lane.b32.xlu0 %v765_v10, %s919_s21 }
 0x21a   : > { %v256_v18 = vpop.xlane.xlu0 %255 }
 0x21b   : > { %878 = vrcp.f32 %v256_v18 }
 0x21e   : > { %v316_v25 = vpop.permute.xlu0 %315 }
 0x225   : > { %v879_v19 = vpop.eup %878 }
 0x226   : > { %v258_v21 = vmul.f32 %v879_v19, %v877_v14 }
 0x228   : > { %v259_v23 = vpack.c.bf16 %v258_v21, %v258_v21 }
 0x22a   : > { %799 = vmatmul.mubr.msk.bf16.vlgmr.msra.gmra.mrb[0].mxu1 %vm201_vm1, %v259_v23 }
 0x22b   : > { %803 = vmatpush3.bf16.xpose.msra.mxu1 %v323_v22  ;;  %804 = vmatprep.mubr.msk.bf16.mxu1 %vm917_vm0, %v916_v0 }
 0x22c   : > { %814 = vmatprep.subr.bf16.mxu1 %v916_v0 }
 0x232   : > { %805 = vmatmul.mubr.msk.bf16.vlgmr.msra.gmra.mrb[4].mxu1 %vm201_vm1, %v316_v25 }
 0x233   : > { %815 = vmatpush3.bf16.xpose.msra.mxu1 %v433_v27  ;;  %816 = vmatprep.mubr.msk.bf16.mxu1 %vm917_vm0, %v916_v0 }
 0x234   : > { %826 = vmatprep.subr.bf16.mxu1 %v916_v0 }
 0x23a   : > { %817 = vmatmul.mubr.msk.bf16.vlgmr.msra.gmra.mrb[8].mxu1 %vm201_vm1, %v426_v26 }
 0x23b   : > { %827 = vmatpush3.bf16.xpose.msra.mxu1 %v543_v29  ;;  %828 = vmatprep.mubr.msk.bf16.mxu1 %vm917_vm0, %v916_v0 }
 0x242   : > { %829 = vmatmul.mubr.msk.bf16.vlgmr.msra.gmra.mrb[12].mxu1 %vm201_vm1, %v536_v30 }
 0x2fd   : > { %v1007_v31 = vpop.f32.mrb[0].mxu1 }
 0x2fe   : > { %v800_v32 = vpop.f32.mrb[1].mxu1 }
 0x2ff   : > { %v309_v33 = vpop.f32.mrb[2].mxu1 }
 0x300   : > { %v801_v34 = vpop.f32.mrb[3].mxu1 }
 0x305   : > { %v359_v35 = vpop.f32.mrb[4].mxu1 }
 0x306   : > { %v806_v36 = vpop.f32.mrb[5].mxu1  ;;  %v365_v37 = vsel %vm201_vm1, %v359_v35, -inf }
 0x307   : > { %366 = vmax.xlane.f32.xlu1 %v365_v37  ;;  %v362_v38 = vpop.f32.mrb[6].mxu1 }
 0x308   : > { %v807_v39 = vpop.f32.mrb[7].mxu1 }
 0x30d   : > { %v469_v40 = vpop.f32.mrb[8].mxu1 }
 0x30e   : > { %v818_v41 = vpop.f32.mrb[9].mxu1  ;;  %v475_v42 = vsel %vm201_vm1, %v469_v40, -inf }
 0x30f   : > { %476 = vmax.xlane.f32.xlu0 %v475_v42  ;;  %v472_v43 = vpop.f32.mrb[10].mxu1 }
 0x310   : > { %v819_v44 = vpop.f32.mrb[11].mxu1 }
 0x315   : > { %v579_v45 = vpop.f32.mrb[12].mxu1 }
 0x316   : > { %v830_v46 = vpop.f32.mrb[13].mxu1  ;;  %v585_v47 = vsel %vm201_vm1, %v579_v45, -inf }
 0x317   : > { %586 = vmax.xlane.f32.xlu1 %v585_v47  ;;  %v582_v48 = vpop.f32.mrb[14].mxu1 }
 0x318   : > { %v831_v49 = vpop.f32.mrb[15].mxu1 }
 0x328   : > { %377 = vrot.lane.b32.xlu1 %v983_v9, %s922_s24 }
 0x394   : > { %v367_v50 = vpop.xlane.xlu1 %366 }
 0x395   : > { %v368_v51 = vsub.f32 %v359_v35, %v367_v50 }
 0x397   : > { %v369_v52 = vmul.f32 1.442695, %v368_v51 }
 0x399   : > { %880 = vpow2.f32 %v369_v52 }
 0x39c   : > { %v477_v53 = vpop.xlane.xlu0 %476 }
 0x39d   : > { %v478_v54 = vsub.f32 %v469_v40, %v477_v53 }
 0x39f   : > { %v479_v55 = vmul.f32 1.442695, %v478_v54 }
 0x3a1   : > { %882 = vpow2.f32 %v479_v55 }
 0x3a3   : > { %v881_v56 = vpop.eup %880 }
 0x3a4   : > { %v587_v57 = vpop.xlane.xlu1 %586  ;;  %v371_v58 = vsel %vm201_vm1, %v881_v56, 0.0 }
 0x3a5   : > { %v588_v59 = vsub.f32 %v579_v45, %v587_v57  ;;  %372 = vadd.xlane.f32.xlu0 %v371_v58 }
 0x3a7   : > { %v589_v60 = vmul.f32 1.442695, %v588_v59 }
 0x3a8   : > { %v378_v61 = vpop.permute.xlu1 %377 }
 0x3a9   : > { %884 = vpow2.f32 %v589_v60  ;;  %v383_v62 = vsel %vm268_vm2, %v378_v61, 0 }
 0x3aa   : > { %809 = vmatpush3.bf16.msra.mxu0 %v383_v62 }
 0x3ab   : > { %v883_v63 = vpop.eup %882  ;;  %820 = vmatprep.subr.bf16.mxu0 %v916_v0 }
 0x3ac   : > { %v481_v1 = vsel %vm201_vm1, %v883_v63, 0.0 }
 0x3ad   : > { %482 = vadd.xlane.f32.xlu1 %v481_v1 }
 0x3b3   : > { %v885_v2 = vpop.eup %884 }
 0x3b4   : > { %v591_v3 = vsel %vm201_vm1, %v885_v2, 0.0 }
 0x3b5   : > { %592 = vadd.xlane.f32.xlu0 %v591_v3 }
 0x3be   : > { %597 = vrot.lane.b32.xlu1 %v983_v9, %s923_s25 }
 0x3cb   : > { %487 = vrot.lane.b32.xlu0 %v983_v9, %s924_s26 }
 0x432   : > { %v373_v4 = vpop.xlane.xlu0 %372 }
 0x433   : > { %886 = vrcp.f32 %v373_v4 }
 0x43a   : > { %v483_v5 = vpop.xlane.xlu1 %482 }
 0x43b   : > { %888 = vrcp.f32 %v483_v5 }
 0x43d   : > { %v887_v6 = vpop.eup %886 }
 0x43e   : > { %v375_v7 = vmul.f32 %v887_v6, %v881_v56  ;;  %v598_v14 = vpop.permute.xlu1 %597 }
 0x43f   : > { %v603_v16 = vsel %vm268_vm2, %v598_v14, 0 }
 0x440   : > { %v376_v8 = vpack.c.bf16 %v375_v7, %v375_v7 }
 0x442   : > { %v593_v10 = vpop.xlane.xlu0 %592  ;;  %811 = vmatmul.mubr.msk.bf16.vlgmr.msra.gmra.mrb[4].mxu0 %vm201_vm1, %v376_v8 }
 0x443   : > { %890 = vrcp.f32 %v593_v10  ;;  %822 = vmatprep.mubr.msk.bf16.mxu0 %vm917_vm0, %v916_v0 }
 0x445   : > { %v889_v11 = vpop.eup %888 }
 0x446   : > { %v485_v12 = vmul.f32 %v889_v11, %v883_v63  ;;  %v488_v13 = vpop.permute.xlu0 %487 }
 0x447   : > { %v493_v9 = vsel %vm268_vm2, %v488_v13, 0 }
 0x448   : > { %821 = vmatpush3.bf16.msra.mxu0 %v493_v9  ;;  %v486_v15 = vpack.c.bf16 %v485_v12, %v485_v12 }
 0x449   : > { %832 = vmatprep.subr.bf16.mxu0 %v916_v0 }
 0x44b   : > { %823 = vmatmul.mubr.msk.bf16.vlgmr.msra.gmra.mrb[8].mxu0 %vm201_vm1, %v486_v15 }
 0x44c   : > { %833 = vmatpush3.bf16.msra.mxu0 %v603_v16  ;;  %834 = vmatprep.mubr.msk.bf16.mxu0 %vm917_vm0, %v916_v0 }
 0x44d   : > { %v891_v17 = vpop.eup %890 }
 0x44e   : > { %v595_v18 = vmul.f32 %v891_v17, %v885_v2 }
 0x450   : > { %v596_v19 = vpack.c.bf16 %v595_v18, %v595_v18 }
 0x453   : > { %835 = vmatmul.mubr.msk.bf16.vlgmr.msra.gmra.mrb[12].mxu0 %vm201_vm1, %v596_v19 }
 0x515   : > { %v419_v20 = vpop.f32.mrb[4].mxu0 }
 0x516   : > { %646 = vrot.lane.b32.xlu1 %v419_v20, %s925_s27  ;;  %v812_v21 = vpop.f32.mrb[5].mxu0 }
 0x517   : > { %v422_v22 = vpop.f32.mrb[6].mxu0 }
 0x518   : > { %v813_v23 = vpop.f32.mrb[7].mxu0 }
 0x51e   : > { %v529_v24 = vpop.f32.mrb[8].mxu0 }
 0x51f   : > { %650 = vrot.lane.b32.xlu0 %v529_v24, %s926_s28  ;;  %v824_v25 = vpop.f32.mrb[9].mxu0 }
 0x520   : > { %v532_v26 = vpop.f32.mrb[10].mxu0 }
 0x521   : > { %v825_v27 = vpop.f32.mrb[11].mxu0 }
 0x526   : > { %v639_v28 = vpop.f32.mrb[12].mxu0 }
 0x527   : > { %654 = vrot.lane.b32.xlu1 %v639_v28, %s927_s29  ;;  %v836_v0 = vpop.f32.mrb[13].mxu0 }
 0x528   : > { %v642_v29 = vpop.f32.mrb[14].mxu0 }
 0x529   : > { %v837_v30 = vpop.f32.mrb[15].mxu0 }
 0x588   : > { %v647_v32 = vpop.permute.xlu1 %646 }
 0x589   : > { %v657_v34 = vsel %vm201_vm1, %v1007_v31, %v647_v32 }
 0x591   : > { %v651_v33 = vpop.permute.xlu0 %650 }
 0x592   : > { %v659_v35 = vsel %vm658_vm3, %v657_v34, %v651_v33 }
 0x599   : > { %v655_v36 = vpop.permute.xlu1 %654 }
 0x59a   : > { %v661_v37 = vsel %vm660_vm4, %v659_v35, %v655_v36 }
 0x59b   : > { %v662_v38 = vpack.c.bf16 %v661_v37, %v661_v37 }
 0x59d   : > { %664 = vst.msk [vmem:[%s197_s4] sm:$0xf] %vm663_vm5, %v662_v38 }
 0x59e PF: > { %s12_s11 = sadd.s32 1, %s914_s11   ;;  %s1048_s9 = smov %s910_s10 }
 0x59f   : > { %p9_p5 = scmp.ge.s32.totalorder %s12_s11, 4   ;;  %s1049_s10 = smov %s1051_s12 }
 0x5a1   :  { %11 = sbr.rel (!%p9_p5) target bundleno = 2 (0x2), region = 61 }

// kernel: decoder_forward.29
= control target key start
LH: loop header
LB: loop body
LE: loop exit
PB: predicated region body
PF: predicated region fallthrough
CT: control target
= control target key end

     0   :  { %vm28_vm0 = vcmask 261120   ;;  %v247_v0 = vmov 0.0   ;;  %vm248_vm1 = vmmov 0   ;;  %vm72_vm2 = vcmask 523264   ;;  %s325_s1 = inlined_call_operand.vmem [shape: bf16[64,32], index: 1, kind: input, shape index: {}]   ;;  %s326_s0 = inlined_call_operand.vmem [shape: bf16[16,64], index: 0, kind: input, shape index: {}]   ;;  %s327_s3 = inlined_call_operand.vmem [shape: bf16[16,32], index: 3, kind: input, shape index: {}]   ;;  %s328_s2 = inlined_call_operand.vmem [shape: f32[1,32], index: 2, kind: input, shape index: {}]   ;;  %s329_s4 = inlined_call_operand.vmem [shape: f32[1,32], index: 4, kind: input, shape index: {}]   ;;  %s330_s5 = inlined_call_operand.vmem [shape: f32[1,32], index: 5, kind: input, shape index: {}]   ;;  %s331_s6 = inlined_call_operand.vmem [shape: bf16[16,32], index: 6, kind: output, shape index: {}]  }
   0x1   :  { %224 = vmatprep.subr.bf16.mxu0 %v247_v0  ;;  %v238_v1 = vld [vmem:[%s325_s1] sm:$0xff]   ;;  %232 = vmatprep.mubr.msk.bf16.mxu0 %vm248_vm1, %v247_v0  ;;  %29 = vst.msk [vmem:[#allocation2] sm:$0xff] %vm28_vm0, %v247_v0  ;;  %30 = vst.msk [vmem:[#allocation2 + $0x8] sm:$0xff] %vm28_vm0, %v247_v0  ;;  %v239_v2 = vld [vmem:[%s325_s1 + $0x8] sm:$0xff]   ;;  %vm195_vm3 = vcmask 257024  }
   0x2   :  { %225 = vmatpush3.bf16.msra.mxu0 %v238_v1  ;;  %v240_v3 = vld [vmem:[%s325_s1 + $0x10] sm:$0xff]   ;;  %v241_v4 = vld [vmem:[%s325_s1 + $0x18] sm:$0xff]   ;;  %v242_v5 = vld [vmem:[%s326_s0] sm:$0xff]  }
   0x3   :  { %226 = vmatprep.subr.bf16.mxu0 %v247_v0  ;;  %v216_v14 = vld [vmem:[%s327_s3] sm:$0xff]  }
   0x4   :  { %v208_v15 = vld [vmem:[%s328_s2] ss:$0 sm:$0xff]  ;;  %v217_v16 = vunpack.c.l.bf16 %v216_v14  ;;  %v218_v19 = vunpack.c.h.bf16 %v216_v14 }
   0x5   :  { %v209_v43 = vld [vmem:[%s329_s4] ss:$0 sm:$0xff] }
   0x6   :  { %227 = vmatpush3.bf16.msra.mxu0 %v239_v2  ;;  %v210_v45 = vld [vmem:[%s330_s5] ss:$0 sm:$0xff] }
   0x7   :  { %228 = vmatprep.subr.bf16.mxu0 %v247_v0 }
   0x8   :  { %v31_v6 = vld [vmem:[#allocation2] sm:$0xff]  ;;  %v32_v8 = vld [vmem:[#allocation2 + $0x8] sm:$0xff] }
   0xa   :  { %229 = vmatpush3.bf16.msra.mxu0 %v240_v3 }
   0xb   :  { %230 = vmatprep.subr.bf16.mxu0 %v247_v0 }
   0xe   :  { %231 = vmatpush3.bf16.msra.mxu0 %v241_v4 }
  0x11   :  { %233 = vmatmul.mubr.msk.bf16.vlgmr.msra.gmra.mrb[0].mxu0 %vm72_vm2, %v242_v5 }
  0xe4   :  { %v110_v7 = vpop.f32.mrb[0].mxu0 }
  0xe5   :  { %v117_v9 = vadd.f32 %v110_v7, %v31_v6  ;;  %v234_v10 = vpop.f32.mrb[1].mxu0 }
  0xe6   :  { %v113_v11 = vpop.f32.mrb[2].mxu0 }
  0xe7   :  { %120 = vst.msk [vmem:[#allocation2] sm:$0xff] %vm28_vm0, %v117_v9  ;;  %v118_v12 = vadd.f32 %v113_v11, %v32_v8  ;;  %v235_v13 = vpop.f32.mrb[3].mxu0 }
  0xe9   :  { %121 = vst.msk [vmem:[#allocation2 + $0x8] sm:$0xff] %vm28_vm0, %v118_v12 }
  0xee   :  { %v125_v17 = vld [vmem:[#allocation2] sm:$0xff] }
  0xef   :  { %v134_v18 = vadd.f32 %v208_v15, %v125_v17 }
  0xf0   :  { %v126_v20 = vld [vmem:[#allocation2 + $0x8] sm:$0xff] }
  0xf1   :  { %v140_v21 = vadd.f32 %v217_v16, %v134_v18  ;;  %v135_v22 = vadd.f32 %v208_v15, %v126_v20 }
  0xf3   :  { %v142_v23 = vsel %vm28_vm0, %v140_v21, 0.0  ;;  %v141_v24 = vadd.f32 %v218_v19, %v135_v22 }
  0xf4   :  { %143 = vadd.xlane.f32.xlu0 %v142_v23 }
  0xf5   :  { %v145_v25 = vsel %vm28_vm0, %v141_v24, 0.0 }
  0xf8   :  { %146 = vadd.xlane.f32.xlu0 %v145_v25 }
 0x181   :  { %v144_v26 = vpop.xlane.xlu0 %143 }
 0x182   :  { %v149_v27 = vmul.f32 0.03125, %v144_v26 }
 0x184   :  { %v151_v28 = vsub.f32 %v140_v21, %v149_v27 }
 0x185   :  { %v147_v29 = vpop.xlane.xlu0 %146 }
 0x186   :  { %v150_v30 = vmul.f32 0.03125, %v147_v29  ;;  %v153_v31 = vmul.f32 %v151_v28, %v151_v28 }
 0x188   :  { %v152_v32 = vsub.f32 %v141_v24, %v150_v30  ;;  %v155_v33 = vsel %vm28_vm0, %v153_v31, 0.0 }
 0x189   :  { %156 = vadd.xlane.f32.xlu1 %v155_v33 }
 0x18a   :  { %v154_v34 = vmul.f32 %v152_v32, %v152_v32 }
 0x18c   :  { %v158_v35 = vsel %vm28_vm0, %v154_v34, 0.0 }
 0x18d   :  { %159 = vadd.xlane.f32.xlu1 %v158_v35 }
 0x216   :  { %v157_v36 = vpop.xlane.xlu1 %156 }
 0x217   :  { %v161_v37 = vmul.f32 0.03125, %v157_v36 }
 0x219   :  { %v163_v38 = vadd.f32 1e-12, %v161_v37 }
 0x21a   :  { %v160_v39 = vpop.xlane.xlu1 %159 }
 0x21b   :  { %243 = vrsqrt.f32 %v163_v38  ;;  %v162_v40 = vmul.f32 0.03125, %v160_v39 }
 0x21d   :  { %v164_v41 = vadd.f32 1e-12, %v162_v40 }
 0x21f   :  { %245 = vrsqrt.f32 %v164_v41 }
 0x225   :  { %v244_v42 = vpop.eup %243 }
 0x226   :  { %v167_v44 = vmul.f32 %v244_v42, %v151_v28 }
 0x228   :  { %v176_v46 = vmul.f32 %v209_v43, %v167_v44 }
 0x229   :  { %v246_v47 = vpop.eup %245 }
 0x22a   :  { %v185_v48 = vadd.f32 %v210_v45, %v176_v46  ;;  %v168_v49 = vmul.f32 %v246_v47, %v152_v32 }
 0x22c   :  { %v213_v50 = vpack.c.bf16 %v185_v48, %v185_v48  ;;  %v177_v51 = vmul.f32 %v209_v43, %v168_v49 }
 0x22e   :  { %196 = vst.msk [vmem:[%s331_s6] sm:$0xf] %vm195_vm3, %v213_v50  ;;  %v186_v52 = vadd.f32 %v210_v45, %v177_v51 }
 0x230   :  { %v214_v53 = vpack.c.bf16 %v186_v52, %v186_v52 }
 0x232   :  { %197 = vst.msk [vmem:[%s331_s6 + $0x4] sm:$0xf] %vm195_vm3, %v214_v53 }

// kernel: decoder_forward.39
= control target key start
LH: loop header
LB: loop body
LE: loop exit
PB: predicated region body
PF: predicated region fallthrough
CT: control target
= control target key end

     0   :  { %9 = vsyncpa [#allocation4], 0  ;;  %s855_s0 = inlined_call_operand.vmem [shape: bf16[16,32], index: 0, kind: input, shape index: {}]   ;;  %s856_s1 = inlined_call_operand.vmem [shape: bf16[32,128], index: 1, kind: input, shape index: {}]   ;;  %s857_s2 = inlined_call_operand.vmem [shape: f32[1,128], index: 2, kind: input, shape index: {}]   ;;  %s858_s3 = inlined_call_operand.vmem [shape: f32[2,8,1], index: 3, kind: input, shape index: {}]   ;;  %s859_s4 = inlined_call_operand.hbm [shape: f32[2,8,128], index: 4, kind: output, shape index: {}]  }
   0x1   :  { %11 = vsyncpa [#allocation4 + $0x1], 0  ;;  %s731_s15 = smov 0   ;;  %s733_s16 = smov 0  }
   0x2   :  { %s735_s17 = smov 0   ;;  %s737_s18 = smov 0  }
   0x3   :  { %s739_s19 = smov 0   ;;  %s741_s20 = smov 0  }
   0x4 LB: > { %s528_s21 = sadd.s32 4294967295, %s700_s20   ;;  %s529_s22 = sadd.s32 4294967294, %s700_s20   ;;  %s700_s20 = sphi %s741_s20, %s17_s20   ;;  %s696_s19 = sphi %s739_s19, %s866_s19   ;;  %s692_s18 = sphi %s737_s18, %s865_s18   ;;  %s688_s17 = sphi %s735_s17, %s864_s17   ;;  %s684_s16 = sphi %s733_s16, %s863_s16   ;;  %s680_s15 = sphi %s731_s15, %s862_s15  }
   0x5   : > { %s36_s23 = sadd.s32 1, %s696_s19  ;;  %s153_s24 = sadd.s32 1, %s688_s17 }
   0x6   : > { %p38_p0 = scmp.ge.s32.totalorder %s36_s23, 2  ;;  %p163_p1 = scmp.ne.s32.totalorder %s688_s17, %s684_s16 }
   0x7   : > { %p164_p2 = scmp.eq.s32.totalorder %s528_s21, 1  ;;  %p169_p3 = scmp.ne.s32.totalorder %s684_s16, %s680_s15 }
   0x8   : > { %s868_s23 = smov (%p38_p0, %s36_s23), 0  ;;  %p170_p5 = scmp.eq.s32.totalorder %s529_s22, 1 }
   0x9   : > { %p771_p4 = por %p164_p2, %p163_p1  ;;  %s148_s26 = ssub.s32 %s696_s19, %s868_s23 }
   0xa   : > { %p534_p6 = scmp.ge.s32.totalorder %s700_s20, 1  ;;  %p151_p7 = scmp.eq.s32.totalorder %s148_s26, 0 }
   0xb   : > { %p778_p8 = por %p170_p5, %p169_p3  ;;  %p223_p9 = scmp.lt.s32.totalorder %s700_s20, 3 }
   0xc   : > { %s784_s28 = scalar_select %p151_p7, %s688_s17, %s153_s24  }
   0xd   : > { %p224_p10 = pnand %p534_p6, %p223_p9 }
   0xe   : > { %v616_v0 = vld [vmem:[%s856_s1] sm:$0xff] (!%p224_p10)   ;;  %v702_v1 = vmov (!%p224_p10), 0.0   ;;  %v617_v2 = vld [vmem:[%s856_s1 + $0x8] sm:$0xff] (!%p224_p10)   ;;  %vm703_vm0 = vmmov (!%p224_p10), 0   ;;  %p266_p11 = scmp.lt.s32.totalorder (!%p224_p10), %s692_s18, 1  ;;  %v704_v3 = vmov (!%p224_p10), 0  }
   0xf   : > { %227 = sbr.rel (%p224_p10) target bundleno = 311 (0x137), region = 36  ;;  %549 = vmatprep.subr.bf16.mxu0 (!%p224_p10), %v702_v1  ;;  %553 = vmatprep.mubr.msk.bf16.mxu0 (!%p224_p10), %vm703_vm0, %v702_v1  ;;  %vm313_vm1 = vcmask (!%p224_p10), 261120   ;;  %v541_v8 = vld [vmem:[%s857_s2] ss:$0 sm:$0xff] (!%p224_p10)  ;;  %s263_s26 = sand.u32 (!%p224_p10), 1, %s684_s16  }
  0x10   : > { %550 = vmatpush3.bf16.msra.mxu0 (!%p224_p10), %v616_v0  ;;  %615 = vset.pattern.permute.xlu0 (!%p224_p10), %v704_v3  ;;  %s535_s29 = sshll.u32 (!%p224_p10), %s263_s26, 3  ;;  %s543_s30 = sshll.u32 (!%p224_p10), %s692_s18, 7 }
  0x11   : > { %551 = vmatprep.subr.bf16.mxu0 (!%p224_p10), %v702_v1  ;;  %s265_s5 = scalar_lea.vmem (!%p224_p10), [#allocation3], %s535_s29  ;;  %s398_s10 = scalar_lea.sflag (!%p224_p10), [#allocation4], %s263_s26 }
  0x12   : > { %s412_s6 = sshll.u32 (!%p224_p10), %s265_s5, 4  ;;  %s810_s6 = int_to_ptr.vmem [resolvable:$true] %s412_s6 }
  0x13   : > { %s622_s11 = scalar_lea.vmem (!%p224_p10), %s810_s6, 128 }
  0x14   : > { %552 = vmatpush3.bf16.msra.mxu0 (!%p224_p10), %v617_v2  ;;  %p623_p12 = scmp.ne.s32.totalorder (!%p224_p10), %s810_s6, %s622_s11 }
  0x16   : > { %s267_s7 = scalar_select %p266_p11, %s692_s18, 1 }
  0x17   : > { %p624_p13 = pnand %p623_p12, %p771_p4  ;;  %s705_s18 = smov [#allocation3]  }
  0x18   : > { %s536_s8 = sshll.u32 %s267_s7, 2  ;;  %s537_s9 = sshll.u32 %s267_s7, 3 }
  0x19   : > { %s272_s12 = scalar_lea.vmem %s855_s0, %s536_s8  ;;  %s288_s21 = scalar_lea.vmem %s858_s3, %s537_s9 }
  0x1a   : > { %v296_v4 = vld [vmem:[%s272_s12] sm:$0xf]  ;;  %s808_s9 = scalar_lea.hbm %s859_s4, %s543_s30  ;;  %p625_p0 = pneg %p624_p13 }
  0x1b   : > { %v363_v5 = vld [vmem:[%s288_s21] sm:$0xff]  ;;  %554 = vmatmul.mubr.msk.bf16.vlgmr.msra.gmra.mrb[0].mxu0 %vm313_vm1, %v296_v4  ;;  %s626_s12 = sshll.u32 %s705_s18, 4  ;;  %s627_s12 = int_to_ptr.vmem [resolvable:$false] %s626_s12 }
  0x1c   : > { %366 = vperm.xlu0 %615, %v363_v5   ;;  %s628_s13 = scalar_lea.vmem %s627_s12, 256  ;;  %p629_p1 = scmp.lt.s32.totalorder %s810_s6, %s627_s12 }
  0x1d   : > { %p630_p2 = scmp.lt.s32.totalorder %s628_s13, %s622_s11 }
  0x1f   : > { %p631_p3 = por %p630_p2, %p629_p1 }
  0x21   : > { %p632_p5 = pnand %p631_p3, %p625_p0 }
  0x9b   : > { %v367_v6 = vpop.permute.xlu0 %366 }
  0xee   : > { %v351_v7 = vpop.f32.mrb[0].mxu0 }
  0xef   : > { %v369_v9 = vmul.f32 %v367_v6, %v351_v7  ;;  %v555_v10 = vpop.f32.mrb[1].mxu0 }
  0xf0   : > { %v354_v11 = vpop.f32.mrb[2].mxu0 }
  0xf1   : > { %v377_v12 = vadd.f32 %v541_v8, %v369_v9  ;;  %v556_v13 = vpop.f32.mrb[3].mxu0 }
  0xf3   : > { %v378_v14 = vrot.slane %v377_v12, 4 }
  0xf5   : > { %v379_v15 = vmax.f32 %v377_v12, %v378_v14 }
  0xf7   : > { %v380_v16 = vrot.slane %v379_v15, 2 }
  0xf9   : > { %v381_v17 = vmax.f32 %v379_v15, %v380_v16 }
  0xfb   : > { %v382_v18 = vrot.slane %v381_v17, 1 }
  0xfd   : > { %v383_v19 = vmax.f32 %v381_v17, %v382_v18 }
  0xff   : > { %v384_v20 = vsub.f32 %v377_v12, %v383_v19 }
 0x101   : > { %v385_v21 = vmul.f32 1.442695, %v384_v20 }
 0x103   : > { %618 = vpow2.f32 %v385_v21 }
 0x10d   : > { %v619_v22 = vpop.eup %618 }
 0x10e   : > { %v387_v23 = vrot.slane %v619_v22, 4 }
 0x110   : > { %v388_v24 = vadd.f32 %v619_v22, %v387_v23 }
 0x112   : > { %v389_v25 = vrot.slane %v388_v24, 2 }
 0x114   : > { %v390_v26 = vadd.f32 %v389_v25, %v388_v24 }
 0x116   : > { %v391_v27 = vrot.slane %v390_v26, 1 }
 0x118   : > { %v392_v28 = vadd.f32 %v391_v27, %v390_v26 }
 0x11a   : > { %620 = vlog2.f32 %v392_v28 }
 0x124   : > { %v621_v29 = vpop.eup %620 }
 0x125   : > { %v394_v30 = vmul.f32 0.6931472, %v621_v29 }
 0x127   : > { %v395_v31 = vsub.f32 %v384_v20, %v394_v30 }
 0x129   : > { %396 = vst [vmem:[%s265_s5] sm:$0xff] %v395_v31 }
 0x12a   : > { %635 = shalt.err (!%p632_p5)
}
 0x12b   : > { %s636_s14 = scalar_lea.hbm %s808_s9, 128  ;;  %s640_s24 = scalar_lea.hbm %s859_s4, 256 }
 0x12c   : > { %p637_p6 = scmp.ne.s32.totalorder %s808_s9, %s636_s14  ;;  %p641_p10 = scmp.lt.u32.totalorder %s808_s9, %s859_s4 }
 0x12d   : > { %p642_p11 = scmp.lt.u32.totalorder %s640_s24, %s636_s14  ;;  %p644_p13 = scmp.lt.u32.totalorder %s636_s14, %s808_s9 }
 0x12e   : > { %p638_p7 = pnand %p637_p6, %p771_p4 }
 0x12f   : > { %p643_p12 = por %p642_p11, %p641_p10 }
 0x130   : > { %p639_p9 = pneg %p638_p7 }
 0x131   : > { %p645_p0 = por %p644_p13, %p643_p12 }
 0x133   : > { %p646_p1 = pnand %p645_p0, %p639_p9 }
 0x135   : > { %649 = shalt.err (!%p646_p1)
}
 0x136   : > { %557 = dma.vmem_to_hbm [thread:$0]  (%p771_p4), %s810_s6, 128, %s808_s9, %s398_s10  }
 0x137 PF: > { %p563_p2 = scmp.ge.s32.totalorder %s700_s20, 2  ;;  %s424_s30 = sand.u32 1, %s680_s15  }
 0x138   : > { %s425_s5 = scalar_lea.sflag [#allocation4], %s424_s30 }
 0x139   : > { %p560_p3 = pnand %p563_p2, %p778_p8 }
 0x13b   : > { %675 = dma.done.wait (!%p560_p3), %s425_s5, 128  }
 0x13c   : > { %677 = vsyncadd (!%p560_p3), %s425_s5, 4294967168  ;;  %s17_s20 = sadd.s32 1, %s700_s20   ;;  %s862_s15 = smov %s684_s16 }
 0x13d   : > { %p14_p5 = scmp.ge.s32.totalorder %s17_s20, 4   ;;  %s863_s16 = smov %s688_s17 }
 0x13e   : > { %s864_s17 = smov %s784_s28  ;;  %s865_s18 = smov %s696_s19 }
 0x13f   : > { %s866_s19 = smov %s868_s23  ;;  %16 = sbr.rel (!%p14_p5) target bundleno = 4 (0x4), region = 88 }
 0x146   :  { %430 = vsyncpa [#allocation4], 1 }
 0x147   :  { %432 = vsyncpa [#allocation4 + $0x1], 1 }

</bundles_post_ra>
